<compile_context>
chip_gen: v7x
topology: tpu7x:2x2x1
jax: 0.10.0
libtpu: 0.0.40
codegen_flags: <defaults>
</compile_context>

<pallas_src>
import functools

import jax
import jax.numpy as jnp
from jax.experimental import pallas as pl
from jax.experimental.pallas import tpu as pltpu

EPS = 1e-6
VMEM_LIMIT = 32 * 1024 * 1024

# ----------------------------- small config -----------------------------
BATCH = 2
CHANNELS = 3
FRAMES = 2            # num_frames   (8   in the full model)
IMG = 16              # img_size     (224 in the full model)
PATCH = 8             # patch_size   (16  in the full model)
EMBED_DIM = 128       # embed_dim    (768 in the full model); lane-aligned toy dim
NUM_HEADS = 4         # num_heads    (12  in the full model)
DEPTH = 4             # depth        (12  in the full model); last 4 blocks feed the head
MLP_HIDDEN = EMBED_DIM * 4
NUM_CLASSES = 255
NUM_CLASSES_PAD = 256  # lane-dense head output, sliced back to 255

ROW_TILE = 256        # row tile for all (M, K) @ (K, N) kernels
ATTN_TILE = 128       # (sequence*head) batch tile for the attention core


def _round_up(x, m):
    return (x + m - 1) // m * m


def _compiler_params():
    return pltpu.CompilerParams(
        dimension_semantics=("parallel",),
        vmem_limit_bytes=VMEM_LIMIT)


# ----------------------------- row-tiled pallas helper -----------------------------
def _row_tiled_call(kernel, row_args, fixed_args, out_cols, out_dtype, tile=ROW_TILE):
    """Run `kernel` over row tiles of the (M, K_i) arrays in `row_args`.

    `fixed_args` (weights / biases, all 2-D) are grid-invariant and fully resident.
    Rows are zero-padded up to a multiple of the tile and sliced back afterwards.
    """
    M = row_args[0].shape[0]
    tile_m = min(tile, M)
    Mp = _round_up(M, tile_m)
    if Mp != M:
        row_args = [jnp.pad(a, ((0, Mp - M), (0, 0))) for a in row_args]
    in_specs = (
        [pl.BlockSpec((tile_m, a.shape[1]), lambda i: (i, 0)) for a in row_args]
        + [pl.BlockSpec(a.shape, lambda i: (0, 0)) for a in fixed_args])
    out = pl.pallas_call(
        kernel,
        out_shape=jax.ShapeDtypeStruct((Mp, out_cols), out_dtype),
        grid=(Mp // tile_m,),
        in_specs=in_specs,
        out_specs=pl.BlockSpec((tile_m, out_cols), lambda i: (i, 0)),
        compiler_params=_compiler_params(),
    )(*row_args, *fixed_args)
    return out[:M] if Mp != M else out


# ----------------------------- Pallas kernels -----------------------------
def _layernorm(x, g, b):
    mu = jnp.mean(x, axis=-1, keepdims=True)
    xc = x - mu
    var = jnp.mean(xc * xc, axis=-1, keepdims=True)
    return xc * jax.lax.rsqrt(var + EPS) * g + b


def _linear_kernel(x_ref, w_ref, b_ref, o_ref):
    x = x_ref[...].astype(jnp.bfloat16)
    o_ref[...] = (jnp.dot(x, w_ref[...], preferred_element_type=jnp.float32)
                  + b_ref[...]).astype(o_ref.dtype)


def linear(x, w, b):
    n = w.shape[1]
    return _row_tiled_call(_linear_kernel, [x], [w, b.reshape(1, n)], n, jnp.float32)


def _linear_residual_kernel(x_ref, res_ref, w_ref, b_ref, o_ref):
    # out = res + (x @ w + b): attention out-projection fused with residual add.
    y = (jnp.dot(x_ref[...].astype(jnp.bfloat16), w_ref[...],
                 preferred_element_type=jnp.float32) + b_ref[...])
    o_ref[...] = res_ref[...] + y


def linear_residual(x, res, w, b):
    n = w.shape[1]
    return _row_tiled_call(_linear_residual_kernel, [x, res],
                           [w, b.reshape(1, n)], n, jnp.float32)


def _ln_linear_kernel(x_ref, g_ref, b_ref, w_ref, bw_ref, o_ref):
    # Fused LayerNorm + (QKV) projection.
    xn = _layernorm(x_ref[...], g_ref[...], b_ref[...]).astype(jnp.bfloat16)
    o_ref[...] = (jnp.dot(xn, w_ref[...], preferred_element_type=jnp.float32)
                  + bw_ref[...]).astype(o_ref.dtype)


def ln_linear(x, g, b, w, bw):
    d = x.shape[1]
    n = w.shape[1]
    return _row_tiled_call(_ln_linear_kernel, [x],
                           [g.reshape(1, d), b.reshape(1, d), w, bw.reshape(1, n)],
                           n, jnp.bfloat16)


def _proj_residual_kernel(a_ref, res_ref, w1_ref, b1_ref, w2_ref, b2_ref, o_ref):
    # out = res + ((a @ w1 + b1) @ w2 + b2): attn out-proj + temporal_fc + residual.
    y = (jnp.dot(a_ref[...].astype(jnp.bfloat16), w1_ref[...],
                 preferred_element_type=jnp.float32) + b1_ref[...])
    y = (jnp.dot(y.astype(jnp.bfloat16), w2_ref[...],
                 preferred_element_type=jnp.float32) + b2_ref[...])
    o_ref[...] = res_ref[...] + y


def proj_residual(a, res, w1, b1, w2, b2):
    d1 = w1.shape[1]
    d2 = w2.shape[1]
    return _row_tiled_call(_proj_residual_kernel, [a, res],
                           [w1, b1.reshape(1, d1), w2, b2.reshape(1, d2)],
                           d2, jnp.float32)


def _mlp_kernel(x_ref, g_ref, b_ref, w1_ref, b1_ref, w2_ref, b2_ref, o_ref):
    x = x_ref[...]
    xn = _layernorm(x, g_ref[...], b_ref[...]).astype(jnp.bfloat16)
    h = jnp.dot(xn, w1_ref[...], preferred_element_type=jnp.float32) + b1_ref[...]
    # TODO(synk): PyTorch nn.GELU default is erf-exact; tanh approximation used
    # here for Mosaic-lowering portability.
    h = jax.nn.gelu(h, approximate=True).astype(jnp.bfloat16)
    y = jnp.dot(h, w2_ref[...], preferred_element_type=jnp.float32) + b2_ref[...]
    o_ref[...] = x + y


def mlp_residual(x, g, b, w1, b1, w2, b2):
    d = x.shape[1]
    hdim = w1.shape[1]
    return _row_tiled_call(_mlp_kernel, [x],
                           [g.reshape(1, d), b.reshape(1, d),
                            w1, b1.reshape(1, hdim), w2, b2.reshape(1, d)],
                           d, jnp.float32)


def _attn_core_kernel(q_ref, k_ref, v_ref, o_ref, *, scale):
    q = q_ref[...]                                  # (BH_BLK, L, dh) bf16
    k = k_ref[...]
    v = v_ref[...]
    s = jnp.einsum('bqd,bkd->bqk', q, k, preferred_element_type=jnp.float32) * scale
    s = s - jnp.max(s, axis=-1, keepdims=True)
    p = jnp.exp(s)
    p = p * pl.reciprocal(jnp.sum(p, axis=-1, keepdims=True), approx=True)
    o = jnp.einsum('bqk,bkd->bqd', p.astype(v.dtype), v,
                   preferred_element_type=jnp.float32)
    o_ref[...] = o.astype(o_ref.dtype)


def attn_core(q, k, v, tile=ATTN_TILE):
    """q/k/v: (S*H, L, dh) bf16 -> softmax(q k^T / sqrt(dh)) v, batched over (seq, head)."""
    bh, seq_len, dh = q.shape
    blk = min(tile, bh)
    bhp = _round_up(bh, blk)
    if bhp != bh:
        pad = ((0, bhp - bh), (0, 0), (0, 0))
        q, k, v = (jnp.pad(t, pad) for t in (q, k, v))
    spec = pl.BlockSpec((blk, seq_len, dh), lambda i: (i, 0, 0))
    out = pl.pallas_call(
        functools.partial(_attn_core_kernel, scale=float(dh) ** -0.5),
        out_shape=jax.ShapeDtypeStruct((bhp, seq_len, dh), jnp.bfloat16),
        grid=(bhp // blk,),
        in_specs=[spec, spec, spec],
        out_specs=spec,
        compiler_params=_compiler_params(),
    )(q, k, v)
    return out[:bh] if bhp != bh else out


def _norm_head_kernel(x_ref, g_ref, b_ref, w_ref, bw_ref, o_ref):
    # Fused final LayerNorm over each of the 4 CLS read-outs + classifier head:
    # logits = sum_i LN(cls_i) @ W[i] + b  (statically unrolled, f32 accumulate).
    acc = jnp.zeros(o_ref.shape, jnp.float32)
    for i in range(x_ref.shape[0]):
        xn = _layernorm(x_ref[i], g_ref[...], b_ref[...]).astype(jnp.bfloat16)
        acc = acc + jnp.dot(xn, w_ref[i], preferred_element_type=jnp.float32)
    o_ref[...] = acc + bw_ref[...]


def norm_head(cls_stack, g, b, w4, bias):
    """cls_stack: (n_feat, B, D) f32; w4: (n_feat, D, NC) bf16 -> (B, NC) f32."""
    n_feat, bsz, d = cls_stack.shape
    nc = w4.shape[2]
    return pl.pallas_call(
        _norm_head_kernel,
        out_shape=jax.ShapeDtypeStruct((bsz, nc), jnp.float32),
        grid=(1,),
        in_specs=[
            pl.BlockSpec((n_feat, bsz, d), lambda i: (0, 0, 0)),
            pl.BlockSpec((1, d), lambda i: (0, 0)),
            pl.BlockSpec((1, d), lambda i: (0, 0)),
            pl.BlockSpec((n_feat, d, nc), lambda i: (0, 0, 0)),
            pl.BlockSpec((1, nc), lambda i: (0, 0)),
        ],
        out_specs=pl.BlockSpec((bsz, nc), lambda i: (0, 0)),
        compiler_params=_compiler_params(),
    )(cls_stack, g.reshape(1, d), b.reshape(1, d), w4, bias.reshape(1, nc))


# ----------------------------- attention sub-block -----------------------------
def attention_block(x_seq, ln_g, ln_b, qkv_w, qkv_b, wo, bo, num_heads,
                    proj_w=None, proj_b=None, residual=None):
    """Divided-attention sub-block on (S, L, D) sequences.

    proj_w given   -> residual + temporal_fc(proj(attn(LN(x))))   (temporal path)
    residual given -> residual + proj(attn(LN(x)))                (spatial path)
    neither        -> proj(attn(LN(x)))
    """
    s, l, d = x_seq.shape
    dh = d // num_heads
    x2 = x_seq.reshape(s * l, d)

    qkv = ln_linear(x2, ln_g, ln_b, qkv_w, qkv_b)                    # (S*L, 3D) bf16
    qkv = qkv.reshape(s, l, 3, num_heads, dh).transpose(2, 0, 3, 1, 4)
    qkv = qkv.reshape(3, s * num_heads, l, dh)
    # TODO(synk): the head/seq re-layout above is an XLA transpose; it could be
    # folded into the attention BlockSpec index_map to save one HBM round trip.

    o = attn_core(qkv[0], qkv[1], qkv[2])                            # (S*H, L, dh) bf16
    o = o.reshape(s, num_heads, l, dh).transpose(0, 2, 1, 3).reshape(s * l, d)

    if proj_w is not None:
        y = proj_residual(o, residual.reshape(s * l, d), wo, bo, proj_w, proj_b)
    elif residual is not None:
        y = linear_residual(o, residual.reshape(s * l, d), wo, bo)
    else:
        y = linear(o, wo, bo)
    return y.reshape(s, l, d)


# ----------------------------- model (JAX glue around kernels) -----------------------------
def block_forward(x, p, B, T, num_heads):
    """One divided space-time block.  x: (B, 1 + HW*T, D) float32."""
    _, L, D = x.shape
    HW = (L - 1) // T

    # --- temporal attention: 'b (h w t) m -> (b h w) t m'  (+ fused temporal_fc & residual)
    xt_in = x[:, 1:, :].reshape(B * HW, T, D)
    xt = attention_block(xt_in, p['t_ln_g'], p['t_ln_b'], p['t_qkv_w'], p['t_qkv_b'],
                         p['t_wo'], p['t_bo'], num_heads,
                         proj_w=p['t_fc_w'], proj_b=p['t_fc_b'], residual=xt_in)
    xt = xt.reshape(B, HW * T, D)

    # --- spatial attention: 'b (h w t) m -> (b t) (h w) m' with replicated CLS
    init_cls = x[:, 0:1, :]                                          # (B, 1, D)
    cls_rep = jnp.broadcast_to(init_cls, (B, T, D)).reshape(B * T, 1, D)
    xs_tok = xt.reshape(B, HW, T, D).transpose(0, 2, 1, 3).reshape(B * T, HW, D)
    xs = jnp.concatenate([cls_rep, xs_tok], axis=1)                  # (B*T, 1+HW, D)
    # residual fused into the out-projection kernel; CLS rows get zero residual
    # (the CLS path averages over T and adds init_cls separately below).
    res_masked = jnp.concatenate([jnp.zeros_like(cls_rep), xs_tok], axis=1)
    res_s = attention_block(xs, p['s_ln_g'], p['s_ln_b'], p['s_qkv_w'], p['s_qkv_b'],
                            p['s_wo'], p['s_bo'], num_heads,
                            residual=res_masked)                     # (B*T, 1+HW, D)
    cls_out = res_s[:, 0, :].reshape(B, T, D).mean(axis=1, keepdims=True)   # (B, 1, D)
    cls_final = init_cls + cls_out
    x_tok = (res_s[:, 1:, :].reshape(B, T, HW, D)
             .transpose(0, 2, 1, 3).reshape(B, HW * T, D))
    x_new = jnp.concatenate([cls_final, x_tok], axis=1)              # (B, L, D)

    # --- MLP (fused LN + FC + GELU + FC + residual), row-tiled
    out2d = mlp_residual(x_new.reshape(B * L, D),
                         p['m_ln_g'], p['m_ln_b'],
                         p['m_w1'], p['m_b1'], p['m_w2'], p['m_b2'])
    return out2d.reshape(B, L, D)


def sign_model_forward(x, params):
    B, C, T, H, W = x.shape
    P = PATCH
    Hn, Wn = H // P, W // P
    HW = Hn * Wn
    D = EMBED_DIM

    # patch embedding: Conv2d(kernel=stride=P) == patch-unfold + matmul (row-tiled Pallas)
    xt = x.transpose(0, 2, 1, 3, 4).reshape(B * T, C, H, W)          # '(b t) c h w'
    patches = (xt.reshape(B * T, C, Hn, P, Wn, P)
                 .transpose(0, 2, 4, 1, 3, 5)
                 .reshape(B * T * HW, C * P * P))                    # patch flattened (c, ph, pw)
    tok = linear(patches, params['patch_w'], params['patch_b']).reshape(B * T, HW, D)

    # cls token + positional embedding
    cls = jnp.broadcast_to(params['cls_token'], (B * T, 1, D))
    tok = jnp.concatenate([cls, tok], axis=1) + params['pos_embed']  # (B*T, 1+HW, D)

    # time embedding: '(b t) n m -> (b n) t m', add, '(b n) t m -> b (n t) m'
    # (per-batch CLS taken from frame 0; all frames share the same CLS content here)
    cls_tokens = tok.reshape(B, T, 1 + HW, D)[:, 0, 0:1, :]          # (B, 1, D)
    xsp = tok[:, 1:, :].reshape(B, T, HW, D).transpose(0, 2, 1, 3)   # (B, HW, T, D)
    xsp = xsp + params['time_embed'].reshape(1, 1, T, D)
    xcur = jnp.concatenate([cls_tokens, xsp.reshape(B, HW * T, D)], axis=1)

    # transformer blocks; collect CLS of the last 4 blocks
    cls_feats = []
    depth = len(params['blocks'])
    for i, bp in enumerate(params['blocks']):
        xcur = block_forward(xcur, bp, B, T, NUM_HEADS)
        if i >= depth - 4:
            cls_feats.append(xcur[:, 0, :])
    cls_stack = jnp.stack(cls_feats, axis=0)                         # (4, B, D)

    # fused final LayerNorm + SignModel head (256 padded lanes, sliced to NUM_CLASSES)
    logits = norm_head(cls_stack, params['norm_g'], params['norm_b'],
                       params['head_w'], params['head_b'])[:, :NUM_CLASSES]
    return logits


# ----------------------------- deterministic init -----------------------------
def init_params(key):
    D, C, P, T = EMBED_DIM, CHANNELS, PATCH, FRAMES
    HW = (IMG // PATCH) ** 2
    keys = iter(jax.random.split(key, 16 + DEPTH * 16))

    def nrm(shape, dtype=jnp.bfloat16, std=0.02):
        return (std * jax.random.normal(next(keys), shape, dtype=jnp.float32)).astype(dtype)

    zeros = lambda s: jnp.zeros(s, jnp.float32)
    ones = lambda s: jnp.ones(s, jnp.float32)

    # head weight stored as (4, D, NUM_CLASSES_PAD): one (D, NC) slab per CLS read-out
    head_w = jnp.zeros((4, D, NUM_CLASSES_PAD), jnp.bfloat16)
    head_w = head_w.at[:, :, :NUM_CLASSES].set(nrm((4, D, NUM_CLASSES)))

    params = {
        'patch_w': nrm((C * P * P, D)),   # Conv2d weight (D,C,P,P) flattened (c,ph,pw) & transposed
        'patch_b': zeros((D,)),
        'cls_token': nrm((1, 1, D), jnp.float32),
        'pos_embed': nrm((1, 1 + HW, D), jnp.float32),
        'time_embed': nrm((1, T, D), jnp.float32),
        'norm_g': ones((D,)), 'norm_b': zeros((D,)),
        'head_w': head_w,
        'head_b': zeros((NUM_CLASSES_PAD,)),
        'blocks': [],
    }
    for _ in range(DEPTH):
        blk = {
            't_ln_g': ones((D,)), 't_ln_b': zeros((D,)),
            't_qkv_w': nrm((D, 3 * D)), 't_qkv_b': zeros((3 * D,)),   # fused [q | k | v]
            't_wo': nrm((D, D)), 't_bo': zeros((D,)),
            't_fc_w': nrm((D, D)), 't_fc_b': zeros((D,)),
            's_ln_g': ones((D,)), 's_ln_b': zeros((D,)),
            's_qkv_w': nrm((D, 3 * D)), 's_qkv_b': zeros((3 * D,)),
            's_wo': nrm((D, D)), 's_bo': zeros((D,)),
            'm_ln_g': ones((D,)), 'm_ln_b': zeros((D,)),
            'm_w1': nrm((D, MLP_HIDDEN)), 'm_b1': zeros((MLP_HIDDEN,)),
            'm_w2': nrm((MLP_HIDDEN, D)), 'm_b2': zeros((D,)),
        }
        params['blocks'].append(blk)
    return params


if __name__ == "__main__":
    key = jax.random.PRNGKey(0)
    pkey, xkey = jax.random.split(key)
    params = init_params(pkey)
    x = jax.random.normal(xkey, (BATCH, CHANNELS, FRAMES, IMG, IMG), dtype=jnp.float32)

    fwd = jax.jit(lambda inp: sign_model_forward(inp, params))
    out = fwd(x)
    jax.block_until_ready(out)
    assert out.shape == (BATCH, NUM_CLASSES), out.shape
    assert bool(jnp.all(jnp.isfinite(out)))
    print("KERNEL_OK")
</pallas_src>

<mosaic_0001>
module attributes {stable_mosaic.version = 11 : i64} {
  func.func @_linear_kernel(%arg0: i32, %arg1: memref<16x192xf32, #tpu.memory_space<vmem>>, %arg2: memref<192x128xbf16, #tpu.memory_space<vmem>>, %arg3: memref<1x128xf32, #tpu.memory_space<vmem>>, %arg4: memref<16x128xf32, #tpu.memory_space<vmem>>) attributes {dimension_semantics = [#tpu.dimension_semantics<parallel>], iteration_bounds = array<i64: 1>, scalar_prefetch = 0 : i64, scratch_operands = 0 : i64, tpu.core_type = #tpu.core_type<tc>, window_params = [{transform_indices = @transform_0, window_bounds = array<i64: 16, 192>}, {pipeline_mode = #tpu.pipeline_mode<synchronous>, transform_indices = @transform_1, window_bounds = array<i64: 192, 128>}, {pipeline_mode = #tpu.pipeline_mode<synchronous>, transform_indices = @transform_2, window_bounds = array<i64: 1, 128>}, {transform_indices = @transform_3, window_bounds = array<i64: 16, 128>}]} {
    %c0 = arith.constant 0 : index
    %c0_0 = arith.constant 0 : index
    %0 = vector.load %arg1[%c0, %c0_0] : memref<16x192xf32, #tpu.memory_space<vmem>>, vector<16x192xf32>
    %1 = arith.truncf %0 : vector<16x192xf32> to vector<16x192xbf16>
    %c0_1 = arith.constant 0 : index
    %c0_2 = arith.constant 0 : index
    %2 = vector.load %arg2[%c0_1, %c0_2] : memref<192x128xbf16, #tpu.memory_space<vmem>>, vector<192x128xbf16>
    %cst = arith.constant dense<0.000000e+00> : vector<16x128xf32>
    %3 = tpu.matmul %1, %2, %cst {dimension_numbers = #tpu.dot_dimension_numbers<[1], [0], [0], [1], [0, 0, 1, 1], [], []>} : vector<16x192xbf16>, vector<192x128xbf16>, vector<16x128xf32> -> vector<16x128xf32>
    %c0_3 = arith.constant 0 : index
    %c0_4 = arith.constant 0 : index
    %4 = vector.load %arg3[%c0_3, %c0_4] : memref<1x128xf32, #tpu.memory_space<vmem>>, vector<1x128xf32>
    %5 = vector.broadcast %4 : vector<1x128xf32> to vector<16x128xf32>
    %6 = arith.addf %3, %5 : vector<16x128xf32>
    %c0_5 = arith.constant 0 : index
    %c0_6 = arith.constant 0 : index
    %7 = vector.load %arg4[%c0_5, %c0_6] : memref<16x128xf32, #tpu.memory_space<vmem>>, vector<16x128xf32>
    tpu.vector_store %arg4[%c0_5, %c0_6], %6 {strides = array<i32>} : memref<16x128xf32, #tpu.memory_space<vmem>>, vector<16x128xf32>,
    return
  }
  func.func @transform_0(%arg0: i32) -> (i32, i32) {
    %c0_i32 = arith.constant 0 : i32
    %c0_i32_0 = arith.constant 0 : i32
    return %arg0, %c0_i32 : i32, i32
  }
  func.func @transform_1(%arg0: i32) -> (i32, i32) {
    %c0_i32 = arith.constant 0 : i32
    %c0_i32_0 = arith.constant 0 : i32
    %c0_i32_1 = arith.constant 0 : i32
    return %c0_i32, %c0_i32_0 : i32, i32
  }
  func.func @transform_2(%arg0: i32) -> (i32, i32) {
    %c0_i32 = arith.constant 0 : i32
    %c0_i32_0 = arith.constant 0 : i32
    %c0_i32_1 = arith.constant 0 : i32
    return %c0_i32, %c0_i32_0 : i32, i32
  }
  func.func @transform_3(%arg0: i32) -> (i32, i32) {
    %c0_i32 = arith.constant 0 : i32
    %c0_i32_0 = arith.constant 0 : i32
    return %arg0, %c0_i32 : i32, i32
  }
}

module attributes {stable_mosaic.version = 11 : i64} {
  func.func @_ln_linear_kernel(%arg0: i32, %arg1: memref<16x128xf32, #tpu.memory_space<vmem>>, %arg2: memref<1x128xf32, #tpu.memory_space<vmem>>, %arg3: memref<1x128xf32, #tpu.memory_space<vmem>>, %arg4: memref<128x384xbf16, #tpu.memory_space<vmem>>, %arg5: memref<1x384xf32, #tpu.memory_space<vmem>>, %arg6: memref<16x384xbf16, #tpu.memory_space<vmem>>) attributes {dimension_semantics = [#tpu.dimension_semantics<parallel>], iteration_bounds = array<i64: 1>, scalar_prefetch = 0 : i64, scratch_operands = 0 : i64, tpu.core_type = #tpu.core_type<tc>, window_params = [{transform_indices = @transform_0, window_bounds = array<i64: 16, 128>}, {pipeline_mode = #tpu.pipeline_mode<synchronous>, transform_indices = @transform_1, window_bounds = array<i64: 1, 128>}, {pipeline_mode = #tpu.pipeline_mode<synchronous>, transform_indices = @transform_2, window_bounds = array<i64: 1, 128>}, {pipeline_mode = #tpu.pipeline_mode<synchronous>, transform_indices = @transform_3, window_bounds = array<i64: 128, 384>}, {pipeline_mode = #tpu.pipeline_mode<synchronous>, transform_indices = @transform_4, window_bounds = array<i64: 1, 384>}, {transform_indices = @transform_5, window_bounds = array<i64: 16, 384>}]} {
    %c0 = arith.constant 0 : index
    %c0_0 = arith.constant 0 : index
    %0 = vector.load %arg1[%c0, %c0_0] : memref<16x128xf32, #tpu.memory_space<vmem>>, vector<16x128xf32>
    %c0_1 = arith.constant 0 : index
    %c0_2 = arith.constant 0 : index
    %1 = vector.load %arg2[%c0_1, %c0_2] : memref<1x128xf32, #tpu.memory_space<vmem>>, vector<1x128xf32>
    %c0_3 = arith.constant 0 : index
    %c0_4 = arith.constant 0 : index
    %2 = vector.load %arg3[%c0_3, %c0_4] : memref<1x128xf32, #tpu.memory_space<vmem>>, vector<1x128xf32>
    %cst = arith.constant dense<0.000000e+00> : vector<16xf32>
    %3 = vector.multi_reduction <add>, %0, %cst [1] : vector<16x128xf32> to vector<16xf32>
    %4 = vector.shape_cast %3 : vector<16xf32> to vector<16x1xf32>
    %cst_5 = arith.constant 1.280000e+02 : f32
    %5 = vector.broadcast %cst_5 : f32 to vector<16x1xf32>
    %6 = arith.divf %4, %5 : vector<16x1xf32>
    %7 = vector.broadcast %6 : vector<16x1xf32> to vector<16x128xf32>
    %8 = arith.subf %0, %7 : vector<16x128xf32>
    %9 = arith.mulf %8, %8 : vector<16x128xf32>
    %cst_6 = arith.constant dense<0.000000e+00> : vector<16xf32>
    %10 = vector.multi_reduction <add>, %9, %cst_6 [1] : vector<16x128xf32> to vector<16xf32>
    %11 = vector.shape_cast %10 : vector<16xf32> to vector<16x1xf32>
    %cst_7 = arith.constant 1.280000e+02 : f32
    %12 = vector.broadcast %cst_7 : f32 to vector<16x1xf32>
    %13 = arith.divf %11, %12 : vector<16x1xf32>
    %cst_8 = arith.constant 9.99999997E-7 : f32
    %14 = vector.broadcast %cst_8 : f32 to vector<16x1xf32>
    %15 = arith.addf %13, %14 : vector<16x1xf32>
    %16 = math.rsqrt %15 : vector<16x1xf32>
    %17 = vector.broadcast %16 : vector<16x1xf32> to vector<16x128xf32>
    %18 = arith.mulf %8, %17 : vector<16x128xf32>
    %19 = vector.broadcast %1 : vector<1x128xf32> to vector<16x128xf32>
    %20 = arith.mulf %18, %19 : vector<16x128xf32>
    %21 = vector.broadcast %2 : vector<1x128xf32> to vector<16x128xf32>
    %22 = arith.addf %20, %21 : vector<16x128xf32>
    %23 = arith.truncf %22 : vector<16x128xf32> to vector<16x128xbf16>
    %c0_9 = arith.constant 0 : index
    %c0_10 = arith.constant 0 : index
    %24 = vector.load %arg4[%c0_9, %c0_10] : memref<128x384xbf16, #tpu.memory_space<vmem>>, vector<128x384xbf16>
    %cst_11 = arith.constant dense<0.000000e+00> : vector<16x384xf32>
    %25 = tpu.matmul %23, %24, %cst_11 {dimension_numbers = #tpu.dot_dimension_numbers<[1], [0], [0], [1], [0, 0, 1, 1], [], []>} : vector<16x128xbf16>, vector<128x384xbf16>, vector<16x384xf32> -> vector<16x384xf32>
    %c0_12 = arith.constant 0 : index
    %c0_13 = arith.constant 0 : index
    %26 = vector.load %arg5[%c0_12, %c0_13] : memref<1x384xf32, #tpu.memory_space<vmem>>, vector<1x384xf32>
    %27 = vector.broadcast %26 : vector<1x384xf32> to vector<16x384xf32>
    %28 = arith.addf %25, %27 : vector<16x384xf32>
    %29 = arith.truncf %28 : vector<16x384xf32> to vector<16x384xbf16>
    %c0_14 = arith.constant 0 : index
    %c0_15 = arith.constant 0 : index
    %30 = vector.load %arg6[%c0_14, %c0_15] : memref<16x384xbf16, #tpu.memory_space<vmem>>, vector<16x384xbf16>
    tpu.vector_store %arg6[%c0_14, %c0_15], %29 {strides = array<i32>} : memref<16x384xbf16, #tpu.memory_space<vmem>>, vector<16x384xbf16>,
    return
  }
  func.func @transform_0(%arg0: i32) -> (i32, i32) {
    %c0_i32 = arith.constant 0 : i32
    %c0_i32_0 = arith.constant 0 : i32
    return %arg0, %c0_i32 : i32, i32
  }
  func.func @transform_1(%arg0: i32) -> (i32, i32) {
    %c0_i32 = arith.constant 0 : i32
    %c0_i32_0 = arith.constant 0 : i32
    %c0_i32_1 = arith.constant 0 : i32
    return %c0_i32, %c0_i32_0 : i32, i32
  }
  func.func @transform_2(%arg0: i32) -> (i32, i32) {
    %c0_i32 = arith.constant 0 : i32
    %c0_i32_0 = arith.constant 0 : i32
    %c0_i32_1 = arith.constant 0 : i32
    return %c0_i32, %c0_i32_0 : i32, i32
  }
  func.func @transform_3(%arg0: i32) -> (i32, i32) {
    %c0_i32 = arith.constant 0 : i32
    %c0_i32_0 = arith.constant 0 : i32
    %c0_i32_1 = arith.constant 0 : i32
    return %c0_i32, %c0_i32_0 : i32, i32
  }
  func.func @transform_4(%arg0: i32) -> (i32, i32) {
    %c0_i32 = arith.constant 0 : i32
    %c0_i32_0 = arith.constant 0 : i32
    %c0_i32_1 = arith.constant 0 : i32
    return %c0_i32, %c0_i32_0 : i32, i32
  }
  func.func @transform_5(%arg0: i32) -> (i32, i32) {
    %c0_i32 = arith.constant 0 : i32
    %c0_i32_0 = arith.constant 0 : i32
    return %arg0, %c0_i32 : i32, i32
  }
}

module attributes {stable_mosaic.version = 11 : i64} {
  func.func @_attn_core_kernel(%arg0: i32, %arg1: memref<32x2x32xbf16, #tpu.memory_space<vmem>>, %arg2: memref<32x2x32xbf16, #tpu.memory_space<vmem>>, %arg3: memref<32x2x32xbf16, #tpu.memory_space<vmem>>, %arg4: memref<32x2x32xbf16, #tpu.memory_space<vmem>>) attributes {dimension_semantics = [#tpu.dimension_semantics<parallel>], iteration_bounds = array<i64: 1>, scalar_prefetch = 0 : i64, scratch_operands = 0 : i64, tpu.core_type = #tpu.core_type<tc>, window_params = [{transform_indices = @transform_0, window_bounds = array<i64: 32, 2, 32>}, {transform_indices = @transform_1, window_bounds = array<i64: 32, 2, 32>}, {transform_indices = @transform_2, window_bounds = array<i64: 32, 2, 32>}, {transform_indices = @transform_3, window_bounds = array<i64: 32, 2, 32>}]} {
    %c0 = arith.constant 0 : index
    %c0_0 = arith.constant 0 : index
    %c0_1 = arith.constant 0 : index
    %0 = vector.load %arg1[%c0, %c0_0, %c0_1] : memref<32x2x32xbf16, #tpu.memory_space<vmem>>, vector<32x2x32xbf16>
    %c0_2 = arith.constant 0 : index
    %c0_3 = arith.constant 0 : index
    %c0_4 = arith.constant 0 : index
    %1 = vector.load %arg2[%c0_2, %c0_3, %c0_4] : memref<32x2x32xbf16, #tpu.memory_space<vmem>>, vector<32x2x32xbf16>
    %c0_5 = arith.constant 0 : index
    %c0_6 = arith.constant 0 : index
    %c0_7 = arith.constant 0 : index
    %2 = vector.load %arg3[%c0_5, %c0_6, %c0_7] : memref<32x2x32xbf16, #tpu.memory_space<vmem>>, vector<32x2x32xbf16>
    "tpu.trace_start"() <{level = 10 : i32, message = "bqd,bkd->bqk"}> : () -> ()
    %cst = arith.constant dense<0.000000e+00> : vector<32x2x2xf32>
    %3 = tpu.matmul %0, %1, %cst {dimension_numbers = #tpu.dot_dimension_numbers<[2], [2], [1], [1], [0, 0, 0, 1, 1, 1], [0], [0]>} : vector<32x2x32xbf16>, vector<32x2x32xbf16>, vector<32x2x2xf32> -> vector<32x2x2xf32>
    "tpu.trace_stop"() : () -> ()
    %cst_8 = arith.constant 0.176776692 : f32
    %4 = vector.broadcast %cst_8 : f32 to vector<32x2x2xf32>
    %5 = arith.mulf %3, %4 : vector<32x2x2xf32>
    %cst_9 = arith.constant dense<0xFF800000> : vector<32x2xf32>
    %6 = vector.multi_reduction <maximumf>, %5, %cst_9 [2] : vector<32x2x2xf32> to vector<32x2xf32>
    %7 = vector.shape_cast %6 : vector<32x2xf32> to vector<32x2x1xf32>
    %8 = vector.broadcast %7 : vector<32x2x1xf32> to vector<32x2x2xf32>
    %9 = arith.subf %5, %8 : vector<32x2x2xf32>
    %10 = math.exp %9 : vector<32x2x2xf32>
    %cst_10 = arith.constant dense<0.000000e+00> : vector<32x2xf32>
    %11 = vector.multi_reduction <add>, %10, %cst_10 [2] : vector<32x2x2xf32> to vector<32x2xf32>
    %12 = vector.shape_cast %11 : vector<32x2xf32> to vector<32x2x1xf32>
    %13 = tpu.reciprocal %12 {approx = true} : vector<32x2x1xf32> -> vector<32x2x1xf32>
    %14 = vector.broadcast %13 : vector<32x2x1xf32> to vector<32x2x2xf32>
    %15 = arith.mulf %10, %14 : vector<32x2x2xf32>
    %16 = arith.truncf %15 : vector<32x2x2xf32> to vector<32x2x2xbf16>
    "tpu.trace_start"() <{level = 10 : i32, message = "bqk,bkd->bqd"}> : () -> ()
    %cst_11 = arith.constant dense<0.000000e+00> : vector<32x2x32xf32>
    %17 = tpu.matmul %16, %2, %cst_11 {dimension_numbers = #tpu.dot_dimension_numbers<[2], [1], [1], [2], [0, 0, 0, 1, 1, 2], [0], [0]>} : vector<32x2x2xbf16>, vector<32x2x32xbf16>, vector<32x2x32xf32> -> vector<32x2x32xf32>
    "tpu.trace_stop"() : () -> ()
    %18 = arith.truncf %17 : vector<32x2x32xf32> to vector<32x2x32xbf16>
    %c0_12 = arith.constant 0 : index
    %c0_13 = arith.constant 0 : index
    %c0_14 = arith.constant 0 : index
    %19 = vector.load %arg4[%c0_12, %c0_13, %c0_14] : memref<32x2x32xbf16, #tpu.memory_space<vmem>>, vector<32x2x32xbf16>
    tpu.vector_store %arg4[%c0_12, %c0_13, %c0_14], %18 {strides = array<i32>} : memref<32x2x32xbf16, #tpu.memory_space<vmem>>, vector<32x2x32xbf16>,
    return
  }
  func.func @transform_0(%arg0: i32) -> (i32, i32, i32) {
    %c0_i32 = arith.constant 0 : i32
    %c0_i32_0 = arith.constant 0 : i32
    %c0_i32_1 = arith.constant 0 : i32
    return %arg0, %c0_i32, %c0_i32_0 : i32, i32, i32
  }
  func.func @transform_1(%arg0: i32) -> (i32, i32, i32) {
    %c0_i32 = arith.constant 0 : i32
    %c0_i32_0 = arith.constant 0 : i32
    %c0_i32_1 = arith.constant 0 : i32
    return %arg0, %c0_i32, %c0_i32_0 : i32, i32, i32
  }
  func.func @transform_2(%arg0: i32) -> (i32, i32, i32) {
    %c0_i32 = arith.constant 0 : i32
    %c0_i32_0 = arith.constant 0 : i32
    %c0_i32_1 = arith.constant 0 : i32
    return %arg0, %c0_i32, %c0_i32_0 : i32, i32, i32
  }
  func.func @transform_3(%arg0: i32) -> (i32, i32, i32) {
    %c0_i32 = arith.constant 0 : i32
    %c0_i32_0 = arith.constant 0 : i32
    %c0_i32_1 = arith.constant 0 : i32
    return %arg0, %c0_i32, %c0_i32_0 : i32, i32, i32
  }
}

module attributes {stable_mosaic.version = 11 : i64} {
  func.func @_proj_residual_kernel(%arg0: i32, %arg1: memref<16x128xbf16, #tpu.memory_space<vmem>>, %arg2: memref<16x128xf32, #tpu.memory_space<vmem>>, %arg3: memref<128x128xbf16, #tpu.memory_space<vmem>>, %arg4: memref<1x128xf32, #tpu.memory_space<vmem>>, %arg5: memref<128x128xbf16, #tpu.memory_space<vmem>>, %arg6: memref<1x128xf32, #tpu.memory_space<vmem>>, %arg7: memref<16x128xf32, #tpu.memory_space<vmem>>) attributes {dimension_semantics = [#tpu.dimension_semantics<parallel>], iteration_bounds = array<i64: 1>, scalar_prefetch = 0 : i64, scratch_operands = 0 : i64, tpu.core_type = #tpu.core_type<tc>, window_params = [{transform_indices = @transform_0, window_bounds = array<i64: 16, 128>}, {transform_indices = @transform_1, window_bounds = array<i64: 16, 128>}, {pipeline_mode = #tpu.pipeline_mode<synchronous>, transform_indices = @transform_2, window_bounds = array<i64: 128, 128>}, {pipeline_mode = #tpu.pipeline_mode<synchronous>, transform_indices = @transform_3, window_bounds = array<i64: 1, 128>}, {pipeline_mode = #tpu.pipeline_mode<synchronous>, transform_indices = @transform_4, window_bounds = array<i64: 128, 128>}, {pipeline_mode = #tpu.pipeline_mode<synchronous>, transform_indices = @transform_5, window_bounds = array<i64: 1, 128>}, {transform_indices = @transform_6, window_bounds = array<i64: 16, 128>}]} {
    %c0 = arith.constant 0 : index
    %c0_0 = arith.constant 0 : index
    %0 = vector.load %arg1[%c0, %c0_0] : memref<16x128xbf16, #tpu.memory_space<vmem>>, vector<16x128xbf16>
    %c0_1 = arith.constant 0 : index
    %c0_2 = arith.constant 0 : index
    %1 = vector.load %arg3[%c0_1, %c0_2] : memref<128x128xbf16, #tpu.memory_space<vmem>>, vector<128x128xbf16>
    %cst = arith.constant dense<0.000000e+00> : vector<16x128xf32>
    %2 = tpu.matmul %0, %1, %cst {dimension_numbers = #tpu.dot_dimension_numbers<[1], [0], [0], [1], [0, 0, 1, 1], [], []>} : vector<16x128xbf16>, vector<128x128xbf16>, vector<16x128xf32> -> vector<16x128xf32>
    %c0_3 = arith.constant 0 : index
    %c0_4 = arith.constant 0 : index
    %3 = vector.load %arg4[%c0_3, %c0_4] : memref<1x128xf32, #tpu.memory_space<vmem>>, vector<1x128xf32>
    %4 = vector.broadcast %3 : vector<1x128xf32> to vector<16x128xf32>
    %5 = arith.addf %2, %4 : vector<16x128xf32>
    %6 = arith.truncf %5 : vector<16x128xf32> to vector<16x128xbf16>
    %c0_5 = arith.constant 0 : index
    %c0_6 = arith.constant 0 : index
    %7 = vector.load %arg5[%c0_5, %c0_6] : memref<128x128xbf16, #tpu.memory_space<vmem>>, vector<128x128xbf16>
    %cst_7 = arith.constant dense<0.000000e+00> : vector<16x128xf32>
    %8 = tpu.matmul %6, %7, %cst_7 {dimension_numbers = #tpu.dot_dimension_numbers<[1], [0], [0], [1], [0, 0, 1, 1], [], []>} : vector<16x128xbf16>, vector<128x128xbf16>, vector<16x128xf32> -> vector<16x128xf32>
    %c0_8 = arith.constant 0 : index
    %c0_9 = arith.constant 0 : index
    %9 = vector.load %arg6[%c0_8, %c0_9] : memref<1x128xf32, #tpu.memory_space<vmem>>, vector<1x128xf32>
    %10 = vector.broadcast %9 : vector<1x128xf32> to vector<16x128xf32>
    %11 = arith.addf %8, %10 : vector<16x128xf32>
    %c0_10 = arith.constant 0 : index
    %c0_11 = arith.constant 0 : index
    %12 = vector.load %arg2[%c0_10, %c0_11] : memref<16x128xf32, #tpu.memory_space<vmem>>, vector<16x128xf32>
    %13 = arith.addf %12, %11 : vector<16x128xf32>
    %c0_12 = arith.constant 0 : index
    %c0_13 = arith.constant 0 : index
    %14 = vector.load %arg7[%c0_12, %c0_13] : memref<16x128xf32, #tpu.memory_space<vmem>>, vector<16x128xf32>
    tpu.vector_store %arg7[%c0_12, %c0_13], %13 {strides = array<i32>} : memref<16x128xf32, #tpu.memory_space<vmem>>, vector<16x128xf32>,
    return
  }
  func.func @transform_0(%arg0: i32) -> (i32, i32) {
    %c0_i32 = arith.constant 0 : i32
    %c0_i32_0 = arith.constant 0 : i32
    return %arg0, %c0_i32 : i32, i32
  }
  func.func @transform_1(%arg0: i32) -> (i32, i32) {
    %c0_i32 = arith.constant 0 : i32
    %c0_i32_0 = arith.constant 0 : i32
    return %arg0, %c0_i32 : i32, i32
  }
  func.func @transform_2(%arg0: i32) -> (i32, i32) {
    %c0_i32 = arith.constant 0 : i32
    %c0_i32_0 = arith.constant 0 : i32
    %c0_i32_1 = arith.constant 0 : i32
    return %c0_i32, %c0_i32_0 : i32, i32
  }
  func.func @transform_3(%arg0: i32) -> (i32, i32) {
    %c0_i32 = arith.constant 0 : i32
    %c0_i32_0 = arith.constant 0 : i32
    %c0_i32_1 = arith.constant 0 : i32
    return %c0_i32, %c0_i32_0 : i32, i32
  }
  func.func @transform_4(%arg0: i32) -> (i32, i32) {
    %c0_i32 = arith.constant 0 : i32
    %c0_i32_0 = arith.constant 0 : i32
    %c0_i32_1 = arith.constant 0 : i32
    return %c0_i32, %c0_i32_0 : i32, i32
  }
  func.func @transform_5(%arg0: i32) -> (i32, i32) {
    %c0_i32 = arith.constant 0 : i32
    %c0_i32_0 = arith.constant 0 : i32
    %c0_i32_1 = arith.constant 0 : i32
    return %c0_i32, %c0_i32_0 : i32, i32
  }
  func.func @transform_6(%arg0: i32) -> (i32, i32) {
    %c0_i32 = arith.constant 0 : i32
    %c0_i32_0 = arith.constant 0 : i32
    return %arg0, %c0_i32 : i32, i32
  }
}

module attributes {stable_mosaic.version = 11 : i64} {
  func.func @_ln_linear_kernel(%arg0: i32, %arg1: memref<20x128xf32, #tpu.memory_space<vmem>>, %arg2: memref<1x128xf32, #tpu.memory_space<vmem>>, %arg3: memref<1x128xf32, #tpu.memory_space<vmem>>, %arg4: memref<128x384xbf16, #tpu.memory_space<vmem>>, %arg5: memref<1x384xf32, #tpu.memory_space<vmem>>, %arg6: memref<20x384xbf16, #tpu.memory_space<vmem>>) attributes {dimension_semantics = [#tpu.dimension_semantics<parallel>], iteration_bounds = array<i64: 1>, scalar_prefetch = 0 : i64, scratch_operands = 0 : i64, tpu.core_type = #tpu.core_type<tc>, window_params = [{transform_indices = @transform_0, window_bounds = array<i64: 20, 128>}, {pipeline_mode = #tpu.pipeline_mode<synchronous>, transform_indices = @transform_1, window_bounds = array<i64: 1, 128>}, {pipeline_mode = #tpu.pipeline_mode<synchronous>, transform_indices = @transform_2, window_bounds = array<i64: 1, 128>}, {pipeline_mode = #tpu.pipeline_mode<synchronous>, transform_indices = @transform_3, window_bounds = array<i64: 128, 384>}, {pipeline_mode = #tpu.pipeline_mode<synchronous>, transform_indices = @transform_4, window_bounds = array<i64: 1, 384>}, {transform_indices = @transform_5, window_bounds = array<i64: 20, 384>}]} {
    %c0 = arith.constant 0 : index
    %c0_0 = arith.constant 0 : index
    %0 = vector.load %arg1[%c0, %c0_0] : memref<20x128xf32, #tpu.memory_space<vmem>>, vector<20x128xf32>
    %c0_1 = arith.constant 0 : index
    %c0_2 = arith.constant 0 : index
    %1 = vector.load %arg2[%c0_1, %c0_2] : memref<1x128xf32, #tpu.memory_space<vmem>>, vector<1x128xf32>
    %c0_3 = arith.constant 0 : index
    %c0_4 = arith.constant 0 : index
    %2 = vector.load %arg3[%c0_3, %c0_4] : memref<1x128xf32, #tpu.memory_space<vmem>>, vector<1x128xf32>
    %cst = arith.constant dense<0.000000e+00> : vector<20xf32>
    %3 = vector.multi_reduction <add>, %0, %cst [1] : vector<20x128xf32> to vector<20xf32>
    %4 = vector.shape_cast %3 : vector<20xf32> to vector<20x1xf32>
    %cst_5 = arith.constant 1.280000e+02 : f32
    %5 = vector.broadcast %cst_5 : f32 to vector<20x1xf32>
    %6 = arith.divf %4, %5 : vector<20x1xf32>
    %7 = vector.broadcast %6 : vector<20x1xf32> to vector<20x128xf32>
    %8 = arith.subf %0, %7 : vector<20x128xf32>
    %9 = arith.mulf %8, %8 : vector<20x128xf32>
    %cst_6 = arith.constant dense<0.000000e+00> : vector<20xf32>
    %10 = vector.multi_reduction <add>, %9, %cst_6 [1] : vector<20x128xf32> to vector<20xf32>
    %11 = vector.shape_cast %10 : vector<20xf32> to vector<20x1xf32>
    %cst_7 = arith.constant 1.280000e+02 : f32
    %12 = vector.broadcast %cst_7 : f32 to vector<20x1xf32>
    %13 = arith.divf %11, %12 : vector<20x1xf32>
    %cst_8 = arith.constant 9.99999997E-7 : f32
    %14 = vector.broadcast %cst_8 : f32 to vector<20x1xf32>
    %15 = arith.addf %13, %14 : vector<20x1xf32>
    %16 = math.rsqrt %15 : vector<20x1xf32>
    %17 = vector.broadcast %16 : vector<20x1xf32> to vector<20x128xf32>
    %18 = arith.mulf %8, %17 : vector<20x128xf32>
    %19 = vector.broadcast %1 : vector<1x128xf32> to vector<20x128xf32>
    %20 = arith.mulf %18, %19 : vector<20x128xf32>
    %21 = vector.broadcast %2 : vector<1x128xf32> to vector<20x128xf32>
    %22 = arith.addf %20, %21 : vector<20x128xf32>
    %23 = arith.truncf %22 : vector<20x128xf32> to vector<20x128xbf16>
    %c0_9 = arith.constant 0 : index
    %c0_10 = arith.constant 0 : index
    %24 = vector.load %arg4[%c0_9, %c0_10] : memref<128x384xbf16, #tpu.memory_space<vmem>>, vector<128x384xbf16>
    %cst_11 = arith.constant dense<0.000000e+00> : vector<20x384xf32>
    %25 = tpu.matmul %23, %24, %cst_11 {dimension_numbers = #tpu.dot_dimension_numbers<[1], [0], [0], [1], [0, 0, 1, 1], [], []>} : vector<20x128xbf16>, vector<128x384xbf16>, vector<20x384xf32> -> vector<20x384xf32>
    %c0_12 = arith.constant 0 : index
    %c0_13 = arith.constant 0 : index
    %26 = vector.load %arg5[%c0_12, %c0_13] : memref<1x384xf32, #tpu.memory_space<vmem>>, vector<1x384xf32>
    %27 = vector.broadcast %26 : vector<1x384xf32> to vector<20x384xf32>
    %28 = arith.addf %25, %27 : vector<20x384xf32>
    %29 = arith.truncf %28 : vector<20x384xf32> to vector<20x384xbf16>
    %c0_14 = arith.constant 0 : index
    %c0_15 = arith.constant 0 : index
    %30 = vector.load %arg6[%c0_14, %c0_15] : memref<20x384xbf16, #tpu.memory_space<vmem>>, vector<20x384xbf16>
    tpu.vector_store %arg6[%c0_14, %c0_15], %29 {strides = array<i32>} : memref<20x384xbf16, #tpu.memory_space<vmem>>, vector<20x384xbf16>,
    return
  }
  func.func @transform_0(%arg0: i32) -> (i32, i32) {
    %c0_i32 = arith.constant 0 : i32
    %c0_i32_0 = arith.constant 0 : i32
    return %arg0, %c0_i32 : i32, i32
  }
  func.func @transform_1(%arg0: i32) -> (i32, i32) {
    %c0_i32 = arith.constant 0 : i32
    %c0_i32_0 = arith.constant 0 : i32
    %c0_i32_1 = arith.constant 0 : i32
    return %c0_i32, %c0_i32_0 : i32, i32
  }
  func.func @transform_2(%arg0: i32) -> (i32, i32) {
    %c0_i32 = arith.constant 0 : i32
    %c0_i32_0 = arith.constant 0 : i32
    %c0_i32_1 = arith.constant 0 : i32
    return %c0_i32, %c0_i32_0 : i32, i32
  }
  func.func @transform_3(%arg0: i32) -> (i32, i32) {
    %c0_i32 = arith.constant 0 : i32
    %c0_i32_0 = arith.constant 0 : i32
    %c0_i32_1 = arith.constant 0 : i32
    return %c0_i32, %c0_i32_0 : i32, i32
  }
  func.func @transform_4(%arg0: i32) -> (i32, i32) {
    %c0_i32 = arith.constant 0 : i32
    %c0_i32_0 = arith.constant 0 : i32
    %c0_i32_1 = arith.constant 0 : i32
    return %c0_i32, %c0_i32_0 : i32, i32
  }
  func.func @transform_5(%arg0: i32) -> (i32, i32) {
    %c0_i32 = arith.constant 0 : i32
    %c0_i32_0 = arith.constant 0 : i32
    return %arg0, %c0_i32 : i32, i32
  }
}

module attributes {stable_mosaic.version = 11 : i64} {
  func.func @_attn_core_kernel(%arg0: i32, %arg1: memref<16x5x32xbf16, #tpu.memory_space<vmem>>, %arg2: memref<16x5x32xbf16, #tpu.memory_space<vmem>>, %arg3: memref<16x5x32xbf16, #tpu.memory_space<vmem>>, %arg4: memref<16x5x32xbf16, #tpu.memory_space<vmem>>) attributes {dimension_semantics = [#tpu.dimension_semantics<parallel>], iteration_bounds = array<i64: 1>, scalar_prefetch = 0 : i64, scratch_operands = 0 : i64, tpu.core_type = #tpu.core_type<tc>, window_params = [{transform_indices = @transform_0, window_bounds = array<i64: 16, 5, 32>}, {transform_indices = @transform_1, window_bounds = array<i64: 16, 5, 32>}, {transform_indices = @transform_2, window_bounds = array<i64: 16, 5, 32>}, {transform_indices = @transform_3, window_bounds = array<i64: 16, 5, 32>}]} {
    %c0 = arith.constant 0 : index
    %c0_0 = arith.constant 0 : index
    %c0_1 = arith.constant 0 : index
    %0 = vector.load %arg1[%c0, %c0_0, %c0_1] : memref<16x5x32xbf16, #tpu.memory_space<vmem>>, vector<16x5x32xbf16>
    %c0_2 = arith.constant 0 : index
    %c0_3 = arith.constant 0 : index
    %c0_4 = arith.constant 0 : index
    %1 = vector.load %arg2[%c0_2, %c0_3, %c0_4] : memref<16x5x32xbf16, #tpu.memory_space<vmem>>, vector<16x5x32xbf16>
    %c0_5 = arith.constant 0 : index
    %c0_6 = arith.constant 0 : index
    %c0_7 = arith.constant 0 : index
    %2 = vector.load %arg3[%c0_5, %c0_6, %c0_7] : memref<16x5x32xbf16, #tpu.memory_space<vmem>>, vector<16x5x32xbf16>
    "tpu.trace_start"() <{level = 10 : i32, message = "bqd,bkd->bqk"}> : () -> ()
    %cst = arith.constant dense<0.000000e+00> : vector<16x5x5xf32>
    %3 = tpu.matmul %0, %1, %cst {dimension_numbers = #tpu.dot_dimension_numbers<[2], [2], [1], [1], [0, 0, 0, 1, 1, 1], [0], [0]>} : vector<16x5x32xbf16>, vector<16x5x32xbf16>, vector<16x5x5xf32> -> vector<16x5x5xf32>
    "tpu.trace_stop"() : () -> ()
    %cst_8 = arith.constant 0.176776692 : f32
    %4 = vector.broadcast %cst_8 : f32 to vector<16x5x5xf32>
    %5 = arith.mulf %3, %4 : vector<16x5x5xf32>
    %cst_9 = arith.constant dense<0xFF800000> : vector<16x5xf32>
    %6 = vector.multi_reduction <maximumf>, %5, %cst_9 [2] : vector<16x5x5xf32> to vector<16x5xf32>
    %7 = vector.shape_cast %6 : vector<16x5xf32> to vector<16x5x1xf32>
    %8 = vector.broadcast %7 : vector<16x5x1xf32> to vector<16x5x5xf32>
    %9 = arith.subf %5, %8 : vector<16x5x5xf32>
    %10 = math.exp %9 : vector<16x5x5xf32>
    %cst_10 = arith.constant dense<0.000000e+00> : vector<16x5xf32>
    %11 = vector.multi_reduction <add>, %10, %cst_10 [2] : vector<16x5x5xf32> to vector<16x5xf32>
    %12 = vector.shape_cast %11 : vector<16x5xf32> to vector<16x5x1xf32>
    %13 = tpu.reciprocal %12 {approx = true} : vector<16x5x1xf32> -> vector<16x5x1xf32>
    %14 = vector.broadcast %13 : vector<16x5x1xf32> to vector<16x5x5xf32>
    %15 = arith.mulf %10, %14 : vector<16x5x5xf32>
    %16 = arith.truncf %15 : vector<16x5x5xf32> to vector<16x5x5xbf16>
    "tpu.trace_start"() <{level = 10 : i32, message = "bqk,bkd->bqd"}> : () -> ()
    %cst_11 = arith.constant dense<0.000000e+00> : vector<16x5x32xf32>
    %17 = tpu.matmul %16, %2, %cst_11 {dimension_numbers = #tpu.dot_dimension_numbers<[2], [1], [1], [2], [0, 0, 0, 1, 1, 2], [0], [0]>} : vector<16x5x5xbf16>, vector<16x5x32xbf16>, vector<16x5x32xf32> -> vector<16x5x32xf32>
    "tpu.trace_stop"() : () -> ()
    %18 = arith.truncf %17 : vector<16x5x32xf32> to vector<16x5x32xbf16>
    %c0_12 = arith.constant 0 : index
    %c0_13 = arith.constant 0 : index
    %c0_14 = arith.constant 0 : index
    %19 = vector.load %arg4[%c0_12, %c0_13, %c0_14] : memref<16x5x32xbf16, #tpu.memory_space<vmem>>, vector<16x5x32xbf16>
    tpu.vector_store %arg4[%c0_12, %c0_13, %c0_14], %18 {strides = array<i32>} : memref<16x5x32xbf16, #tpu.memory_space<vmem>>, vector<16x5x32xbf16>,
    return
  }
  func.func @transform_0(%arg0: i32) -> (i32, i32, i32) {
    %c0_i32 = arith.constant 0 : i32
    %c0_i32_0 = arith.constant 0 : i32
    %c0_i32_1 = arith.constant 0 : i32
    return %arg0, %c0_i32, %c0_i32_0 : i32, i32, i32
  }
  func.func @transform_1(%arg0: i32) -> (i32, i32, i32) {
    %c0_i32 = arith.constant 0 : i32
    %c0_i32_0 = arith.constant 0 : i32
    %c0_i32_1 = arith.constant 0 : i32
    return %arg0, %c0_i32, %c0_i32_0 : i32, i32, i32
  }
  func.func @transform_2(%arg0: i32) -> (i32, i32, i32) {
    %c0_i32 = arith.constant 0 : i32
    %c0_i32_0 = arith.constant 0 : i32
    %c0_i32_1 = arith.constant 0 : i32
    return %arg0, %c0_i32, %c0_i32_0 : i32, i32, i32
  }
  func.func @transform_3(%arg0: i32) -> (i32, i32, i32) {
    %c0_i32 = arith.constant 0 : i32
    %c0_i32_0 = arith.constant 0 : i32
    %c0_i32_1 = arith.constant 0 : i32
    return %arg0, %c0_i32, %c0_i32_0 : i32, i32, i32
  }
}

module attributes {stable_mosaic.version = 11 : i64} {
  func.func @_linear_residual_kernel(%arg0: i32, %arg1: memref<20x128xbf16, #tpu.memory_space<vmem>>, %arg2: memref<20x128xf32, #tpu.memory_space<vmem>>, %arg3: memref<128x128xbf16, #tpu.memory_space<vmem>>, %arg4: memref<1x128xf32, #tpu.memory_space<vmem>>, %arg5: memref<20x128xf32, #tpu.memory_space<vmem>>) attributes {dimension_semantics = [#tpu.dimension_semantics<parallel>], iteration_bounds = array<i64: 1>, scalar_prefetch = 0 : i64, scratch_operands = 0 : i64, tpu.core_type = #tpu.core_type<tc>, window_params = [{transform_indices = @transform_0, window_bounds = array<i64: 20, 128>}, {transform_indices = @transform_1, window_bounds = array<i64: 20, 128>}, {pipeline_mode = #tpu.pipeline_mode<synchronous>, transform_indices = @transform_2, window_bounds = array<i64: 128, 128>}, {pipeline_mode = #tpu.pipeline_mode<synchronous>, transform_indices = @transform_3, window_bounds = array<i64: 1, 128>}, {transform_indices = @transform_4, window_bounds = array<i64: 20, 128>}]} {
    %c0 = arith.constant 0 : index
    %c0_0 = arith.constant 0 : index
    %0 = vector.load %arg1[%c0, %c0_0] : memref<20x128xbf16, #tpu.memory_space<vmem>>, vector<20x128xbf16>
    %c0_1 = arith.constant 0 : index
    %c0_2 = arith.constant 0 : index
    %1 = vector.load %arg3[%c0_1, %c0_2] : memref<128x128xbf16, #tpu.memory_space<vmem>>, vector<128x128xbf16>
    %cst = arith.constant dense<0.000000e+00> : vector<20x128xf32>
    %2 = tpu.matmul %0, %1, %cst {dimension_numbers = #tpu.dot_dimension_numbers<[1], [0], [0], [1], [0, 0, 1, 1], [], []>} : vector<20x128xbf16>, vector<128x128xbf16>, vector<20x128xf32> -> vector<20x128xf32>
    %c0_3 = arith.constant 0 : index
    %c0_4 = arith.constant 0 : index
    %3 = vector.load %arg4[%c0_3, %c0_4] : memref<1x128xf32, #tpu.memory_space<vmem>>, vector<1x128xf32>
    %4 = vector.broadcast %3 : vector<1x128xf32> to vector<20x128xf32>
    %5 = arith.addf %2, %4 : vector<20x128xf32>
    %c0_5 = arith.constant 0 : index
    %c0_6 = arith.constant 0 : index
    %6 = vector.load %arg2[%c0_5, %c0_6] : memref<20x128xf32, #tpu.memory_space<vmem>>, vector<20x128xf32>
    %7 = arith.addf %6, %5 : vector<20x128xf32>
    %c0_7 = arith.constant 0 : index
    %c0_8 = arith.constant 0 : index
    %8 = vector.load %arg5[%c0_7, %c0_8] : memref<20x128xf32, #tpu.memory_space<vmem>>, vector<20x128xf32>
    tpu.vector_store %arg5[%c0_7, %c0_8], %7 {strides = array<i32>} : memref<20x128xf32, #tpu.memory_space<vmem>>, vector<20x128xf32>,
    return
  }
  func.func @transform_0(%arg0: i32) -> (i32, i32) {
    %c0_i32 = arith.constant 0 : i32
    %c0_i32_0 = arith.constant 0 : i32
    return %arg0, %c0_i32 : i32, i32
  }
  func.func @transform_1(%arg0: i32) -> (i32, i32) {
    %c0_i32 = arith.constant 0 : i32
    %c0_i32_0 = arith.constant 0 : i32
    return %arg0, %c0_i32 : i32, i32
  }
  func.func @transform_2(%arg0: i32) -> (i32, i32) {
    %c0_i32 = arith.constant 0 : i32
    %c0_i32_0 = arith.constant 0 : i32
    %c0_i32_1 = arith.constant 0 : i32
    return %c0_i32, %c0_i32_0 : i32, i32
  }
  func.func @transform_3(%arg0: i32) -> (i32, i32) {
    %c0_i32 = arith.constant 0 : i32
    %c0_i32_0 = arith.constant 0 : i32
    %c0_i32_1 = arith.constant 0 : i32
    return %c0_i32, %c0_i32_0 : i32, i32
  }
  func.func @transform_4(%arg0: i32) -> (i32, i32) {
    %c0_i32 = arith.constant 0 : i32
    %c0_i32_0 = arith.constant 0 : i32
    return %arg0, %c0_i32 : i32, i32
  }
}

module attributes {stable_mosaic.version = 11 : i64} {
  func.func @_mlp_kernel(%arg0: i32, %arg1: memref<18x128xf32, #tpu.memory_space<vmem>>, %arg2: memref<1x128xf32, #tpu.memory_space<vmem>>, %arg3: memref<1x128xf32, #tpu.memory_space<vmem>>, %arg4: memref<128x512xbf16, #tpu.memory_space<vmem>>, %arg5: memref<1x512xf32, #tpu.memory_space<vmem>>, %arg6: memref<512x128xbf16, #tpu.memory_space<vmem>>, %arg7: memref<1x128xf32, #tpu.memory_space<vmem>>, %arg8: memref<18x128xf32, #tpu.memory_space<vmem>>) attributes {dimension_semantics = [#tpu.dimension_semantics<parallel>], iteration_bounds = array<i64: 1>, scalar_prefetch = 0 : i64, scratch_operands = 0 : i64, tpu.core_type = #tpu.core_type<tc>, window_params = [{transform_indices = @transform_0, window_bounds = array<i64: 18, 128>}, {pipeline_mode = #tpu.pipeline_mode<synchronous>, transform_indices = @transform_1, window_bounds = array<i64: 1, 128>}, {pipeline_mode = #tpu.pipeline_mode<synchronous>, transform_indices = @transform_2, window_bounds = array<i64: 1, 128>}, {pipeline_mode = #tpu.pipeline_mode<synchronous>, transform_indices = @transform_3, window_bounds = array<i64: 128, 512>}, {pipeline_mode = #tpu.pipeline_mode<synchronous>, transform_indices = @transform_4, window_bounds = array<i64: 1, 512>}, {pipeline_mode = #tpu.pipeline_mode<synchronous>, transform_indices = @transform_5, window_bounds = array<i64: 512, 128>}, {pipeline_mode = #tpu.pipeline_mode<synchronous>, transform_indices = @transform_6, window_bounds = array<i64: 1, 128>}, {transform_indices = @transform_7, window_bounds = array<i64: 18, 128>}]} {
    %c0 = arith.constant 0 : index
    %c0_0 = arith.constant 0 : index
    %0 = vector.load %arg1[%c0, %c0_0] : memref<18x128xf32, #tpu.memory_space<vmem>>, vector<18x128xf32>
    %c0_1 = arith.constant 0 : index
    %c0_2 = arith.constant 0 : index
    %1 = vector.load %arg2[%c0_1, %c0_2] : memref<1x128xf32, #tpu.memory_space<vmem>>, vector<1x128xf32>
    %c0_3 = arith.constant 0 : index
    %c0_4 = arith.constant 0 : index
    %2 = vector.load %arg3[%c0_3, %c0_4] : memref<1x128xf32, #tpu.memory_space<vmem>>, vector<1x128xf32>
    %cst = arith.constant dense<0.000000e+00> : vector<18xf32>
    %3 = vector.multi_reduction <add>, %0, %cst [1] : vector<18x128xf32> to vector<18xf32>
    %4 = vector.shape_cast %3 : vector<18xf32> to vector<18x1xf32>
    %cst_5 = arith.constant 1.280000e+02 : f32
    %5 = vector.broadcast %cst_5 : f32 to vector<18x1xf32>
    %6 = arith.divf %4, %5 : vector<18x1xf32>
    %7 = vector.broadcast %6 : vector<18x1xf32> to vector<18x128xf32>
    %8 = arith.subf %0, %7 : vector<18x128xf32>
    %9 = arith.mulf %8, %8 : vector<18x128xf32>
    %cst_6 = arith.constant dense<0.000000e+00> : vector<18xf32>
    %10 = vector.multi_reduction <add>, %9, %cst_6 [1] : vector<18x128xf32> to vector<18xf32>
    %11 = vector.shape_cast %10 : vector<18xf32> to vector<18x1xf32>
    %cst_7 = arith.constant 1.280000e+02 : f32
    %12 = vector.broadcast %cst_7 : f32 to vector<18x1xf32>
    %13 = arith.divf %11, %12 : vector<18x1xf32>
    %cst_8 = arith.constant 9.99999997E-7 : f32
    %14 = vector.broadcast %cst_8 : f32 to vector<18x1xf32>
    %15 = arith.addf %13, %14 : vector<18x1xf32>
    %16 = math.rsqrt %15 : vector<18x1xf32>
    %17 = vector.broadcast %16 : vector<18x1xf32> to vector<18x128xf32>
    %18 = arith.mulf %8, %17 : vector<18x128xf32>
    %19 = vector.broadcast %1 : vector<1x128xf32> to vector<18x128xf32>
    %20 = arith.mulf %18, %19 : vector<18x128xf32>
    %21 = vector.broadcast %2 : vector<1x128xf32> to vector<18x128xf32>
    %22 = arith.addf %20, %21 : vector<18x128xf32>
    %23 = arith.truncf %22 : vector<18x128xf32> to vector<18x128xbf16>
    %c0_9 = arith.constant 0 : index
    %c0_10 = arith.constant 0 : index
    %24 = vector.load %arg4[%c0_9, %c0_10] : memref<128x512xbf16, #tpu.memory_space<vmem>>, vector<128x512xbf16>
    %cst_11 = arith.constant dense<0.000000e+00> : vector<18x512xf32>
    %25 = tpu.matmul %23, %24, %cst_11 {dimension_numbers = #tpu.dot_dimension_numbers<[1], [0], [0], [1], [0, 0, 1, 1], [], []>} : vector<18x128xbf16>, vector<128x512xbf16>, vector<18x512xf32> -> vector<18x512xf32>
    %c0_12 = arith.constant 0 : index
    %c0_13 = arith.constant 0 : index
    %26 = vector.load %arg5[%c0_12, %c0_13] : memref<1x512xf32, #tpu.memory_space<vmem>>, vector<1x512xf32>
    %27 = vector.broadcast %26 : vector<1x512xf32> to vector<18x512xf32>
    %28 = arith.addf %25, %27 : vector<18x512xf32>
    %29 = arith.mulf %28, %28 : vector<18x512xf32>
    %30 = arith.mulf %28, %29 : vector<18x512xf32>
    %cst_14 = arith.constant 4.471500e-02 : f32
    %31 = vector.broadcast %cst_14 : f32 to vector<18x512xf32>
    %32 = arith.mulf %31, %30 : vector<18x512xf32>
    %33 = arith.addf %28, %32 : vector<18x512xf32>
    %cst_15 = arith.constant 0.797884583 : f32
    %34 = vector.broadcast %cst_15 : f32 to vector<18x512xf32>
    %35 = arith.mulf %34, %33 : vector<18x512xf32>
    %36 = math.tanh %35 : vector<18x512xf32>
    %cst_16 = arith.constant 1.000000e+00 : f32
    %37 = vector.broadcast %cst_16 : f32 to vector<18x512xf32>
    %38 = arith.addf %37, %36 : vector<18x512xf32>
    %cst_17 = arith.constant 5.000000e-01 : f32
    %39 = vector.broadcast %cst_17 : f32 to vector<18x512xf32>
    %40 = arith.mulf %39, %38 : vector<18x512xf32>
    %41 = arith.mulf %28, %40 : vector<18x512xf32>
    %42 = arith.truncf %41 : vector<18x512xf32> to vector<18x512xbf16>
    %c0_18 = arith.constant 0 : index
    %c0_19 = arith.constant 0 : index
    %43 = vector.load %arg6[%c0_18, %c0_19] : memref<512x128xbf16, #tpu.memory_space<vmem>>, vector<512x128xbf16>
    %cst_20 = arith.constant dense<0.000000e+00> : vector<18x128xf32>
    %44 = tpu.matmul %42, %43, %cst_20 {dimension_numbers = #tpu.dot_dimension_numbers<[1], [0], [0], [1], [0, 0, 1, 1], [], []>} : vector<18x512xbf16>, vector<512x128xbf16>, vector<18x128xf32> -> vector<18x128xf32>
    %c0_21 = arith.constant 0 : index
    %c0_22 = arith.constant 0 : index
    %45 = vector.load %arg7[%c0_21, %c0_22] : memref<1x128xf32, #tpu.memory_space<vmem>>, vector<1x128xf32>
    %46 = vector.broadcast %45 : vector<1x128xf32> to vector<18x128xf32>
    %47 = arith.addf %44, %46 : vector<18x128xf32>
    %48 = arith.addf %0, %47 : vector<18x128xf32>
    %c0_23 = arith.constant 0 : index
    %c0_24 = arith.constant 0 : index
    %49 = vector.load %arg8[%c0_23, %c0_24] : memref<18x128xf32, #tpu.memory_space<vmem>>, vector<18x128xf32>
    tpu.vector_store %arg8[%c0_23, %c0_24], %48 {strides = array<i32>} : memref<18x128xf32, #tpu.memory_space<vmem>>, vector<18x128xf32>,
    return
  }
  func.func @transform_0(%arg0: i32) -> (i32, i32) {
    %c0_i32 = arith.constant 0 : i32
    %c0_i32_0 = arith.constant 0 : i32
    return %arg0, %c0_i32 : i32, i32
  }
  func.func @transform_1(%arg0: i32) -> (i32, i32) {
    %c0_i32 = arith.constant 0 : i32
    %c0_i32_0 = arith.constant 0 : i32
    %c0_i32_1 = arith.constant 0 : i32
    return %c0_i32, %c0_i32_0 : i32, i32
  }
  func.func @transform_2(%arg0: i32) -> (i32, i32) {
    %c0_i32 = arith.constant 0 : i32
    %c0_i32_0 = arith.constant 0 : i32
    %c0_i32_1 = arith.constant 0 : i32
    return %c0_i32, %c0_i32_0 : i32, i32
  }
  func.func @transform_3(%arg0: i32) -> (i32, i32) {
    %c0_i32 = arith.constant 0 : i32
    %c0_i32_0 = arith.constant 0 : i32
    %c0_i32_1 = arith.constant 0 : i32
    return %c0_i32, %c0_i32_0 : i32, i32
  }
  func.func @transform_4(%arg0: i32) -> (i32, i32) {
    %c0_i32 = arith.constant 0 : i32
    %c0_i32_0 = arith.constant 0 : i32
    %c0_i32_1 = arith.constant 0 : i32
    return %c0_i32, %c0_i32_0 : i32, i32
  }
  func.func @transform_5(%arg0: i32) -> (i32, i32) {
    %c0_i32 = arith.constant 0 : i32
    %c0_i32_0 = arith.constant 0 : i32
    %c0_i32_1 = arith.constant 0 : i32
    return %c0_i32, %c0_i32_0 : i32, i32
  }
  func.func @transform_6(%arg0: i32) -> (i32, i32) {
    %c0_i32 = arith.constant 0 : i32
    %c0_i32_0 = arith.constant 0 : i32
    %c0_i32_1 = arith.constant 0 : i32
    return %c0_i32, %c0_i32_0 : i32, i32
  }
  func.func @transform_7(%arg0: i32) -> (i32, i32) {
    %c0_i32 = arith.constant 0 : i32
    %c0_i32_0 = arith.constant 0 : i32
    return %arg0, %c0_i32 : i32, i32
  }
}

module attributes {stable_mosaic.version = 11 : i64} {
  func.func @_norm_head_kernel(%arg0: i32, %arg1: memref<4x2x128xf32, #tpu.memory_space<vmem>>, %arg2: memref<1x128xf32, #tpu.memory_space<vmem>>, %arg3: memref<1x128xf32, #tpu.memory_space<vmem>>, %arg4: memref<4x128x256xbf16, #tpu.memory_space<vmem>>, %arg5: memref<1x256xf32, #tpu.memory_space<vmem>>, %arg6: memref<2x256xf32, #tpu.memory_space<vmem>>) attributes {dimension_semantics = [#tpu.dimension_semantics<parallel>], iteration_bounds = array<i64: 1>, scalar_prefetch = 0 : i64, scratch_operands = 0 : i64, tpu.core_type = #tpu.core_type<tc>, window_params = [{pipeline_mode = #tpu.pipeline_mode<synchronous>, transform_indices = @transform_0, window_bounds = array<i64: 4, 2, 128>}, {pipeline_mode = #tpu.pipeline_mode<synchronous>, transform_indices = @transform_1, window_bounds = array<i64: 1, 128>}, {pipeline_mode = #tpu.pipeline_mode<synchronous>, transform_indices = @transform_2, window_bounds = array<i64: 1, 128>}, {pipeline_mode = #tpu.pipeline_mode<synchronous>, transform_indices = @transform_3, window_bounds = array<i64: 4, 128, 256>}, {pipeline_mode = #tpu.pipeline_mode<synchronous>, transform_indices = @transform_4, window_bounds = array<i64: 1, 256>}, {pipeline_mode = #tpu.pipeline_mode<synchronous>, transform_indices = @transform_5, window_bounds = array<i64: 2, 256>}]} {
    %cst = arith.constant 0.000000e+00 : f32
    %0 = vector.broadcast %cst : f32 to vector<2x256xf32>
    %c0 = arith.constant 0 : index
    %c0_0 = arith.constant 0 : index
    %c0_1 = arith.constant 0 : index
    %1 = vector.load %arg1[%c0, %c0_0, %c0_1] : memref<4x2x128xf32, #tpu.memory_space<vmem>>, vector<1x2x128xf32>
    %2 = vector.shape_cast %1 : vector<1x2x128xf32> to vector<2x128xf32>
    %c0_2 = arith.constant 0 : index
    %c0_3 = arith.constant 0 : index
    %3 = vector.load %arg2[%c0_2, %c0_3] : memref<1x128xf32, #tpu.memory_space<vmem>>, vector<1x128xf32>
    %c0_4 = arith.constant 0 : index
    %c0_5 = arith.constant 0 : index
    %4 = vector.load %arg3[%c0_4, %c0_5] : memref<1x128xf32, #tpu.memory_space<vmem>>, vector<1x128xf32>
    %cst_6 = arith.constant dense<0.000000e+00> : vector<2xf32>
    %5 = vector.multi_reduction <add>, %2, %cst_6 [1] : vector<2x128xf32> to vector<2xf32>
    %6 = vector.shape_cast %5 : vector<2xf32> to vector<2x1xf32>
    %cst_7 = arith.constant 1.280000e+02 : f32
    %7 = vector.broadcast %cst_7 : f32 to vector<2x1xf32>
    %8 = arith.divf %6, %7 : vector<2x1xf32>
    %9 = vector.broadcast %8 : vector<2x1xf32> to vector<2x128xf32>
    %10 = arith.subf %2, %9 : vector<2x128xf32>
    %11 = arith.mulf %10, %10 : vector<2x128xf32>
    %cst_8 = arith.constant dense<0.000000e+00> : vector<2xf32>
    %12 = vector.multi_reduction <add>, %11, %cst_8 [1] : vector<2x128xf32> to vector<2xf32>
    %13 = vector.shape_cast %12 : vector<2xf32> to vector<2x1xf32>
    %cst_9 = arith.constant 1.280000e+02 : f32
    %14 = vector.broadcast %cst_9 : f32 to vector<2x1xf32>
    %15 = arith.divf %13, %14 : vector<2x1xf32>
    %cst_10 = arith.constant 9.99999997E-7 : f32
    %16 = vector.broadcast %cst_10 : f32 to vector<2x1xf32>
    %17 = arith.addf %15, %16 : vector<2x1xf32>
    %18 = math.rsqrt %17 : vector<2x1xf32>
    %19 = vector.broadcast %18 : vector<2x1xf32> to vector<2x128xf32>
    %20 = arith.mulf %10, %19 : vector<2x128xf32>
    %21 = vector.broadcast %3 : vector<1x128xf32> to vector<2x128xf32>
    %22 = arith.mulf %20, %21 : vector<2x128xf32>
    %23 = vector.broadcast %4 : vector<1x128xf32> to vector<2x128xf32>
    %24 = arith.addf %22, %23 : vector<2x128xf32>
    %25 = arith.truncf %24 : vector<2x128xf32> to vector<2x128xbf16>
    %c0_11 = arith.constant 0 : index
    %c0_12 = arith.constant 0 : index
    %c0_13 = arith.constant 0 : index
    %26 = vector.load %arg4[%c0_11, %c0_12, %c0_13] : memref<4x128x256xbf16, #tpu.memory_space<vmem>>, vector<1x128x256xbf16>
    %27 = vector.shape_cast %26 : vector<1x128x256xbf16> to vector<128x256xbf16>
    %cst_14 = arith.constant dense<0.000000e+00> : vector<2x256xf32>
    %28 = tpu.matmul %25, %27, %cst_14 {dimension_numbers = #tpu.dot_dimension_numbers<[1], [0], [0], [1], [0, 0, 1, 1], [], []>} : vector<2x128xbf16>, vector<128x256xbf16>, vector<2x256xf32> -> vector<2x256xf32>
    %29 = arith.addf %0, %28 : vector<2x256xf32>
    %c1 = arith.constant 1 : index
    %c0_15 = arith.constant 0 : index
    %c0_16 = arith.constant 0 : index
    %30 = vector.load %arg1[%c1, %c0_15, %c0_16] : memref<4x2x128xf32, #tpu.memory_space<vmem>>, vector<1x2x128xf32>
    %31 = vector.shape_cast %30 : vector<1x2x128xf32> to vector<2x128xf32>
    %c0_17 = arith.constant 0 : index
    %c0_18 = arith.constant 0 : index
    %32 = vector.load %arg2[%c0_17, %c0_18] : memref<1x128xf32, #tpu.memory_space<vmem>>, vector<1x128xf32>
    %c0_19 = arith.constant 0 : index
    %c0_20 = arith.constant 0 : index
    %33 = vector.load %arg3[%c0_19, %c0_20] : memref<1x128xf32, #tpu.memory_space<vmem>>, vector<1x128xf32>
    %cst_21 = arith.constant dense<0.000000e+00> : vector<2xf32>
    %34 = vector.multi_reduction <add>, %31, %cst_21 [1] : vector<2x128xf32> to vector<2xf32>
    %35 = vector.shape_cast %34 : vector<2xf32> to vector<2x1xf32>
    %cst_22 = arith.constant 1.280000e+02 : f32
    %36 = vector.broadcast %cst_22 : f32 to vector<2x1xf32>
    %37 = arith.divf %35, %36 : vector<2x1xf32>
    %38 = vector.broadcast %37 : vector<2x1xf32> to vector<2x128xf32>
    %39 = arith.subf %31, %38 : vector<2x128xf32>
    %40 = arith.mulf %39, %39 : vector<2x128xf32>
    %cst_23 = arith.constant dense<0.000000e+00> : vector<2xf32>
    %41 = vector.multi_reduction <add>, %40, %cst_23 [1] : vector<2x128xf32> to vector<2xf32>
    %42 = vector.shape_cast %41 : vector<2xf32> to vector<2x1xf32>
    %cst_24 = arith.constant 1.280000e+02 : f32
    %43 = vector.broadcast %cst_24 : f32 to vector<2x1xf32>
    %44 = arith.divf %42, %43 : vector<2x1xf32>
    %cst_25 = arith.constant 9.99999997E-7 : f32
    %45 = vector.broadcast %cst_25 : f32 to vector<2x1xf32>
    %46 = arith.addf %44, %45 : vector<2x1xf32>
    %47 = math.rsqrt %46 : vector<2x1xf32>
    %48 = vector.broadcast %47 : vector<2x1xf32> to vector<2x128xf32>
    %49 = arith.mulf %39, %48 : vector<2x128xf32>
    %50 = vector.broadcast %32 : vector<1x128xf32> to vector<2x128xf32>
    %51 = arith.mulf %49, %50 : vector<2x128xf32>
    %52 = vector.broadcast %33 : vector<1x128xf32> to vector<2x128xf32>
    %53 = arith.addf %51, %52 : vector<2x128xf32>
    %54 = arith.truncf %53 : vector<2x128xf32> to vector<2x128xbf16>
    %c1_26 = arith.constant 1 : index
    %c0_27 = arith.constant 0 : index
    %c0_28 = arith.constant 0 : index
    %55 = vector.load %arg4[%c1_26, %c0_27, %c0_28] : memref<4x128x256xbf16, #tpu.memory_space<vmem>>, vector<1x128x256xbf16>
    %56 = vector.shape_cast %55 : vector<1x128x256xbf16> to vector<128x256xbf16>
    %cst_29 = arith.constant dense<0.000000e+00> : vector<2x256xf32>
    %57 = tpu.matmul %54, %56, %cst_29 {dimension_numbers = #tpu.dot_dimension_numbers<[1], [0], [0], [1], [0, 0, 1, 1], [], []>} : vector<2x128xbf16>, vector<128x256xbf16>, vector<2x256xf32> -> vector<2x256xf32>
    %58 = arith.addf %29, %57 : vector<2x256xf32>
    %c2 = arith.constant 2 : index
    %c0_30 = arith.constant 0 : index
    %c0_31 = arith.constant 0 : index
    %59 = vector.load %arg1[%c2, %c0_30, %c0_31] : memref<4x2x128xf32, #tpu.memory_space<vmem>>, vector<1x2x128xf32>
    %60 = vector.shape_cast %59 : vector<1x2x128xf32> to vector<2x128xf32>
    %c0_32 = arith.constant 0 : index
    %c0_33 = arith.constant 0 : index
    %61 = vector.load %arg2[%c0_32, %c0_33] : memref<1x128xf32, #tpu.memory_space<vmem>>, vector<1x128xf32>
    %c0_34 = arith.constant 0 : index
    %c0_35 = arith.constant 0 : index
    %62 = vector.load %arg3[%c0_34, %c0_35] : memref<1x128xf32, #tpu.memory_space<vmem>>, vector<1x128xf32>
    %cst_36 = arith.constant dense<0.000000e+00> : vector<2xf32>
    %63 = vector.multi_reduction <add>, %60, %cst_36 [1] : vector<2x128xf32> to vector<2xf32>
    %64 = vector.shape_cast %63 : vector<2xf32> to vector<2x1xf32>
    %cst_37 = arith.constant 1.280000e+02 : f32
    %65 = vector.broadcast %cst_37 : f32 to vector<2x1xf32>
    %66 = arith.divf %64, %65 : vector<2x1xf32>
    %67 = vector.broadcast %66 : vector<2x1xf32> to vector<2x128xf32>
    %68 = arith.subf %60, %67 : vector<2x128xf32>
    %69 = arith.mulf %68, %68 : vector<2x128xf32>
    %cst_38 = arith.constant dense<0.000000e+00> : vector<2xf32>
    %70 = vector.multi_reduction <add>, %69, %cst_38 [1] : vector<2x128xf32> to vector<2xf32>
    %71 = vector.shape_cast %70 : vector<2xf32> to vector<2x1xf32>
    %cst_39 = arith.constant 1.280000e+02 : f32
    %72 = vector.broadcast %cst_39 : f32 to vector<2x1xf32>
    %73 = arith.divf %71, %72 : vector<2x1xf32>
    %cst_40 = arith.constant 9.99999997E-7 : f32
    %74 = vector.broadcast %cst_40 : f32 to vector<2x1xf32>
    %75 = arith.addf %73, %74 : vector<2x1xf32>
    %76 = math.rsqrt %75 : vector<2x1xf32>
    %77 = vector.broadcast %76 : vector<2x1xf32> to vector<2x128xf32>
    %78 = arith.mulf %68, %77 : vector<2x128xf32>
    %79 = vector.broadcast %61 : vector<1x128xf32> to vector<2x128xf32>
    %80 = arith.mulf %78, %79 : vector<2x128xf32>
    %81 = vector.broadcast %62 : vector<1x128xf32> to vector<2x128xf32>
    %82 = arith.addf %80, %81 : vector<2x128xf32>
    %83 = arith.truncf %82 : vector<2x128xf32> to vector<2x128xbf16>
    %c2_41 = arith.constant 2 : index
    %c0_42 = arith.constant 0 : index
    %c0_43 = arith.constant 0 : index
    %84 = vector.load %arg4[%c2_41, %c0_42, %c0_43] : memref<4x128x256xbf16, #tpu.memory_space<vmem>>, vector<1x128x256xbf16>
    %85 = vector.shape_cast %84 : vector<1x128x256xbf16> to vector<128x256xbf16>
    %cst_44 = arith.constant dense<0.000000e+00> : vector<2x256xf32>
    %86 = tpu.matmul %83, %85, %cst_44 {dimension_numbers = #tpu.dot_dimension_numbers<[1], [0], [0], [1], [0, 0, 1, 1], [], []>} : vector<2x128xbf16>, vector<128x256xbf16>, vector<2x256xf32> -> vector<2x256xf32>
    %87 = arith.addf %58, %86 : vector<2x256xf32>
    %c3 = arith.constant 3 : index
    %c0_45 = arith.constant 0 : index
    %c0_46 = arith.constant 0 : index
    %88 = vector.load %arg1[%c3, %c0_45, %c0_46] : memref<4x2x128xf32, #tpu.memory_space<vmem>>, vector<1x2x128xf32>
    %89 = vector.shape_cast %88 : vector<1x2x128xf32> to vector<2x128xf32>
    %c0_47 = arith.constant 0 : index
    %c0_48 = arith.constant 0 : index
    %90 = vector.load %arg2[%c0_47, %c0_48] : memref<1x128xf32, #tpu.memory_space<vmem>>, vector<1x128xf32>
    %c0_49 = arith.constant 0 : index
    %c0_50 = arith.constant 0 : index
    %91 = vector.load %arg3[%c0_49, %c0_50] : memref<1x128xf32, #tpu.memory_space<vmem>>, vector<1x128xf32>
    %cst_51 = arith.constant dense<0.000000e+00> : vector<2xf32>
    %92 = vector.multi_reduction <add>, %89, %cst_51 [1] : vector<2x128xf32> to vector<2xf32>
    %93 = vector.shape_cast %92 : vector<2xf32> to vector<2x1xf32>
    %cst_52 = arith.constant 1.280000e+02 : f32
    %94 = vector.broadcast %cst_52 : f32 to vector<2x1xf32>
    %95 = arith.divf %93, %94 : vector<2x1xf32>
    %96 = vector.broadcast %95 : vector<2x1xf32> to vector<2x128xf32>
    %97 = arith.subf %89, %96 : vector<2x128xf32>
    %98 = arith.mulf %97, %97 : vector<2x128xf32>
    %cst_53 = arith.constant dense<0.000000e+00> : vector<2xf32>
    %99 = vector.multi_reduction <add>, %98, %cst_53 [1] : vector<2x128xf32> to vector<2xf32>
    %100 = vector.shape_cast %99 : vector<2xf32> to vector<2x1xf32>
    %cst_54 = arith.constant 1.280000e+02 : f32
    %101 = vector.broadcast %cst_54 : f32 to vector<2x1xf32>
    %102 = arith.divf %100, %101 : vector<2x1xf32>
    %cst_55 = arith.constant 9.99999997E-7 : f32
    %103 = vector.broadcast %cst_55 : f32 to vector<2x1xf32>
    %104 = arith.addf %102, %103 : vector<2x1xf32>
    %105 = math.rsqrt %104 : vector<2x1xf32>
    %106 = vector.broadcast %105 : vector<2x1xf32> to vector<2x128xf32>
    %107 = arith.mulf %97, %106 : vector<2x128xf32>
    %108 = vector.broadcast %90 : vector<1x128xf32> to vector<2x128xf32>
    %109 = arith.mulf %107, %108 : vector<2x128xf32>
    %110 = vector.broadcast %91 : vector<1x128xf32> to vector<2x128xf32>
    %111 = arith.addf %109, %110 : vector<2x128xf32>
    %112 = arith.truncf %111 : vector<2x128xf32> to vector<2x128xbf16>
    %c3_56 = arith.constant 3 : index
    %c0_57 = arith.constant 0 : index
    %c0_58 = arith.constant 0 : index
    %113 = vector.load %arg4[%c3_56, %c0_57, %c0_58] : memref<4x128x256xbf16, #tpu.memory_space<vmem>>, vector<1x128x256xbf16>
    %114 = vector.shape_cast %113 : vector<1x128x256xbf16> to vector<128x256xbf16>
    %cst_59 = arith.constant dense<0.000000e+00> : vector<2x256xf32>
    %115 = tpu.matmul %112, %114, %cst_59 {dimension_numbers = #tpu.dot_dimension_numbers<[1], [0], [0], [1], [0, 0, 1, 1], [], []>} : vector<2x128xbf16>, vector<128x256xbf16>, vector<2x256xf32> -> vector<2x256xf32>
    %116 = arith.addf %87, %115 : vector<2x256xf32>
    %c0_60 = arith.constant 0 : index
    %c0_61 = arith.constant 0 : index
    %117 = vector.load %arg5[%c0_60, %c0_61] : memref<1x256xf32, #tpu.memory_space<vmem>>, vector<1x256xf32>
    %118 = vector.broadcast %117 : vector<1x256xf32> to vector<2x256xf32>
    %119 = arith.addf %116, %118 : vector<2x256xf32>
    %c0_62 = arith.constant 0 : index
    %c0_63 = arith.constant 0 : index
    %120 = vector.load %arg6[%c0_62, %c0_63] : memref<2x256xf32, #tpu.memory_space<vmem>>, vector<2x256xf32>
    tpu.vector_store %arg6[%c0_62, %c0_63], %119 {strides = array<i32>} : memref<2x256xf32, #tpu.memory_space<vmem>>, vector<2x256xf32>,
    return
  }
  func.func @transform_0(%arg0: i32) -> (i32, i32, i32) {
    %c0_i32 = arith.constant 0 : i32
    %c0_i32_0 = arith.constant 0 : i32
    %c0_i32_1 = arith.constant 0 : i32
    %c0_i32_2 = arith.constant 0 : i32
    return %c0_i32, %c0_i32_0, %c0_i32_1 : i32, i32, i32
  }
  func.func @transform_1(%arg0: i32) -> (i32, i32) {
    %c0_i32 = arith.constant 0 : i32
    %c0_i32_0 = arith.constant 0 : i32
    %c0_i32_1 = arith.constant 0 : i32
    return %c0_i32, %c0_i32_0 : i32, i32
  }
  func.func @transform_2(%arg0: i32) -> (i32, i32) {
    %c0_i32 = arith.constant 0 : i32
    %c0_i32_0 = arith.constant 0 : i32
    %c0_i32_1 = arith.constant 0 : i32
    return %c0_i32, %c0_i32_0 : i32, i32
  }
  func.func @transform_3(%arg0: i32) -> (i32, i32, i32) {
    %c0_i32 = arith.constant 0 : i32
    %c0_i32_0 = arith.constant 0 : i32
    %c0_i32_1 = arith.constant 0 : i32
    %c0_i32_2 = arith.constant 0 : i32
    return %c0_i32, %c0_i32_0, %c0_i32_1 : i32, i32, i32
  }
  func.func @transform_4(%arg0: i32) -> (i32, i32) {
    %c0_i32 = arith.constant 0 : i32
    %c0_i32_0 = arith.constant 0 : i32
    %c0_i32_1 = arith.constant 0 : i32
    return %c0_i32, %c0_i32_0 : i32, i32
  }
  func.func @transform_5(%arg0: i32) -> (i32, i32) {
    %c0_i32 = arith.constant 0 : i32
    %c0_i32_0 = arith.constant 0 : i32
    %c0_i32_1 = arith.constant 0 : i32
    return %c0_i32, %c0_i32_0 : i32, i32
  }
}

</mosaic_0001>

<bundles_post_ra>
// kernel: _lambda_.30
= control target key start
LH: loop header
LB: loop body
LE: loop exit
PB: predicated region body
PF: predicated region fallthrough
CT: control target
= control target key end

     0   :  { %v202_v0 = vmov 0   ;;  %vm124_vm0 = vcmask 523264   ;;  %s280_s1 = inlined_call_operand.vmem [shape: bf16[192,128], index: 1, kind: input, shape index: {}]   ;;  %s281_s0 = inlined_call_operand.vmem [shape: f32[16,192], index: 0, kind: input, shape index: {}]   ;;  %s282_s2 = inlined_call_operand.vmem [shape: f32[1,128], index: 2, kind: input, shape index: {}]   ;;  %s283_s3 = inlined_call_operand.vmem [shape: f32[16,128], index: 3, kind: output, shape index: {}]  }
   0x1   :  { %128 = vmatprep.subr.bf16.mxu0 %v202_v0  ;;  %v190_v1 = vld [vmem:[%s280_s1] sm:$0xff]   ;;  %v191_v2 = vld [vmem:[%s280_s1 + $0x8] sm:$0xff]   ;;  %v192_v3 = vld [vmem:[%s280_s1 + $0x10] sm:$0xff]  }
   0x2   :  { %129 = vmatpush1.bf16.msra.mxu0 %v190_v1  ;;  %v193_v4 = vld [vmem:[%s280_s1 + $0x18] sm:$0xff]   ;;  %v16_v5 = vld [vmem:[%s281_s0 + $0x8] sm:$0xff]  ;;  %v194_v8 = vld [vmem:[%s280_s1 + $0x20] sm:$0xff]  }
   0x3   :  { %130 = vmatprep.subr.bf16.mxu0 %v202_v0  ;;  %v18_v6 = vld [vmem:[%s281_s0 + $0x18] sm:$0xff]  ;;  %v195_v9 = vld [vmem:[%s280_s1 + $0x28] sm:$0xff]   ;;  %v196_v10 = vld [vmem:[%s280_s1 + $0x30] sm:$0xff]  }
   0x4   :  { %v20_v7 = vpack.c.bf16 %v18_v6, %v16_v5  ;;  %v197_v11 = vld [vmem:[%s280_s1 + $0x38] sm:$0xff]   ;;  %v198_v12 = vld [vmem:[%s280_s1 + $0x40] sm:$0xff]   ;;  %v199_v13 = vld [vmem:[%s280_s1 + $0x48] sm:$0xff]  }
   0x5   :  { %v200_v14 = vld [vmem:[%s280_s1 + $0x50] sm:$0xff]   ;;  %v201_v15 = vld [vmem:[%s280_s1 + $0x58] sm:$0xff]   ;;  %v15_v16 = vld [vmem:[%s281_s0] sm:$0xff] }
   0x6   :  { %131 = vmatpush1.bf16.msra.mxu0 %v191_v2  ;;  %188 = vmatprep.mubr.msk.bf16.mxu0 %vm124_vm0, %v20_v7  ;;  %v17_v17 = vld [vmem:[%s281_s0 + $0x10] sm:$0xff]  ;;  %v175_v19 = vld [vmem:[%s282_s2] ss:$0 sm:$0xff] }
   0x7   :  { %132 = vmatprep.subr.bf16.mxu0 %v202_v0  ;;  %v19_v18 = vpack.c.bf16 %v17_v17, %v15_v16 }
   0xa   :  { %133 = vmatpush1.bf16.msra.mxu0 %v192_v3 }
   0xb   :  { %134 = vmatprep.subr.bf16.mxu0 %v202_v0 }
   0xe   :  { %135 = vmatpush1.bf16.msra.mxu0 %v193_v4 }
   0xf   :  { %136 = vmatprep.subr.bf16.mxu0 %v202_v0 }
  0x12   :  { %137 = vmatpush1.bf16.msra.mxu0 %v194_v8 }
  0x13   :  { %138 = vmatprep.subr.bf16.mxu0 %v202_v0 }
  0x16   :  { %139 = vmatpush1.bf16.msra.mxu0 %v195_v9 }
  0x17   :  { %140 = vmatprep.subr.bf16.mxu0 %v202_v0 }
  0x1a   :  { %141 = vmatpush1.bf16.msra.mxu0 %v196_v10 }
  0x1b   :  { %142 = vmatprep.subr.bf16.mxu0 %v202_v0 }
  0x1e   :  { %143 = vmatpush1.bf16.msra.mxu0 %v197_v11 }
  0x1f   :  { %144 = vmatprep.subr.bf16.mxu0 %v202_v0 }
  0x22   :  { %145 = vmatpush1.bf16.msra.mxu0 %v198_v12 }
  0x23   :  { %146 = vmatprep.subr.bf16.mxu0 %v202_v0 }
  0x26   :  { %147 = vmatpush1.bf16.msra.mxu0 %v199_v13 }
  0x27   :  { %148 = vmatprep.subr.bf16.mxu0 %v202_v0 }
  0x2a   :  { %149 = vmatpush1.bf16.msra.mxu0 %v200_v14 }
  0x2b   :  { %150 = vmatprep.subr.bf16.mxu0 %v202_v0 }
  0x2e   :  { %151 = vmatpush1.bf16.msra.mxu0 %v201_v15 }
  0x31   :  { %161 = vmatmul.mubr.bf16.vlgmr.msra.gmra.mrb[0].mxu0 %v19_v18 }
 0x104   :  { %v162_v20 = vpop.f32.mrb[0].mxu0 }
 0x105   :  { %v163_v21 = vadd.f32 %v175_v19, %v162_v20  ;;  %v164_v22 = vpop.f32.mrb[1].mxu0 }
 0x106   :  { %v165_v23 = vpop.f32.mrb[2].mxu0 }
 0x107   :  { %169 = vst [vmem:[%s283_s3] sm:$0xff] %v163_v21  ;;  %v166_v24 = vadd.f32 %v175_v19, %v165_v23  ;;  %v167_v25 = vpop.f32.mrb[3].mxu0 }
 0x109   :  { %170 = vst [vmem:[%s283_s3 + $0x8] sm:$0xff] %v166_v24 }

// kernel: _lambda_.31
= control target key start
LH: loop header
LB: loop body
LE: loop exit
PB: predicated region body
PF: predicated region fallthrough
CT: control target
= control target key end

     0   :  { %v456_v3 = vmov 0.0   ;;  %v457_v30 = vmov 0   ;;  %vm458_vm0 = vmmov 0   ;;  %v99_v53 = vlaneseq  ;;  %s607_s0 = inlined_call_operand.vmem [shape: f32[16,128], index: 0, kind: input, shape index: {}]   ;;  %s608_s3 = inlined_call_operand.vmem [shape: bf16[128,384], index: 3, kind: input, shape index: {}]   ;;  %s609_s1 = inlined_call_operand.vmem [shape: f32[1,128], index: 1, kind: input, shape index: {}]   ;;  %s610_s2 = inlined_call_operand.vmem [shape: f32[1,128], index: 2, kind: input, shape index: {}]   ;;  %s611_s4 = inlined_call_operand.vmem [shape: f32[1,384], index: 4, kind: input, shape index: {}]   ;;  %s612_s5 = inlined_call_operand.vmem [shape: bf16[16,384], index: 5, kind: output, shape index: {}]  }
   0x1   :  { %v21_v0 = vld [vmem:[%s607_s0] sm:$0xff]  ;;  %v22_v1 = vld [vmem:[%s607_s0 + $0x8] sm:$0xff]  ;;  %397 = vmatprep.subr.bf16.mxu1 %v456_v3  ;;  %v430_v18 = vld [vmem:[%s608_s3 + $0x30] ss:$12 sps:$4 sm:$0xff]   ;;  %274 = vmatprep.mubr.bf16.mxu0 %v457_v30 }
   0x2   :  { %25 = vadd.xlane.f32.xlu0 %v21_v0  ;;  %v420_v2 = vld [vmem:[%s608_s3 + $0x4] ss:$12 sps:$4 sm:$0xff]   ;;  %v422_v4 = vld [vmem:[%s608_s3] ss:$12 sps:$4 sm:$0xff]   ;;  %v423_v5 = vld [vmem:[%s608_s3 + $0x8] ss:$12 sps:$4 sm:$0xff]   ;;  %413 = vmatprep.mubr.msk.bf16.mxu1 %vm458_vm0, %v456_v3 }
   0x3   :  { %242 = vmatprep.subr.bf16.mxu0 %v420_v2  ;;  %v424_v6 = vld [vmem:[%s608_s3 + $0x1c] ss:$12 sps:$4 sm:$0xff]   ;;  %398 = vmatpush3.bf16.msra.mxu1 %v423_v5  ;;  %v426_v15 = vld [vmem:[%s608_s3 + $0x18] ss:$12 sps:$4 sm:$0xff]   ;;  %v427_v16 = vld [vmem:[%s608_s3 + $0x20] ss:$12 sps:$4 sm:$0xff]  }
   0x4   :  { %243 = vmatpush1.bf16.msra.mxu0 %v422_v4  ;;  %399 = vmatprep.subr.bf16.mxu1 %v456_v3  ;;  %v428_v17 = vld [vmem:[%s608_s3 + $0x34] ss:$12 sps:$4 sm:$0xff]   ;;  %v431_v19 = vld [vmem:[%s608_s3 + $0x38] ss:$12 sps:$4 sm:$0xff]   ;;  %v435_v22 = vld [vmem:[%s608_s3 + $0x50] ss:$12 sps:$4 sm:$0xff]  }
   0x5   :  { %244 = vmatprep.subr.bf16.mxu0 %v424_v6  ;;  %v432_v20 = vld [vmem:[%s608_s3 + $0x4c] ss:$12 sps:$4 sm:$0xff]   ;;  %v434_v21 = vld [vmem:[%s608_s3 + $0x48] ss:$12 sps:$4 sm:$0xff]   ;;  %v436_v23 = vld [vmem:[%s608_s3 + $0x64] ss:$12 sps:$4 sm:$0xff]  }
   0x6   :  { %27 = vadd.xlane.f32.xlu0 %v22_v1  ;;  %v438_v24 = vld [vmem:[%s608_s3 + $0x60] ss:$12 sps:$4 sm:$0xff]   ;;  %v439_v25 = vld [vmem:[%s608_s3 + $0x68] ss:$12 sps:$4 sm:$0xff]   ;;  %v442_v27 = vld [vmem:[%s608_s3 + $0x78] ss:$12 sps:$4 sm:$0xff]  }
   0x7   :  { %400 = vmatpush3.bf16.msra.mxu1 %v427_v16  ;;  %v440_v26 = vld [vmem:[%s608_s3 + $0x7c] ss:$12 sps:$4 sm:$0xff]   ;;  %v443_v28 = vld [vmem:[%s608_s3 + $0x80] ss:$12 sps:$4 sm:$0xff]   ;;  %v447_v32 = vld [vmem:[%s608_s3 + $0x98] ss:$12 sps:$4 sm:$0xff]  }
   0x8   :  { %245 = vmatpush1.bf16.msra.mxu0 %v426_v15  ;;  %401 = vmatprep.subr.bf16.mxu1 %v456_v3  ;;  %v444_v29 = vld [vmem:[%s608_s3 + $0x94] ss:$12 sps:$4 sm:$0xff]   ;;  %v446_v31 = vld [vmem:[%s608_s3 + $0x90] ss:$12 sps:$4 sm:$0xff]   ;;  %v448_v33 = vld [vmem:[%s608_s3 + $0xac] ss:$12 sps:$4 sm:$0xff]  }
   0x9   :  { %246 = vmatprep.subr.bf16.mxu0 %v428_v17  ;;  %v450_v34 = vld [vmem:[%s608_s3 + $0xa8] ss:$12 sps:$4 sm:$0xff]   ;;  %v451_v35 = vld [vmem:[%s608_s3 + $0xb0] ss:$12 sps:$4 sm:$0xff]   ;;  %v354_v44 = vld [vmem:[%s609_s1] ss:$0 sm:$0xff] }
   0xa   :  { %v355_v48 = vld [vmem:[%s610_s2] ss:$0 sm:$0xff]  ;;  %v100_v54 = vshrl.u32 %v99_v53, 7 }
   0xb   :  { %402 = vmatpush3.bf16.msra.mxu1 %v431_v19  ;;  %v97_v57 = vld [vmem:[%s611_s4] sm:$0x7] }
   0xc   :  { %247 = vmatpush1.bf16.msra.mxu0 %v430_v18  ;;  %403 = vmatprep.subr.bf16.mxu1 %v456_v3  ;;  %v101_v55 = vsub.s32 0, %v100_v54  ;;  %v109_v56 = vsub.s32 2, %v100_v54  ;;  %v105_v58 = vsub.s32 1, %v100_v54 }
   0xd   :  { %248 = vmatprep.subr.bf16.mxu0 %v432_v20 }
   0xe   :  { %v102_v59 = vrot.slane %v97_v57, %v101_v55  ;;  %v110_v60 = vrot.slane %v97_v57, %v109_v56  ;;  %v106_v61 = vrot.slane %v97_v57, %v105_v58 }
   0xf   :  { %404 = vmatpush3.bf16.msra.mxu1 %v435_v22 }
  0x10   :  { %249 = vmatpush1.bf16.msra.mxu0 %v434_v21  ;;  %405 = vmatprep.subr.bf16.mxu1 %v456_v3 }
  0x11   :  { %250 = vmatprep.subr.bf16.mxu0 %v436_v23 }
  0x13   :  { %406 = vmatpush3.bf16.msra.mxu1 %v439_v25 }
  0x14   :  { %251 = vmatpush1.bf16.msra.mxu0 %v438_v24  ;;  %407 = vmatprep.subr.bf16.mxu1 %v456_v3 }
  0x15   :  { %252 = vmatprep.subr.bf16.mxu0 %v440_v26 }
  0x17   :  { %408 = vmatpush3.bf16.msra.mxu1 %v443_v28 }
  0x18   :  { %253 = vmatpush1.bf16.msra.mxu0 %v442_v27  ;;  %409 = vmatprep.subr.bf16.mxu1 %v456_v3 }
  0x19   :  { %254 = vmatprep.subr.bf16.mxu0 %v444_v29 }
  0x1b   :  { %410 = vmatpush3.bf16.msra.mxu1 %v447_v32 }
  0x1c   :  { %255 = vmatpush1.bf16.msra.mxu0 %v446_v31  ;;  %411 = vmatprep.subr.bf16.mxu1 %v456_v3 }
  0x1d   :  { %256 = vmatprep.subr.bf16.mxu0 %v448_v33 }
  0x1f   :  { %412 = vmatpush3.bf16.msra.mxu1 %v451_v35 }
  0x20   :  { %257 = vmatpush1.bf16.msra.mxu0 %v450_v34 }
  0x8f   :  { %v26_v7 = vpop.xlane.xlu0 %25 }
  0x90   :  { %v30_v8 = vmul.f32 0.0078125, %v26_v7 }
  0x92   :  { %v509_v9 = vsub.f32 %v21_v0, %v30_v8 }
  0x93   :  { %v28_v10 = vpop.xlane.xlu0 %27 }
  0x94   :  { %v31_v11 = vmul.f32 0.0078125, %v28_v10  ;;  %v34_v12 = vmul.f32 %v509_v9, %v509_v9 }
  0x96   :  { %v513_v13 = vsub.f32 %v22_v1, %v31_v11  ;;  %36 = vadd.xlane.f32.xlu1 %v34_v12 }
  0x98   :  { %v35_v14 = vmul.f32 %v513_v13, %v513_v13 }
  0x9a   :  { %38 = vadd.xlane.f32.xlu1 %v35_v14 }
 0x123   :  { %v37_v36 = vpop.xlane.xlu1 %36 }
 0x124   :  { %v40_v37 = vmul.f32 0.0078125, %v37_v36 }
 0x126   :  { %v42_v38 = vadd.f32 1e-06, %v40_v37 }
 0x127   :  { %v39_v39 = vpop.xlane.xlu1 %38 }
 0x128   :  { %452 = vrsqrt.f32 %v42_v38  ;;  %v41_v40 = vmul.f32 0.0078125, %v39_v39 }
 0x12a   :  { %v43_v41 = vadd.f32 1e-06, %v41_v40 }
 0x12c   :  { %454 = vrsqrt.f32 %v43_v41 }
 0x132   :  { %v453_v42 = vpop.eup %452 }
 0x133   :  { %v46_v43 = vmul.f32 %v453_v42, %v509_v9 }
 0x135   :  { %v54_v47 = vmul.f32 %v354_v44, %v46_v43 }
 0x136   :  { %v455_v45 = vpop.eup %454 }
 0x137   :  { %v47_v46 = vmul.f32 %v455_v45, %v513_v13  ;;  %v62_v50 = vadd.f32 %v355_v48, %v54_v47 }
 0x139   :  { %v55_v49 = vmul.f32 %v354_v44, %v47_v46 }
 0x13b   :  { %v63_v51 = vadd.f32 %v355_v48, %v55_v49 }
 0x13d   :  { %v64_v52 = vpack.c.bf16 %v63_v51, %v62_v50 }
 0x13f   :  { %275 = vmatmul.mubr.bf16.vlgmr.msra.gmra.mrb[0].mxu0 %v64_v52  ;;  %414 = vmatmul.mubr.bf16.vlgmr.msra.gmra.mrb[0].mxu1 %v64_v52 }
 0x212   :  { %v276_v62 = vpop.f32.mrb[0].mxu0  ;;  %v319_v63 = vpop.f32.mrb[0].mxu1 }
 0x213   :  { %v277_v0 = vadd.f32 %v276_v62, %v102_v59  ;;  %v320_v1 = vadd.f32 %v319_v63, %v110_v60  ;;  %v278_v2 = vpop.f32.mrb[1].mxu0  ;;  %v415_v3 = vpop.f32.mrb[1].mxu1 }
 0x214   :  { %v279_v4 = vadd.f32 %v278_v2, %v106_v61  ;;  %v280_v5 = vpop.f32.mrb[2].mxu0  ;;  %v322_v6 = vpop.f32.mrb[2].mxu1 }
 0x215   :  { %v385_v7 = vpack.c.bf16 %v320_v1, %v320_v1  ;;  %v281_v8 = vadd.f32 %v280_v5, %v102_v59  ;;  %v323_v9 = vadd.f32 %v322_v6, %v110_v60  ;;  %v282_v10 = vpop.f32.mrb[3].mxu0  ;;  %v416_v11 = vpop.f32.mrb[3].mxu1 }
 0x216   :  { %v384_v12 = vpack.c.bf16 %v279_v4, %v277_v0  ;;  %v283_v13 = vadd.f32 %v282_v10, %v106_v61 }
 0x217   :  { %347 = vst [vmem:[%s612_s5 + $0x8] sm:$0xf] %v385_v7  ;;  %v387_v14 = vpack.c.bf16 %v323_v9, %v323_v9 }
 0x218   :  { %346 = vst [vmem:[%s612_s5] sm:$0xff] %v384_v12  ;;  %v386_v15 = vpack.c.bf16 %v283_v13, %v281_v8 }
 0x219   :  { %349 = vst [vmem:[%s612_s5 + $0x14] sm:$0xf] %v387_v14 }
 0x21a   :  { %348 = vst [vmem:[%s612_s5 + $0xc] sm:$0xff] %v386_v15 }

// kernel: _lambda_.33
= control target key start
LH: loop header
LB: loop body
LE: loop exit
PB: predicated region body
PF: predicated region fallthrough
CT: control target
= control target key end

     0   :  { %v363_v0 = vmov 0.0   ;;  %vm364_vm0 = vmmov 0   ;;  %s469_s2 = inlined_call_operand.vmem [shape: bf16[128,128], index: 2, kind: input, shape index: {}]   ;;  %s470_s4 = inlined_call_operand.vmem [shape: bf16[128,128], index: 4, kind: input, shape index: {}]   ;;  %s471_s0 = inlined_call_operand.vmem [shape: bf16[16,128], index: 0, kind: input, shape index: {}]   ;;  %s472_s3 = inlined_call_operand.vmem [shape: f32[1,128], index: 3, kind: input, shape index: {}, may-alias: {3,5}]   ;;  %s473_s5 = inlined_call_operand.vmem [shape: f32[1,128], index: 5, kind: input, shape index: {}, may-alias: {3,5}]   ;;  %s474_s1 = inlined_call_operand.vmem [shape: f32[16,128], index: 1, kind: input, shape index: {}]   ;;  %s475_s6 = inlined_call_operand.vmem [shape: f32[16,128], index: 6, kind: output, shape index: {}]  }
   0x1   :  { %304 = vmatprep.subr.bf16.mxu0 %v363_v0  ;;  %v346_v1 = vld [vmem:[%s469_s2] sm:$0xff]   ;;  %320 = vmatprep.mubr.msk.bf16.mxu0 %vm364_vm0, %v363_v0  ;;  %v347_v2 = vld [vmem:[%s469_s2 + $0x8] sm:$0xff]   ;;  %v348_v3 = vld [vmem:[%s469_s2 + $0x10] sm:$0xff]  }
   0x2   :  { %324 = vmatprep.subr.bf16.mxu1 %v363_v0  ;;  %340 = vmatprep.mubr.msk.bf16.mxu1 %vm364_vm0, %v363_v0  ;;  %v355_v4 = vld [vmem:[%s470_s4] sm:$0xff]   ;;  %v349_v5 = vld [vmem:[%s469_s2 + $0x18] sm:$0xff]   ;;  %v356_v6 = vld [vmem:[%s470_s4 + $0x8] sm:$0xff]  }
   0x3   :  { %305 = vmatpush3.bf16.msra.mxu0 %v346_v1  ;;  %325 = vmatpush3.bf16.msra.mxu1 %v355_v4  ;;  %v350_v7 = vld [vmem:[%s469_s2 + $0x20] sm:$0xff]   ;;  %v357_v8 = vld [vmem:[%s470_s4 + $0x10] sm:$0xff]   ;;  %v351_v9 = vld [vmem:[%s469_s2 + $0x28] sm:$0xff]  }
   0x4   :  { %306 = vmatprep.subr.bf16.mxu0 %v363_v0  ;;  %326 = vmatprep.subr.bf16.mxu1 %v363_v0  ;;  %v358_v10 = vld [vmem:[%s470_s4 + $0x18] sm:$0xff]   ;;  %v352_v11 = vld [vmem:[%s469_s2 + $0x30] sm:$0xff]   ;;  %v359_v12 = vld [vmem:[%s470_s4 + $0x20] sm:$0xff]  }
   0x5   :  { %v353_v13 = vld [vmem:[%s469_s2 + $0x38] sm:$0xff]   ;;  %v360_v14 = vld [vmem:[%s470_s4 + $0x28] sm:$0xff]   ;;  %v354_v15 = vld [vmem:[%s471_s0] sm:$0xff]  }
   0x6   :  { %v361_v16 = vld [vmem:[%s470_s4 + $0x30] sm:$0xff]   ;;  %v362_v17 = vld [vmem:[%s470_s4 + $0x38] sm:$0xff]   ;;  %v267_v18 = vld [vmem:[%s472_s3] ss:$0 sm:$0xff] }
   0x7   :  { %307 = vmatpush3.bf16.msra.mxu0 %v347_v2  ;;  %327 = vmatpush3.bf16.msra.mxu1 %v356_v6  ;;  %v277_v26 = vld [vmem:[%s473_s5] ss:$0 sm:$0xff]  ;;  %v258_v32 = vld [vmem:[%s474_s1 + $0x8] sm:$0xff] }
   0x8   :  { %308 = vmatprep.subr.bf16.mxu0 %v363_v0  ;;  %328 = vmatprep.subr.bf16.mxu1 %v363_v0  ;;  %v257_v28 = vld [vmem:[%s474_s1] sm:$0xff] }
   0xb   :  { %309 = vmatpush3.bf16.msra.mxu0 %v348_v3  ;;  %329 = vmatpush3.bf16.msra.mxu1 %v357_v8 }
   0xc   :  { %310 = vmatprep.subr.bf16.mxu0 %v363_v0  ;;  %330 = vmatprep.subr.bf16.mxu1 %v363_v0 }
   0xf   :  { %311 = vmatpush3.bf16.msra.mxu0 %v349_v5  ;;  %331 = vmatpush3.bf16.msra.mxu1 %v358_v10 }
  0x10   :  { %312 = vmatprep.subr.bf16.mxu0 %v363_v0  ;;  %332 = vmatprep.subr.bf16.mxu1 %v363_v0 }
  0x13   :  { %313 = vmatpush3.bf16.msra.mxu0 %v350_v7  ;;  %333 = vmatpush3.bf16.msra.mxu1 %v359_v12 }
  0x14   :  { %314 = vmatprep.subr.bf16.mxu0 %v363_v0  ;;  %334 = vmatprep.subr.bf16.mxu1 %v363_v0 }
  0x17   :  { %315 = vmatpush3.bf16.msra.mxu0 %v351_v9  ;;  %335 = vmatpush3.bf16.msra.mxu1 %v360_v14 }
  0x18   :  { %316 = vmatprep.subr.bf16.mxu0 %v363_v0  ;;  %336 = vmatprep.subr.bf16.mxu1 %v363_v0 }
  0x1b   :  { %317 = vmatpush3.bf16.msra.mxu0 %v352_v11  ;;  %337 = vmatpush3.bf16.msra.mxu1 %v361_v16 }
  0x1c   :  { %318 = vmatprep.subr.bf16.mxu0 %v363_v0  ;;  %338 = vmatprep.subr.bf16.mxu1 %v363_v0 }
  0x1f   :  { %319 = vmatpush3.bf16.msra.mxu0 %v353_v13  ;;  %339 = vmatpush3.bf16.msra.mxu1 %v362_v17 }
  0x22   :  { %321 = vmatmul.mubr.bf16.vlgmr.msra.gmra.mrb[0].mxu0 %v354_v15 }
  0xf5   :  { %v137_v19 = vpop.f32.mrb[0].mxu0 }
  0xf6   :  { %v322_v20 = vpop.f32.mrb[1].mxu0  ;;  %v138_v22 = vadd.f32 %v267_v18, %v137_v19 }
  0xf7   :  { %v140_v21 = vpop.f32.mrb[2].mxu0 }
  0xf8   :  { %v141_v23 = vadd.f32 %v267_v18, %v140_v21  ;;  %v323_v24 = vpop.f32.mrb[3].mxu0 }
  0xfa   :  { %v144_v25 = vpack.c.bf16 %v141_v23, %v138_v22 }
  0xfc   :  { %341 = vmatmul.mubr.bf16.vlgmr.msra.gmra.mrb[0].mxu1 %v144_v25 }
 0x1cf   :  { %v250_v27 = vpop.f32.mrb[0].mxu1 }
 0x1d0   :  { %v251_v29 = vadd.f32 %v277_v26, %v250_v27  ;;  %v342_v30 = vpop.f32.mrb[1].mxu1 }
 0x1d1   :  { %v253_v31 = vpop.f32.mrb[2].mxu1 }
 0x1d2   :  { %v259_v33 = vadd.f32 %v257_v28, %v251_v29  ;;  %v254_v34 = vadd.f32 %v277_v26, %v253_v31  ;;  %v343_v35 = vpop.f32.mrb[3].mxu1 }
 0x1d4   :  { %261 = vst [vmem:[%s475_s6] sm:$0xff] %v259_v33  ;;  %v260_v36 = vadd.f32 %v258_v32, %v254_v34 }
 0x1d6   :  { %262 = vst [vmem:[%s475_s6 + $0x8] sm:$0xff] %v260_v36 }

// kernel: _lambda_.34
= control target key start
LH: loop header
LB: loop body
LE: loop exit
PB: predicated region body
PF: predicated region fallthrough
CT: control target
= control target key end

     0   :  { %vm30_vm0 = vcmask 1043456   ;;  %v509_v37 = vmov 0   ;;  %s665_s0 = inlined_call_operand.vmem [shape: f32[20,128], index: 0, kind: input, shape index: {}]   ;;  %s666_s3 = inlined_call_operand.vmem [shape: bf16[128,384], index: 3, kind: input, shape index: {}]   ;;  %s667_s1 = inlined_call_operand.vmem [shape: f32[1,128], index: 1, kind: input, shape index: {}]   ;;  %s668_s2 = inlined_call_operand.vmem [shape: f32[1,128], index: 2, kind: input, shape index: {}]   ;;  %s669_s4 = inlined_call_operand.vmem [shape: f32[1,384], index: 4, kind: input, shape index: {}]   ;;  %s670_s5 = inlined_call_operand.vmem [shape: bf16[20,384], index: 5, kind: output, shape index: {}]  }
   0x1   :  { %v21_v0 = vld [vmem:[%s665_s0] sm:$0xff]  ;;  %v23_v1 = vld [vmem:[%s665_s0 + $0x10] sm:$0xf]  ;;  %v22_v3 = vld [vmem:[%s665_s0 + $0x8] sm:$0xff]  ;;  %292 = vmatprep.mubr.bf16.mxu0 %v509_v37 }
   0x2   :  { %26 = vadd.xlane.f32.xlu0 %v21_v0  ;;  %v31_v2 = vsel %vm30_vm0, %v23_v1, 0.0  ;;  %v471_v4 = vld [vmem:[%s666_s3 + $0x4] ss:$12 sps:$4 sm:$0xff]   ;;  %v473_v5 = vld [vmem:[%s666_s3] ss:$12 sps:$4 sm:$0xff]  }
   0x3   :  { %32 = vadd.xlane.f32.xlu1 %v31_v2  ;;  %260 = vmatprep.subr.bf16.mxu0 %v471_v4  ;;  %v474_v6 = vld [vmem:[%s666_s3 + $0x8] ss:$12 sps:$4 sm:$0xff]   ;;  %v477_v21 = vld [vmem:[%s666_s3 + $0x18] ss:$12 sps:$4 sm:$0xff]   ;;  %v478_v22 = vld [vmem:[%s666_s3 + $0x20] ss:$12 sps:$4 sm:$0xff]  }
   0x4   :  { %261 = vmatpush1.bf16.msra.mxu0 %v473_v5  ;;  %v475_v7 = vld [vmem:[%s666_s3 + $0x1c] ss:$12 sps:$4 sm:$0xff]   ;;  %450 = vmatprep.subr.bf16.mxu1 %v474_v6  ;;  %v479_v23 = vld [vmem:[%s666_s3 + $0x34] ss:$12 sps:$4 sm:$0xff]   ;;  %v482_v25 = vld [vmem:[%s666_s3 + $0x38] ss:$12 sps:$4 sm:$0xff]  }
   0x5   :  { %451 = vmatpush3.bf16.msra.mxu1 %v474_v6  ;;  %262 = vmatprep.subr.bf16.mxu0 %v475_v7  ;;  %v481_v24 = vld [vmem:[%s666_s3 + $0x30] ss:$12 sps:$4 sm:$0xff]   ;;  %v483_v26 = vld [vmem:[%s666_s3 + $0x4c] ss:$12 sps:$4 sm:$0xff]   ;;  %v485_v27 = vld [vmem:[%s666_s3 + $0x48] ss:$12 sps:$4 sm:$0xff]  }
   0x6   :  { %28 = vadd.xlane.f32.xlu0 %v22_v3  ;;  %452 = vmatprep.subr.bf16.mxu1 %v478_v22  ;;  %v486_v28 = vld [vmem:[%s666_s3 + $0x50] ss:$12 sps:$4 sm:$0xff]   ;;  %v489_v30 = vld [vmem:[%s666_s3 + $0x60] ss:$12 sps:$4 sm:$0xff]   ;;  %v490_v31 = vld [vmem:[%s666_s3 + $0x68] ss:$12 sps:$4 sm:$0xff]  }
   0x7   :  { %v487_v29 = vld [vmem:[%s666_s3 + $0x64] ss:$12 sps:$4 sm:$0xff]   ;;  %v491_v32 = vld [vmem:[%s666_s3 + $0x7c] ss:$12 sps:$4 sm:$0xff]   ;;  %v494_v33 = vld [vmem:[%s666_s3 + $0x80] ss:$12 sps:$4 sm:$0xff]  }
   0x8   :  { %263 = vmatpush1.bf16.msra.mxu0 %v477_v21  ;;  %v493_v34 = vld [vmem:[%s666_s3 + $0x78] ss:$12 sps:$4 sm:$0xff]   ;;  %v495_v35 = vld [vmem:[%s666_s3 + $0x94] ss:$12 sps:$4 sm:$0xff]   ;;  %v497_v38 = vld [vmem:[%s666_s3 + $0x90] ss:$12 sps:$4 sm:$0xff]  }
   0x9   :  { %453 = vmatpush3.bf16.msra.mxu1 %v478_v22  ;;  %264 = vmatprep.subr.bf16.mxu0 %v479_v23  ;;  %v498_v36 = vld [vmem:[%s666_s3 + $0x98] ss:$12 sps:$4 sm:$0xff]   ;;  %v502_v40 = vld [vmem:[%s666_s3 + $0xb0] ss:$12 sps:$4 sm:$0xff]   ;;  %v501_v41 = vld [vmem:[%s666_s3 + $0xa8] ss:$12 sps:$4 sm:$0xff]  }
   0xa   :  { %454 = vmatprep.subr.bf16.mxu1 %v482_v25  ;;  %v499_v39 = vld [vmem:[%s666_s3 + $0xac] ss:$12 sps:$4 sm:$0xff]   ;;  %v402_v53 = vld [vmem:[%s667_s1] ss:$0 sm:$0xff] }
   0xb   :  { %v403_v59 = vld [vmem:[%s668_s2] ss:$0 sm:$0xff] }
   0xc   :  { %265 = vmatpush1.bf16.msra.mxu0 %v481_v24  ;;  %v115_v6 = vld [vmem:[%s669_s4] sm:$0x7] }
   0xd   :  { %455 = vmatpush3.bf16.msra.mxu1 %v482_v25  ;;  %266 = vmatprep.subr.bf16.mxu0 %v483_v26 }
   0xe   :  { %456 = vmatprep.subr.bf16.mxu1 %v486_v28 }
  0x10   :  { %267 = vmatpush1.bf16.msra.mxu0 %v485_v27 }
  0x11   :  { %457 = vmatpush3.bf16.msra.mxu1 %v486_v28  ;;  %268 = vmatprep.subr.bf16.mxu0 %v487_v29 }
  0x12   :  { %458 = vmatprep.subr.bf16.mxu1 %v490_v31 }
  0x14   :  { %269 = vmatpush1.bf16.msra.mxu0 %v489_v30 }
  0x15   :  { %459 = vmatpush3.bf16.msra.mxu1 %v490_v31  ;;  %270 = vmatprep.subr.bf16.mxu0 %v491_v32 }
  0x16   :  { %460 = vmatprep.subr.bf16.mxu1 %v494_v33 }
  0x18   :  { %271 = vmatpush1.bf16.msra.mxu0 %v493_v34 }
  0x19   :  { %461 = vmatpush3.bf16.msra.mxu1 %v494_v33  ;;  %272 = vmatprep.subr.bf16.mxu0 %v495_v35 }
  0x1a   :  { %462 = vmatprep.subr.bf16.mxu1 %v498_v36 }
  0x1c   :  { %273 = vmatpush1.bf16.msra.mxu0 %v497_v38 }
  0x1d   :  { %463 = vmatpush3.bf16.msra.mxu1 %v498_v36  ;;  %274 = vmatprep.subr.bf16.mxu0 %v499_v39 }
  0x1e   :  { %464 = vmatprep.subr.bf16.mxu1 %v502_v40 }
  0x20   :  { %275 = vmatpush1.bf16.msra.mxu0 %v501_v41 }
  0x21   :  { %465 = vmatpush3.bf16.msra.mxu1 %v502_v40 }
  0x8f   :  { %v27_v8 = vpop.xlane.xlu0 %26 }
  0x90   :  { %v35_v9 = vmul.f32 0.0078125, %v27_v8  ;;  %v33_v10 = vpop.xlane.xlu1 %32 }
  0x91   :  { %v37_v11 = vmul.f32 0.0078125, %v33_v10 }
  0x92   :  { %v562_v12 = vsub.f32 %v21_v0, %v35_v9 }
  0x93   :  { %v564_v13 = vsub.f32 %v23_v1, %v37_v11  ;;  %v29_v14 = vpop.xlane.xlu0 %28 }
  0x94   :  { %v36_v15 = vmul.f32 0.0078125, %v29_v14  ;;  %v41_v16 = vmul.f32 %v562_v12, %v562_v12 }
  0x95   :  { %v43_v17 = vmul.f32 %v564_v13, %v564_v13 }
  0x96   :  { %v570_v18 = vsub.f32 %v22_v3, %v36_v15  ;;  %44 = vadd.xlane.f32.xlu1 %v41_v16  ;;  %v117_v3 = vlaneseq }
  0x97   :  { %v48_v19 = vsel %vm30_vm0, %v43_v17, 0.0 }
  0x98   :  { %v42_v20 = vmul.f32 %v570_v18, %v570_v18  ;;  %v118_v4 = vshrl.u32 %v117_v3, 7 }
  0x9a   :  { %49 = vadd.xlane.f32.xlu1 %v48_v19  ;;  %46 = vadd.xlane.f32.xlu0 %v42_v20  ;;  %v119_v5 = vsub.s32 0, %v118_v4  ;;  %v123_v7 = vsub.s32 1, %v118_v4  ;;  %v127_v8 = vsub.s32 2, %v118_v4 }
  0x9c   :  { %v120_v9 = vrot.slane %v115_v6, %v119_v5  ;;  %v124_v10 = vrot.slane %v115_v6, %v123_v7  ;;  %v128_v11 = vrot.slane %v115_v6, %v127_v8 }
 0x123   :  { %v45_v42 = vpop.xlane.xlu1 %44 }
 0x124   :  { %v51_v43 = vmul.f32 0.0078125, %v45_v42 }
 0x126   :  { %v54_v44 = vadd.f32 1e-06, %v51_v43 }
 0x127   :  { %v50_v45 = vpop.xlane.xlu1 %49  ;;  %v47_v46 = vpop.xlane.xlu0 %46 }
 0x128   :  { %503 = vrsqrt.f32 %v54_v44  ;;  %v53_v47 = vmul.f32 0.0078125, %v50_v45  ;;  %v52_v48 = vmul.f32 0.0078125, %v47_v46 }
 0x12a   :  { %v56_v49 = vadd.f32 1e-06, %v53_v47  ;;  %v55_v50 = vadd.f32 1e-06, %v52_v48 }
 0x12c   :  { %505 = vrsqrt.f32 %v56_v49 }
 0x12d   :  { %507 = vrsqrt.f32 %v55_v50 }
 0x132   :  { %v504_v51 = vpop.eup %503 }
 0x133   :  { %v60_v52 = vmul.f32 %v504_v51, %v562_v12 }
 0x135   :  { %v69_v58 = vmul.f32 %v402_v53, %v60_v52 }
 0x136   :  { %v506_v54 = vpop.eup %505 }
 0x137   :  { %v508_v55 = vpop.eup %507  ;;  %v62_v56 = vmul.f32 %v506_v54, %v564_v13  ;;  %v78_v63 = vadd.f32 %v403_v59, %v69_v58 }
 0x138   :  { %v61_v57 = vmul.f32 %v508_v55, %v570_v18 }
 0x139   :  { %v71_v60 = vmul.f32 %v402_v53, %v62_v56 }
 0x13a   :  { %v70_v61 = vmul.f32 %v402_v53, %v61_v57 }
 0x13b   :  { %v80_v62 = vadd.f32 %v403_v59, %v71_v60 }
 0x13c   :  { %v79_v0 = vadd.f32 %v403_v59, %v70_v61 }
 0x13d   :  { %v82_v1 = vpack.c.bf16 %v80_v62, %v80_v62 }
 0x13e   :  { %v81_v2 = vpack.c.bf16 %v79_v0, %v78_v63 }
 0x140   :  { %293 = vmatmul.mubr.bf16.vlgmr.msra.gmra.mrb[0].mxu0 %v81_v2  ;;  %466 = vmatprep.mubr.bf16.mxu1 %v81_v2 }
 0x141   :  { %467 = vmatmul.mubr.bf16.vlgmr.msra.gmra.mrb[0].mxu1 %v82_v1  ;;  %302 = vmatprep.mubr.bf16.mxu0 %v509_v37 }
 0x148   :  { %303 = vmatmul.mubr.bf16.gmra.mrb[4].mxu0 %v82_v1 }
 0x213   :  { %v294_v12 = vpop.f32.mrb[0].mxu0 }
 0x214   :  { %v295_v13 = vadd.f32 %v294_v12, %v120_v9  ;;  %v296_v14 = vpop.f32.mrb[1].mxu0  ;;  %v468_v15 = vpop.f32.mrb[0].mxu1 }
 0x215   :  { %v297_v16 = vadd.f32 %v296_v14, %v124_v10  ;;  %v354_v17 = vadd.f32 %v468_v15, %v128_v11  ;;  %v298_v18 = vpop.f32.mrb[2].mxu0  ;;  %v345_v19 = vpop.f32.mrb[1].mxu1 }
 0x216   :  { %v299_v20 = vadd.f32 %v298_v18, %v120_v9  ;;  %v346_v21 = vadd.f32 %v345_v19, %v128_v11  ;;  %v300_v22 = vpop.f32.mrb[3].mxu0  ;;  %v469_v23 = vpop.f32.mrb[2].mxu1 }
 0x217   :  { %v434_v24 = vpack.c.bf16 %v297_v16, %v295_v13  ;;  %v439_v25 = vpack.c.bf16 %v354_v17, %v354_v17  ;;  %v301_v26 = vadd.f32 %v300_v22, %v124_v10  ;;  %v348_v27 = vpop.f32.mrb[3].mxu1 }
 0x218   :  { %v435_v28 = vpack.c.bf16 %v346_v21, %v346_v21  ;;  %v349_v29 = vadd.f32 %v348_v27, %v128_v11 }
 0x219   :  { %392 = vst [vmem:[%s670_s5] sm:$0xff] %v434_v24  ;;  %397 = vst [vmem:[%s670_s5 + $0x20] sm:$0x3] %v439_v25  ;;  %v436_v30 = vpack.c.bf16 %v301_v26, %v299_v20 }
 0x21a   :  { %393 = vst [vmem:[%s670_s5 + $0x8] sm:$0xf] %v435_v28  ;;  %v437_v31 = vpack.c.bf16 %v349_v29, %v349_v29 }
 0x21b   :  { %394 = vst [vmem:[%s670_s5 + $0xc] sm:$0xff] %v436_v30  ;;  %v304_v32 = vpop.f32.mrb[4].mxu0 }
 0x21c   :  { %395 = vst [vmem:[%s670_s5 + $0x14] sm:$0xf] %v437_v31  ;;  %v305_v33 = vadd.f32 %v304_v32, %v120_v9  ;;  %v306_v34 = vpop.f32.mrb[5].mxu0 }
 0x21d   :  { %v307_v35 = vadd.f32 %v306_v34, %v124_v10  ;;  %v308_v36 = vpop.f32.mrb[6].mxu0 }
 0x21e   :  { %v309_v37 = vpop.f32.mrb[7].mxu0 }
 0x21f   :  { %v438_v38 = vpack.c.bf16 %v307_v35, %v305_v33 }
 0x221   :  { %396 = vst [vmem:[%s670_s5 + $0x18] sm:$0x33] %v438_v38 }

// kernel: _lambda_.36
= control target key start
LH: loop header
LB: loop body
LE: loop exit
PB: predicated region body
PF: predicated region fallthrough
CT: control target
= control target key end

     0   :  { %s290_s2 = inlined_call_operand.vmem [shape: bf16[128,128], index: 2, kind: input, shape index: {}]   ;;  %s291_s0 = inlined_call_operand.vmem [shape: bf16[20,128], index: 0, kind: input, shape index: {}]   ;;  %s292_s3 = inlined_call_operand.vmem [shape: f32[1,128], index: 3, kind: input, shape index: {}]   ;;  %s293_s1 = inlined_call_operand.vmem [shape: f32[20,128], index: 1, kind: input, shape index: {}]   ;;  %s294_s4 = inlined_call_operand.vmem [shape: f32[20,128], index: 4, kind: output, shape index: {}]  }
   0x1   :  { %v204_v0 = vld [vmem:[%s290_s2] sm:$0xff]   ;;  %v205_v1 = vld [vmem:[%s290_s2 + $0x8] sm:$0xff]   ;;  %v206_v2 = vld [vmem:[%s290_s2 + $0x10] sm:$0xff]  }
   0x2   :  { %184 = vmatprep.subr.bf16.mxu0 %v204_v0  ;;  %v207_v3 = vld [vmem:[%s290_s2 + $0x18] sm:$0xff]   ;;  %v212_v4 = vld [vmem:[%s291_s0] sm:$0xff]   ;;  %v209_v6 = vld [vmem:[%s290_s2 + $0x28] sm:$0xff]  }
   0x3   :  { %185 = vmatpush3.bf16.msra.mxu0 %v204_v0  ;;  %200 = vmatprep.mubr.bf16.mxu0 %v212_v4  ;;  %v208_v5 = vld [vmem:[%s290_s2 + $0x20] sm:$0xff]   ;;  %v210_v7 = vld [vmem:[%s290_s2 + $0x30] sm:$0xff]   ;;  %v211_v8 = vld [vmem:[%s290_s2 + $0x38] sm:$0xff]  }
   0x4   :  { %186 = vmatprep.subr.bf16.mxu0 %v205_v1  ;;  %v213_v9 = vld [vmem:[%s291_s0 + $0x8] ss:$0 sps:$4 sm:$0x33]   ;;  %v163_v10 = vld [vmem:[%s292_s3] ss:$0 sm:$0xff] }
   0x5   :  { %v152_v12 = vld [vmem:[%s293_s1 + $0x10] sm:$0xf]  ;;  %v150_v15 = vld [vmem:[%s293_s1] sm:$0xff]  ;;  %v151_v20 = vld [vmem:[%s293_s1 + $0x8] sm:$0xff] }
   0x7   :  { %187 = vmatpush3.bf16.msra.mxu0 %v205_v1 }
   0x8   :  { %188 = vmatprep.subr.bf16.mxu0 %v206_v2 }
   0xb   :  { %189 = vmatpush3.bf16.msra.mxu0 %v206_v2 }
   0xc   :  { %190 = vmatprep.subr.bf16.mxu0 %v207_v3 }
   0xf   :  { %191 = vmatpush3.bf16.msra.mxu0 %v207_v3 }
  0x10   :  { %192 = vmatprep.subr.bf16.mxu0 %v208_v5 }
  0x13   :  { %193 = vmatpush3.bf16.msra.mxu0 %v208_v5 }
  0x14   :  { %194 = vmatprep.subr.bf16.mxu0 %v209_v6 }
  0x17   :  { %195 = vmatpush3.bf16.msra.mxu0 %v209_v6 }
  0x18   :  { %196 = vmatprep.subr.bf16.mxu0 %v210_v7 }
  0x1b   :  { %197 = vmatpush3.bf16.msra.mxu0 %v210_v7 }
  0x1c   :  { %198 = vmatprep.subr.bf16.mxu0 %v211_v8 }
  0x1f   :  { %199 = vmatpush3.bf16.msra.mxu0 %v211_v8 }
  0x22   :  { %201 = vmatmul.mubr.bf16.vlgmr.msra.gmra.mrb[0].mxu0 %v213_v9 }
  0xf5   :  { %v202_v11 = vpop.f32.mrb[0].mxu0 }
  0xf6   :  { %v145_v13 = vadd.f32 %v202_v11, %v163_v10  ;;  %v136_v14 = vpop.f32.mrb[1].mxu0 }
  0xf7   :  { %v137_v16 = vadd.f32 %v163_v10, %v136_v14  ;;  %v203_v17 = vpop.f32.mrb[2].mxu0 }
  0xf8   :  { %v155_v18 = vadd.f32 %v152_v12, %v145_v13  ;;  %v139_v19 = vpop.f32.mrb[3].mxu0 }
  0xf9   :  { %v153_v21 = vadd.f32 %v150_v15, %v137_v16  ;;  %v140_v22 = vadd.f32 %v163_v10, %v139_v19 }
  0xfa   :  { %158 = vst [vmem:[%s294_s4 + $0x10] sm:$0xf] %v155_v18 }
  0xfb   :  { %156 = vst [vmem:[%s294_s4] sm:$0xff] %v153_v21  ;;  %v154_v23 = vadd.f32 %v151_v20, %v140_v22 }
  0xfd   :  { %157 = vst [vmem:[%s294_s4 + $0x8] sm:$0xff] %v154_v23 }

// kernel: _lambda_.32
= control target key start
LH: loop header
LB: loop body
LE: loop exit
PB: predicated region body
PF: predicated region fallthrough
CT: control target
= control target key end

     0   :  { %vm111_vm0 = vcmask 261120   ;;  %v4250_v0 = vmov 0.0   ;;  %vm4251_vm1 = vmmov 0   ;;  %vm1616_vm2 = vcmask 9216   ;;  %s5343_s1 = inlined_call_operand.vmem [shape: bf16[32,2,32], index: 1, kind: input, shape index: {}]   ;;  %s5344_s0 = inlined_call_operand.vmem [shape: bf16[32,2,32], index: 0, kind: input, shape index: {}]   ;;  %s5345_s2 = inlined_call_operand.vmem [shape: bf16[32,2,32], index: 2, kind: input, shape index: {}]   ;;  %s5346_s3 = inlined_call_operand.vmem [shape: bf16[32,2,32], index: 3, kind: output, shape index: {}]  }
   0x1   :  { %3736 = vmatprep.subr.bf16.mxu0 %v4250_v0  ;;  %3742 = vmatprep.subr.bf16.mxu1 %v4250_v0  ;;  %v47_v1 = vld [vmem:[%s5343_s1] sm:$0x1]  ;;  %v48_v2 = vld [vmem:[%s5343_s1 + $0x1] sm:$0x1]  ;;  %v49_v5 = vld [vmem:[%s5343_s1 + $0x2] sm:$0x1] }
   0x2   :  { %v116_v3 = vsel %vm111_vm0, %v47_v1, 0  ;;  %v162_v4 = vsel %vm111_vm0, %v48_v2, 0  ;;  %3738 = vmatprep.mubr.msk.bf16.mxu0 %vm4251_vm1, %v4250_v0  ;;  %3744 = vmatprep.mubr.msk.bf16.mxu1 %vm4251_vm1, %v4250_v0  ;;  %v50_v6 = vld [vmem:[%s5343_s1 + $0x3] sm:$0x1]  ;;  %v15_v7 = vld [vmem:[%s5344_s0] sm:$0x1] }
   0x3   :  { %3737 = vmatpush3.bf16.xpose.msra.mxu0 %v116_v3  ;;  %3743 = vmatpush3.bf16.xpose.msra.mxu1 %v162_v4  ;;  %v16_v8 = vld [vmem:[%s5344_s0 + $0x1] sm:$0x1]  ;;  %v208_v9 = vsel %vm111_vm0, %v49_v5, 0  ;;  %v254_v10 = vsel %vm111_vm0, %v50_v6, 0  ;;  %v51_v11 = vld [vmem:[%s5343_s1 + $0x4] sm:$0x1] }
   0x4   :  { %3748 = vmatprep.subr.bf16.mxu0 %v4250_v0  ;;  %3754 = vmatprep.subr.bf16.mxu1 %v4250_v0  ;;  %v52_v12 = vld [vmem:[%s5343_s1 + $0x5] sm:$0x1]  ;;  %v17_v13 = vld [vmem:[%s5344_s0 + $0x2] sm:$0x1]  ;;  %v18_v14 = vld [vmem:[%s5344_s0 + $0x3] sm:$0x1] }
   0x5   :  { %v300_v15 = vsel %vm111_vm0, %v51_v11, 0  ;;  %v346_v16 = vsel %vm111_vm0, %v52_v12, 0  ;;  %v53_v17 = vld [vmem:[%s5343_s1 + $0x6] sm:$0x1]  ;;  %v54_v18 = vld [vmem:[%s5343_s1 + $0x7] sm:$0x1] }
   0x6   :  { %v19_v19 = vld [vmem:[%s5344_s0 + $0x4] sm:$0x1]  ;;  %v20_v20 = vld [vmem:[%s5344_s0 + $0x5] sm:$0x1]  ;;  %v392_v21 = vsel %vm111_vm0, %v53_v17, 0  ;;  %v438_v22 = vsel %vm111_vm0, %v54_v18, 0 }
   0x7   :  { %v55_v23 = vld [vmem:[%s5343_s1 + $0x8] sm:$0x1]  ;;  %v56_v24 = vld [vmem:[%s5343_s1 + $0x9] sm:$0x1]  ;;  %v21_v25 = vld [vmem:[%s5344_s0 + $0x6] sm:$0x1] }
   0x8   :  { %v22_v26 = vld [vmem:[%s5344_s0 + $0x7] sm:$0x1]  ;;  %v484_v27 = vsel %vm111_vm0, %v55_v23, 0  ;;  %v530_v28 = vsel %vm111_vm0, %v56_v24, 0  ;;  %v57_v29 = vld [vmem:[%s5343_s1 + $0xa] sm:$0x1] }
   0x9   :  { %v58_v30 = vld [vmem:[%s5343_s1 + $0xb] sm:$0x1]  ;;  %v23_v31 = vld [vmem:[%s5344_s0 + $0x8] sm:$0x1]  ;;  %v24_v32 = vld [vmem:[%s5344_s0 + $0x9] sm:$0x1] }
   0xa   :  { %3739 = vmatmul.mubr.msk.bf16.vlgmr.msra.gmra.mrb[0].mxu0 %vm111_vm0, %v15_v7  ;;  %3745 = vmatmul.mubr.msk.bf16.vlgmr.msra.gmra.mrb[0].mxu1 %vm111_vm0, %v16_v8  ;;  %v576_v33 = vsel %vm111_vm0, %v57_v29, 0  ;;  %v622_v34 = vsel %vm111_vm0, %v58_v30, 0  ;;  %v59_v35 = vld [vmem:[%s5343_s1 + $0xc] sm:$0x1]  ;;  %v60_v36 = vld [vmem:[%s5343_s1 + $0xd] sm:$0x1] }
   0xb   :  { %3749 = vmatpush3.bf16.xpose.msra.mxu0 %v208_v9  ;;  %3755 = vmatpush3.bf16.xpose.msra.mxu1 %v254_v10  ;;  %v25_v37 = vld [vmem:[%s5344_s0 + $0xa] sm:$0x1]  ;;  %v26_v38 = vld [vmem:[%s5344_s0 + $0xb] sm:$0x1]  ;;  %v668_v39 = vsel %vm111_vm0, %v59_v35, 0  ;;  %v714_v40 = vsel %vm111_vm0, %v60_v36, 0 }
   0xc   :  { %3750 = vmatprep.mubr.msk.bf16.mxu0 %vm4251_vm1, %v4250_v0  ;;  %3756 = vmatprep.mubr.msk.bf16.mxu1 %vm4251_vm1, %v4250_v0  ;;  %v61_v41 = vld [vmem:[%s5343_s1 + $0xe] sm:$0x1]  ;;  %v62_v42 = vld [vmem:[%s5343_s1 + $0xf] sm:$0x1]  ;;  %v27_v43 = vld [vmem:[%s5344_s0 + $0xc] sm:$0x1] }
   0xd   :  { %3760 = vmatprep.subr.bf16.mxu0 %v4250_v0  ;;  %3766 = vmatprep.subr.bf16.mxu1 %v4250_v0  ;;  %v28_v44 = vld [vmem:[%s5344_s0 + $0xd] sm:$0x1]  ;;  %v760_v45 = vsel %vm111_vm0, %v61_v41, 0  ;;  %v806_v46 = vsel %vm111_vm0, %v62_v42, 0  ;;  %v63_v47 = vld [vmem:[%s5343_s1 + $0x10] sm:$0x1] }
   0xe   :  { %v64_v48 = vld [vmem:[%s5343_s1 + $0x11] sm:$0x1]  ;;  %v29_v49 = vld [vmem:[%s5344_s0 + $0xe] sm:$0x1]  ;;  %v30_v50 = vld [vmem:[%s5344_s0 + $0xf] sm:$0x1] }
   0xf   :  { %v852_v51 = vsel %vm111_vm0, %v63_v47, 0  ;;  %v898_v52 = vsel %vm111_vm0, %v64_v48, 0  ;;  %v65_v53 = vld [vmem:[%s5343_s1 + $0x12] sm:$0x1]  ;;  %v66_v54 = vld [vmem:[%s5343_s1 + $0x13] sm:$0x1] }
  0x10   :  { %v31_v55 = vld [vmem:[%s5344_s0 + $0x10] sm:$0x1]  ;;  %v32_v56 = vld [vmem:[%s5344_s0 + $0x11] sm:$0x1]  ;;  %v944_v57 = vsel %vm111_vm0, %v65_v53, 0  ;;  %v990_v58 = vsel %vm111_vm0, %v66_v54, 0 }
  0x11   :  { %v67_v59 = vld [vmem:[%s5343_s1 + $0x14] sm:$0x1]  ;;  %v68_v60 = vld [vmem:[%s5343_s1 + $0x15] sm:$0x1]  ;;  %v33_v61 = vld [vmem:[%s5344_s0 + $0x12] sm:$0x1] }
  0x12   :  { %3751 = vmatmul.mubr.msk.bf16.vlgmr.msra.gmra.mrb[4].mxu0 %vm111_vm0, %v17_v13  ;;  %3757 = vmatmul.mubr.msk.bf16.vlgmr.msra.gmra.mrb[4].mxu1 %vm111_vm0, %v18_v14  ;;  %v34_v62 = vld [vmem:[%s5344_s0 + $0x13] sm:$0x1]  ;;  %v1036_v63 = vsel %vm111_vm0, %v67_v59, 0  ;;  %v1082_v1 = vsel %vm111_vm0, %v68_v60, 0  ;;  %v69_v2 = vld [vmem:[%s5343_s1 + $0x16] sm:$0x1] }
  0x13   :  { %3761 = vmatpush3.bf16.xpose.msra.mxu0 %v300_v15  ;;  %3767 = vmatpush3.bf16.xpose.msra.mxu1 %v346_v16  ;;  %v70_v3 = vld [vmem:[%s5343_s1 + $0x17] sm:$0x1]  ;;  %v35_v4 = vld [vmem:[%s5344_s0 + $0x14] sm:$0x1]  ;;  %v36_v5 = vld [vmem:[%s5344_s0 + $0x15] sm:$0x1] }
  0x14   :  { %3762 = vmatprep.mubr.msk.bf16.mxu0 %vm4251_vm1, %v4250_v0  ;;  %3768 = vmatprep.mubr.msk.bf16.mxu1 %vm4251_vm1, %v4250_v0  ;;  %v1128_v6 = vsel %vm111_vm0, %v69_v2, 0  ;;  %v1174_v7 = vsel %vm111_vm0, %v70_v3, 0  ;;  %v71_v8 = vld [vmem:[%s5343_s1 + $0x18] sm:$0x1]  ;;  %v72_v9 = vld [vmem:[%s5343_s1 + $0x19] sm:$0x1] }
  0x15   :  { %3772 = vmatprep.subr.bf16.mxu0 %v4250_v0  ;;  %3778 = vmatprep.subr.bf16.mxu1 %v4250_v0  ;;  %v37_v10 = vld [vmem:[%s5344_s0 + $0x16] sm:$0x1]  ;;  %v38_v11 = vld [vmem:[%s5344_s0 + $0x17] sm:$0x1]  ;;  %v1220_v12 = vsel %vm111_vm0, %v71_v8, 0  ;;  %v1266_v13 = vsel %vm111_vm0, %v72_v9, 0 }
  0x16   :  { %v73_v14 = vld [vmem:[%s5343_s1 + $0x1a] sm:$0x1]  ;;  %v74_v15 = vld [vmem:[%s5343_s1 + $0x1b] sm:$0x1]  ;;  %v39_v16 = vld [vmem:[%s5344_s0 + $0x18] sm:$0x1] }
  0x17   :  { %v40_v17 = vld [vmem:[%s5344_s0 + $0x19] sm:$0x1]  ;;  %v1312_v18 = vsel %vm111_vm0, %v73_v14, 0  ;;  %v42_v23 = vld [vmem:[%s5344_s0 + $0x1b] sm:$0x1]  ;;  %vm2005_vm3 = vcmask 1040384  }
  0x18   :  { %v44_v29 = vld [vmem:[%s5344_s0 + $0x1d] sm:$0x1]  ;;  %vm2001_vm4 = vcmask 15360   ;;  %vm3507_vm5 = vcmask 253952  }
  0x1a   :  { %3763 = vmatmul.mubr.msk.bf16.vlgmr.msra.gmra.mrb[8].mxu0 %vm111_vm0, %v19_v19  ;;  %3769 = vmatmul.mubr.msk.bf16.vlgmr.msra.gmra.mrb[8].mxu1 %vm111_vm0, %v20_v20  ;;  %v1358_v19 = vsel %vm111_vm0, %v74_v15, 0  ;;  %v75_v20 = vld [vmem:[%s5343_s1 + $0x1c] sm:$0x1] }
  0x1b   :  { %3773 = vmatpush3.bf16.xpose.msra.mxu0 %v392_v21  ;;  %3779 = vmatpush3.bf16.xpose.msra.mxu1 %v438_v22  ;;  %v76_v21 = vld [vmem:[%s5343_s1 + $0x1d] sm:$0x1]  ;;  %v41_v22 = vld [vmem:[%s5344_s0 + $0x1a] sm:$0x1]  ;;  %v1404_v24 = vsel %vm111_vm0, %v75_v20, 0 }
  0x1c   :  { %3774 = vmatprep.mubr.msk.bf16.mxu0 %vm4251_vm1, %v4250_v0  ;;  %3780 = vmatprep.mubr.msk.bf16.mxu1 %vm4251_vm1, %v4250_v0 }
  0x1d   :  { %3784 = vmatprep.subr.bf16.mxu0 %v4250_v0  ;;  %3790 = vmatprep.subr.bf16.mxu1 %v4250_v0 }
  0x22   :  { %3775 = vmatmul.mubr.msk.bf16.vlgmr.msra.gmra.mrb[12].mxu0 %vm111_vm0, %v21_v25  ;;  %3781 = vmatmul.mubr.msk.bf16.vlgmr.msra.gmra.mrb[12].mxu1 %vm111_vm0, %v22_v26  ;;  %v1450_v25 = vsel %vm111_vm0, %v76_v21, 0  ;;  %v77_v26 = vld [vmem:[%s5343_s1 + $0x1e] sm:$0x1] }
  0x23   :  { %3785 = vmatpush3.bf16.xpose.msra.mxu0 %v484_v27  ;;  %3791 = vmatpush3.bf16.xpose.msra.mxu1 %v530_v28  ;;  %v78_v27 = vld [vmem:[%s5343_s1 + $0x1f] sm:$0x1]  ;;  %v43_v28 = vld [vmem:[%s5344_s0 + $0x1c] sm:$0x1]  ;;  %v1496_v30 = vsel %vm111_vm0, %v77_v26, 0 }
  0x24   :  { %3786 = vmatprep.mubr.msk.bf16.mxu0 %vm4251_vm1, %v4250_v0  ;;  %3792 = vmatprep.mubr.msk.bf16.mxu1 %vm4251_vm1, %v4250_v0 }
  0x25   :  { %3796 = vmatprep.subr.bf16.mxu0 %v4250_v0  ;;  %3802 = vmatprep.subr.bf16.mxu1 %v4250_v0 }
  0x2a   :  { %3787 = vmatmul.mubr.msk.bf16.vlgmr.msra.gmra.mrb[16].mxu0 %vm111_vm0, %v23_v31  ;;  %3793 = vmatmul.mubr.msk.bf16.vlgmr.msra.gmra.mrb[16].mxu1 %vm111_vm0, %v24_v32  ;;  %v1542_v31 = vsel %vm111_vm0, %v78_v27, 0  ;;  %v45_v32 = vld [vmem:[%s5344_s0 + $0x1e] sm:$0x1] }
  0x2b   :  { %3797 = vmatpush3.bf16.xpose.msra.mxu0 %v576_v33  ;;  %3803 = vmatpush3.bf16.xpose.msra.mxu1 %v622_v34  ;;  %v46_v33 = vld [vmem:[%s5344_s0 + $0x1f] sm:$0x1] }
  0x2c   :  { %3798 = vmatprep.mubr.msk.bf16.mxu0 %vm4251_vm1, %v4250_v0  ;;  %3804 = vmatprep.mubr.msk.bf16.mxu1 %vm4251_vm1, %v4250_v0 }
  0x2d   :  { %3808 = vmatprep.subr.bf16.mxu0 %v4250_v0  ;;  %3814 = vmatprep.subr.bf16.mxu1 %v4250_v0 }
  0x32   :  { %3799 = vmatmul.mubr.msk.bf16.vlgmr.msra.gmra.mrb[20].mxu0 %vm111_vm0, %v25_v37  ;;  %3805 = vmatmul.mubr.msk.bf16.vlgmr.msra.gmra.mrb[20].mxu1 %vm111_vm0, %v26_v38 }
  0x33   :  { %3809 = vmatpush3.bf16.xpose.msra.mxu0 %v668_v39  ;;  %3815 = vmatpush3.bf16.xpose.msra.mxu1 %v714_v40 }
  0x34   :  { %3810 = vmatprep.mubr.msk.bf16.mxu0 %vm4251_vm1, %v4250_v0  ;;  %3816 = vmatprep.mubr.msk.bf16.mxu1 %vm4251_vm1, %v4250_v0 }
  0x35   :  { %3820 = vmatprep.subr.bf16.mxu0 %v4250_v0  ;;  %3826 = vmatprep.subr.bf16.mxu1 %v4250_v0 }
  0x3a   :  { %3811 = vmatmul.mubr.msk.bf16.vlgmr.msra.gmra.mrb[24].mxu0 %vm111_vm0, %v27_v43  ;;  %3817 = vmatmul.mubr.msk.bf16.vlgmr.msra.gmra.mrb[24].mxu1 %vm111_vm0, %v28_v44 }
  0x3b   :  { %3821 = vmatpush3.bf16.xpose.msra.mxu0 %v760_v45  ;;  %3827 = vmatpush3.bf16.xpose.msra.mxu1 %v806_v46 }
  0x3c   :  { %3822 = vmatprep.mubr.msk.bf16.mxu0 %vm4251_vm1, %v4250_v0  ;;  %3828 = vmatprep.mubr.msk.bf16.mxu1 %vm4251_vm1, %v4250_v0 }
  0x3d   :  { %3832 = vmatprep.subr.bf16.mxu0 %v4250_v0  ;;  %3838 = vmatprep.subr.bf16.mxu1 %v4250_v0 }
  0x42   :  { %3823 = vmatmul.mubr.msk.bf16.vlgmr.msra.gmra.mrb[28].mxu0 %vm111_vm0, %v29_v49  ;;  %3829 = vmatmul.mubr.msk.bf16.vlgmr.msra.gmra.mrb[28].mxu1 %vm111_vm0, %v30_v50 }
  0x43   :  { %3833 = vmatpush3.bf16.xpose.msra.mxu0 %v852_v51  ;;  %3839 = vmatpush3.bf16.xpose.msra.mxu1 %v898_v52 }
  0x44   :  { %3834 = vmatprep.mubr.msk.bf16.mxu0 %vm4251_vm1, %v4250_v0  ;;  %3840 = vmatprep.mubr.msk.bf16.mxu1 %vm4251_vm1, %v4250_v0 }
  0x45   :  { %3844 = vmatprep.subr.bf16.mxu0 %v4250_v0  ;;  %3850 = vmatprep.subr.bf16.mxu1 %v4250_v0 }
  0x4a   :  { %3835 = vmatmul.mubr.msk.bf16.vlgmr.msra.gmra.mrb[32].mxu0 %vm111_vm0, %v31_v55  ;;  %3841 = vmatmul.mubr.msk.bf16.vlgmr.msra.gmra.mrb[32].mxu1 %vm111_vm0, %v32_v56 }
  0x4b   :  { %3845 = vmatpush3.bf16.xpose.msra.mxu0 %v944_v57  ;;  %3851 = vmatpush3.bf16.xpose.msra.mxu1 %v990_v58 }
  0x4c   :  { %3846 = vmatprep.mubr.msk.bf16.mxu0 %vm4251_vm1, %v4250_v0  ;;  %3852 = vmatprep.mubr.msk.bf16.mxu1 %vm4251_vm1, %v4250_v0 }
  0x4d   :  { %3856 = vmatprep.subr.bf16.mxu0 %v4250_v0  ;;  %3862 = vmatprep.subr.bf16.mxu1 %v4250_v0 }
  0x52   :  { %3847 = vmatmul.mubr.msk.bf16.vlgmr.msra.gmra.mrb[36].mxu0 %vm111_vm0, %v33_v61  ;;  %3853 = vmatmul.mubr.msk.bf16.vlgmr.msra.gmra.mrb[36].mxu1 %vm111_vm0, %v34_v62 }
  0x53   :  { %3857 = vmatpush3.bf16.xpose.msra.mxu0 %v1036_v63  ;;  %3863 = vmatpush3.bf16.xpose.msra.mxu1 %v1082_v1 }
  0x54   :  { %3858 = vmatprep.mubr.msk.bf16.mxu0 %vm4251_vm1, %v4250_v0  ;;  %3864 = vmatprep.mubr.msk.bf16.mxu1 %vm4251_vm1, %v4250_v0 }
  0x55   :  { %3868 = vmatprep.subr.bf16.mxu0 %v4250_v0  ;;  %3874 = vmatprep.subr.bf16.mxu1 %v4250_v0 }
  0x5a   :  { %3859 = vmatmul.mubr.msk.bf16.vlgmr.msra.gmra.mrb[40].mxu0 %vm111_vm0, %v35_v4  ;;  %3865 = vmatmul.mubr.msk.bf16.vlgmr.msra.gmra.mrb[40].mxu1 %vm111_vm0, %v36_v5 }
  0x5b   :  { %3869 = vmatpush3.bf16.xpose.msra.mxu0 %v1128_v6  ;;  %3875 = vmatpush3.bf16.xpose.msra.mxu1 %v1174_v7 }
  0x5c   :  { %3870 = vmatprep.mubr.msk.bf16.mxu0 %vm4251_vm1, %v4250_v0  ;;  %3876 = vmatprep.mubr.msk.bf16.mxu1 %vm4251_vm1, %v4250_v0 }
  0x5d   :  { %3880 = vmatprep.subr.bf16.mxu0 %v4250_v0  ;;  %3886 = vmatprep.subr.bf16.mxu1 %v4250_v0 }
  0x62   :  { %3871 = vmatmul.mubr.msk.bf16.vlgmr.msra.gmra.mrb[44].mxu0 %vm111_vm0, %v37_v10  ;;  %3877 = vmatmul.mubr.msk.bf16.vlgmr.msra.gmra.mrb[44].mxu1 %vm111_vm0, %v38_v11 }
  0x63   :  { %3881 = vmatpush3.bf16.xpose.msra.mxu0 %v1220_v12  ;;  %3887 = vmatpush3.bf16.xpose.msra.mxu1 %v1266_v13 }
  0x64   :  { %3882 = vmatprep.mubr.msk.bf16.mxu0 %vm4251_vm1, %v4250_v0  ;;  %3892 = vmatprep.subr.bf16.mxu0 %v4250_v0 }
  0x65   :  { %3888 = vmatprep.mubr.msk.bf16.mxu1 %vm4251_vm1, %v4250_v0  ;;  %3898 = vmatprep.subr.bf16.mxu1 %v4250_v0 }
  0x6a   :  { %3883 = vmatmul.mubr.msk.bf16.vlgmr.msra.gmra.mrb[48].mxu0 %vm111_vm0, %v39_v16  ;;  %3889 = vmatmul.mubr.msk.bf16.vlgmr.msra.gmra.mrb[48].mxu1 %vm111_vm0, %v40_v17 }
  0x6b   :  { %3893 = vmatpush3.bf16.xpose.msra.mxu0 %v1312_v18  ;;  %3899 = vmatpush3.bf16.xpose.msra.mxu1 %v1358_v19 }
  0x6c   :  { %3894 = vmatprep.mubr.msk.bf16.mxu0 %vm4251_vm1, %v4250_v0  ;;  %3904 = vmatprep.subr.bf16.mxu0 %v4250_v0 }
  0x6d   :  { %3900 = vmatprep.mubr.msk.bf16.mxu1 %vm4251_vm1, %v4250_v0  ;;  %3910 = vmatprep.subr.bf16.mxu1 %v4250_v0 }
  0x72   :  { %3895 = vmatmul.mubr.msk.bf16.vlgmr.msra.gmra.mrb[52].mxu0 %vm111_vm0, %v41_v22  ;;  %3901 = vmatmul.mubr.msk.bf16.vlgmr.msra.gmra.mrb[52].mxu1 %vm111_vm0, %v42_v23 }
  0x73   :  { %3905 = vmatpush3.bf16.xpose.msra.mxu0 %v1404_v24  ;;  %3911 = vmatpush3.bf16.xpose.msra.mxu1 %v1450_v25 }
  0x74   :  { %3906 = vmatprep.mubr.msk.bf16.mxu0 %vm4251_vm1, %v4250_v0  ;;  %3916 = vmatprep.subr.bf16.mxu0 %v4250_v0 }
  0x75   :  { %3912 = vmatprep.mubr.msk.bf16.mxu1 %vm4251_vm1, %v4250_v0  ;;  %3922 = vmatprep.subr.bf16.mxu1 %v4250_v0 }
  0x7a   :  { %3907 = vmatmul.mubr.msk.bf16.vlgmr.msra.gmra.mrb[56].mxu0 %vm111_vm0, %v43_v28  ;;  %3913 = vmatmul.mubr.msk.bf16.vlgmr.msra.gmra.mrb[56].mxu1 %vm111_vm0, %v44_v29 }
  0x7b   :  { %3917 = vmatpush3.bf16.xpose.msra.mxu0 %v1496_v30  ;;  %3923 = vmatpush3.bf16.xpose.msra.mxu1 %v1542_v31 }
  0x7c   :  { %3918 = vmatprep.mubr.msk.bf16.mxu0 %vm4251_vm1, %v4250_v0  ;;  %3924 = vmatprep.mubr.msk.bf16.mxu1 %vm4251_vm1, %v4250_v0 }
  0x7d   :  { %3928 = vmatprep.subr.bf16.mxu0 %v4250_v0  ;;  %3934 = vmatprep.subr.bf16.mxu1 %v4250_v0 }
  0x82   :  { %3919 = vmatmul.mubr.msk.bf16.vlgmr.msra.gmra.mrb[60].mxu0 %vm111_vm0, %v45_v32  ;;  %3925 = vmatmul.mubr.msk.bf16.vlgmr.msra.gmra.mrb[60].mxu1 %vm111_vm0, %v46_v33 }
  0x83   :  { %3930 = vmatprep.mubr.msk.bf16.mxu0 %vm4251_vm1, %v4250_v0  ;;  %3936 = vmatprep.mubr.msk.bf16.mxu1 %vm4251_vm1, %v4250_v0 }
  0xdd   :  { %v152_v34 = vpop.f32.mrb[0].mxu0  ;;  %v198_v35 = vpop.f32.mrb[0].mxu1 }
  0xde   :  { %v4630_v36 = vmul.f32 0.17677669, %v152_v34  ;;  %v3740_v37 = vpop.f32.mrb[1].mxu0  ;;  %v4632_v38 = vmul.f32 0.17677669, %v198_v35  ;;  %v3746_v39 = vpop.f32.mrb[1].mxu1 }
  0xdf   :  { %v155_v40 = vpop.f32.mrb[2].mxu0  ;;  %v201_v41 = vpop.f32.mrb[2].mxu1 }
  0xe0   :  { %v3741_v42 = vpop.f32.mrb[3].mxu0  ;;  %v1617_v43 = vsel %vm1616_vm2, %v4630_v36, -inf  ;;  %v3747_v44 = vpop.f32.mrb[3].mxu1  ;;  %v1620_v45 = vsel %vm1616_vm2, %v4632_v38, -inf }
  0xe1   :  { %1618 = vmax.xlane.f32.xlu0 %v1617_v43 }
  0xe5   :  { %1621 = vmax.xlane.f32.xlu0 %v1620_v45  ;;  %v244_v46 = vpop.f32.mrb[4].mxu0  ;;  %v290_v47 = vpop.f32.mrb[4].mxu1 }
  0xe6   :  { %v4638_v48 = vmul.f32 0.17677669, %v244_v46  ;;  %v3752_v49 = vpop.f32.mrb[5].mxu0  ;;  %v4640_v50 = vmul.f32 0.17677669, %v290_v47  ;;  %v3758_v51 = vpop.f32.mrb[5].mxu1 }
  0xe7   :  { %v247_v52 = vpop.f32.mrb[6].mxu0  ;;  %v293_v53 = vpop.f32.mrb[6].mxu1 }
  0xe8   :  { %v3753_v54 = vpop.f32.mrb[7].mxu0  ;;  %v1623_v55 = vsel %vm1616_vm2, %v4638_v48, -inf  ;;  %v3759_v56 = vpop.f32.mrb[7].mxu1  ;;  %v1626_v57 = vsel %vm1616_vm2, %v4640_v50, -inf }
  0xe9   :  { %1624 = vmax.xlane.f32.xlu1 %v1623_v55 }
  0xed   :  { %v382_v58 = vpop.f32.mrb[8].mxu1  ;;  %1627 = vmax.xlane.f32.xlu1 %v1626_v57  ;;  %v336_v59 = vpop.f32.mrb[8].mxu0 }
  0xee   :  { %v4646_v60 = vmul.f32 0.17677669, %v382_v58  ;;  %v4648_v61 = vmul.f32 0.17677669, %v336_v59  ;;  %v3764_v62 = vpop.f32.mrb[9].mxu0  ;;  %v3770_v63 = vpop.f32.mrb[9].mxu1 }
  0xef   :  { %v385_v1 = vpop.f32.mrb[10].mxu1  ;;  %v339_v2 = vpop.f32.mrb[10].mxu0 }
  0xf0   :  { %v1632_v3 = vsel %vm1616_vm2, %v4646_v60, -inf  ;;  %v1629_v4 = vsel %vm1616_vm2, %v4648_v61, -inf  ;;  %v3765_v5 = vpop.f32.mrb[11].mxu0  ;;  %v3771_v6 = vpop.f32.mrb[11].mxu1 }
  0xf1   :  { %1633 = vmax.xlane.f32.xlu1 %v1632_v3  ;;  %1630 = vmax.xlane.f32.xlu0 %v1629_v4 }
  0xf5   :  { %v428_v7 = vpop.f32.mrb[12].mxu0  ;;  %v474_v8 = vpop.f32.mrb[12].mxu1 }
  0xf6   :  { %v4654_v9 = vmul.f32 0.17677669, %v428_v7  ;;  %v4656_v10 = vmul.f32 0.17677669, %v474_v8  ;;  %v3776_v11 = vpop.f32.mrb[13].mxu0  ;;  %v3782_v12 = vpop.f32.mrb[13].mxu1 }
  0xf7   :  { %v477_v13 = vpop.f32.mrb[14].mxu1  ;;  %v431_v14 = vpop.f32.mrb[14].mxu0 }
  0xf8   :  { %v1638_v15 = vsel %vm1616_vm2, %v4656_v10, -inf  ;;  %v1635_v16 = vsel %vm1616_vm2, %v4654_v9, -inf  ;;  %v3777_v17 = vpop.f32.mrb[15].mxu0  ;;  %v3783_v18 = vpop.f32.mrb[15].mxu1 }
  0xf9   :  { %1639 = vmax.xlane.f32.xlu1 %v1638_v15  ;;  %1636 = vmax.xlane.f32.xlu0 %v1635_v16 }
  0xfd   :  { %v520_v19 = vpop.f32.mrb[16].mxu0  ;;  %v566_v20 = vpop.f32.mrb[16].mxu1 }
  0xfe   :  { %v4662_v21 = vmul.f32 0.17677669, %v520_v19  ;;  %v4664_v22 = vmul.f32 0.17677669, %v566_v20  ;;  %v3788_v23 = vpop.f32.mrb[17].mxu0  ;;  %v3794_v24 = vpop.f32.mrb[17].mxu1 }
  0xff   :  { %v523_v25 = vpop.f32.mrb[18].mxu0  ;;  %v569_v26 = vpop.f32.mrb[18].mxu1 }
 0x100   :  { %v1644_v27 = vsel %vm1616_vm2, %v4664_v22, -inf  ;;  %v1641_v28 = vsel %vm1616_vm2, %v4662_v21, -inf  ;;  %v3789_v29 = vpop.f32.mrb[19].mxu0  ;;  %v3795_v30 = vpop.f32.mrb[19].mxu1 }
 0x101   :  { %1645 = vmax.xlane.f32.xlu1 %v1644_v27  ;;  %1642 = vmax.xlane.f32.xlu0 %v1641_v28 }
 0x105   :  { %v612_v31 = vpop.f32.mrb[20].mxu0  ;;  %v658_v32 = vpop.f32.mrb[20].mxu1 }
 0x106   :  { %v4670_v33 = vmul.f32 0.17677669, %v612_v31  ;;  %v4672_v34 = vmul.f32 0.17677669, %v658_v32  ;;  %v3800_v35 = vpop.f32.mrb[21].mxu0  ;;  %v3806_v37 = vpop.f32.mrb[21].mxu1 }
 0x107   :  { %v615_v39 = vpop.f32.mrb[22].mxu0  ;;  %v661_v40 = vpop.f32.mrb[22].mxu1 }
 0x108   :  { %v1650_v41 = vsel %vm1616_vm2, %v4672_v34, -inf  ;;  %v1647_v42 = vsel %vm1616_vm2, %v4670_v33, -inf  ;;  %v3801_v43 = vpop.f32.mrb[23].mxu0  ;;  %v3807_v44 = vpop.f32.mrb[23].mxu1 }
 0x109   :  { %1651 = vmax.xlane.f32.xlu1 %v1650_v41  ;;  %1648 = vmax.xlane.f32.xlu0 %v1647_v42 }
 0x10d   :  { %v704_v45 = vpop.f32.mrb[24].mxu0  ;;  %v750_v46 = vpop.f32.mrb[24].mxu1 }
 0x10e   :  { %v4678_v47 = vmul.f32 0.17677669, %v704_v45  ;;  %v4680_v49 = vmul.f32 0.17677669, %v750_v46  ;;  %v3812_v51 = vpop.f32.mrb[25].mxu0  ;;  %v3818_v52 = vpop.f32.mrb[25].mxu1 }
 0x10f   :  { %v707_v53 = vpop.f32.mrb[26].mxu0  ;;  %v753_v54 = vpop.f32.mrb[26].mxu1 }
 0x110   :  { %v1656_v55 = vsel %vm1616_vm2, %v4680_v49, -inf  ;;  %v1653_v56 = vsel %vm1616_vm2, %v4678_v47, -inf  ;;  %v3813_v57 = vpop.f32.mrb[27].mxu0  ;;  %v3819_v58 = vpop.f32.mrb[27].mxu1 }
 0x111   :  { %1657 = vmax.xlane.f32.xlu1 %v1656_v55  ;;  %1654 = vmax.xlane.f32.xlu0 %v1653_v56 }
 0x115   :  { %v796_v59 = vpop.f32.mrb[28].mxu0  ;;  %v842_v62 = vpop.f32.mrb[28].mxu1 }
 0x116   :  { %v4686_v63 = vmul.f32 0.17677669, %v796_v59  ;;  %v4688_v1 = vmul.f32 0.17677669, %v842_v62  ;;  %v3824_v2 = vpop.f32.mrb[29].mxu0  ;;  %v3830_v3 = vpop.f32.mrb[29].mxu1 }
 0x117   :  { %v799_v4 = vpop.f32.mrb[30].mxu0  ;;  %v845_v5 = vpop.f32.mrb[30].mxu1 }
 0x118   :  { %v1662_v6 = vsel %vm1616_vm2, %v4688_v1, -inf  ;;  %v1659_v7 = vsel %vm1616_vm2, %v4686_v63, -inf  ;;  %v3825_v8 = vpop.f32.mrb[31].mxu0  ;;  %v3831_v11 = vpop.f32.mrb[31].mxu1 }
 0x119   :  { %1663 = vmax.xlane.f32.xlu1 %v1662_v6  ;;  %1660 = vmax.xlane.f32.xlu0 %v1659_v7 }
 0x11d   :  { %v888_v12 = vpop.f32.mrb[32].mxu0  ;;  %v934_v13 = vpop.f32.mrb[32].mxu1 }
 0x11e   :  { %v4694_v14 = vmul.f32 0.17677669, %v888_v12  ;;  %v4696_v15 = vmul.f32 0.17677669, %v934_v13  ;;  %v3836_v16 = vpop.f32.mrb[33].mxu0  ;;  %v3842_v17 = vpop.f32.mrb[33].mxu1 }
 0x11f   :  { %v891_v18 = vpop.f32.mrb[34].mxu0  ;;  %v937_v19 = vpop.f32.mrb[34].mxu1 }
 0x120   :  { %v1668_v20 = vsel %vm1616_vm2, %v4696_v15, -inf  ;;  %v1665_v23 = vsel %vm1616_vm2, %v4694_v14, -inf  ;;  %v3837_v24 = vpop.f32.mrb[35].mxu0  ;;  %v3843_v25 = vpop.f32.mrb[35].mxu1 }
 0x121   :  { %1669 = vmax.xlane.f32.xlu1 %v1668_v20  ;;  %1666 = vmax.xlane.f32.xlu0 %v1665_v23 }
 0x125   :  { %v980_v26 = vpop.f32.mrb[36].mxu0  ;;  %v1026_v27 = vpop.f32.mrb[36].mxu1 }
 0x126   :  { %v4702_v28 = vmul.f32 0.17677669, %v980_v26  ;;  %v4704_v29 = vmul.f32 0.17677669, %v1026_v27  ;;  %v3848_v30 = vpop.f32.mrb[37].mxu0  ;;  %v3854_v31 = vpop.f32.mrb[37].mxu1 }
 0x127   :  { %v983_v32 = vpop.f32.mrb[38].mxu0  ;;  %v1029_v35 = vpop.f32.mrb[38].mxu1 }
 0x128   :  { %v1674_v37 = vsel %vm1616_vm2, %v4704_v29, -inf  ;;  %v1671_v39 = vsel %vm1616_vm2, %v4702_v28, -inf  ;;  %v3849_v40 = vpop.f32.mrb[39].mxu0  ;;  %v3855_v41 = vpop.f32.mrb[39].mxu1 }
 0x129   :  { %1675 = vmax.xlane.f32.xlu1 %v1674_v37  ;;  %1672 = vmax.xlane.f32.xlu0 %v1671_v39 }
 0x12d   :  { %v1072_v42 = vpop.f32.mrb[40].mxu0  ;;  %v1118_v43 = vpop.f32.mrb[40].mxu1 }
 0x12e   :  { %v4710_v44 = vmul.f32 0.17677669, %v1072_v42  ;;  %v4712_v45 = vmul.f32 0.17677669, %v1118_v43  ;;  %v3860_v46 = vpop.f32.mrb[41].mxu0  ;;  %v3866_v51 = vpop.f32.mrb[41].mxu1 }
 0x12f   :  { %v1075_v52 = vpop.f32.mrb[42].mxu0  ;;  %v1121_v53 = vpop.f32.mrb[42].mxu1 }
 0x130   :  { %v1680_v54 = vsel %vm1616_vm2, %v4712_v45, -inf  ;;  %v1677_v55 = vsel %vm1616_vm2, %v4710_v44, -inf  ;;  %v3861_v56 = vpop.f32.mrb[43].mxu0  ;;  %v3867_v57 = vpop.f32.mrb[43].mxu1 }
 0x131   :  { %1681 = vmax.xlane.f32.xlu1 %v1680_v54  ;;  %1678 = vmax.xlane.f32.xlu0 %v1677_v55 }
 0x135   :  { %v1164_v58 = vpop.f32.mrb[44].mxu0  ;;  %v1210_v59 = vpop.f32.mrb[44].mxu1 }
 0x136   :  { %v4718_v62 = vmul.f32 0.17677669, %v1164_v58  ;;  %v4720_v2 = vmul.f32 0.17677669, %v1210_v59  ;;  %v3878_v3 = vpop.f32.mrb[45].mxu1  ;;  %v3872_v4 = vpop.f32.mrb[45].mxu0 }
 0x137   :  { %v1167_v5 = vpop.f32.mrb[46].mxu0  ;;  %v1213_v6 = vpop.f32.mrb[46].mxu1 }
 0x138   :  { %v1686_v7 = vsel %vm1616_vm2, %v4720_v2, -inf  ;;  %v1683_v8 = vsel %vm1616_vm2, %v4718_v62, -inf  ;;  %v3873_v11 = vpop.f32.mrb[47].mxu0  ;;  %v3879_v12 = vpop.f32.mrb[47].mxu1 }
 0x139   :  { %1687 = vmax.xlane.f32.xlu1 %v1686_v7  ;;  %1684 = vmax.xlane.f32.xlu0 %v1683_v8 }
 0x13d   :  { %v1256_v13 = vpop.f32.mrb[48].mxu0  ;;  %v1302_v16 = vpop.f32.mrb[48].mxu1 }
 0x13e   :  { %v3884_v17 = vpop.f32.mrb[49].mxu0  ;;  %v3890_v18 = vpop.f32.mrb[49].mxu1 }
 0x13f   :  { %v1305_v19 = vpop.f32.mrb[50].mxu1  ;;  %v1259_v20 = vpop.f32.mrb[50].mxu0 }
 0x140   :  { %v3885_v23 = vpop.f32.mrb[51].mxu0  ;;  %v3891_v24 = vpop.f32.mrb[51].mxu1 }
 0x141   :  { %v4740_v23 = vmul.f32 0.17677669, %v1256_v13 }
 0x145   :  { %v1348_v25 = vpop.f32.mrb[52].mxu0  ;;  %v4726_v26 = vpop.f32.mrb[52].mxu1 }
 0x146   :  { %v3896_v27 = vpop.f32.mrb[53].mxu0  ;;  %v3902_v30 = vpop.f32.mrb[53].mxu1 }
 0x147   :  { %v1397_v31 = vpop.f32.mrb[54].mxu1  ;;  %v1351_v32 = vpop.f32.mrb[54].mxu0 }
 0x148   :  { %v3897_v35 = vpop.f32.mrb[55].mxu0  ;;  %v3903_v37 = vpop.f32.mrb[55].mxu1  ;;  %v4748_v32 = vmul.f32 0.17677669, %v1302_v16 }
 0x14d   :  { %v4728_v39 = vpop.f32.mrb[56].mxu0  ;;  %v4730_v40 = vpop.f32.mrb[56].mxu1 }
 0x14e   :  { %v3908_v41 = vpop.f32.mrb[57].mxu0  ;;  %v3914_v42 = vpop.f32.mrb[57].mxu1 }
 0x14f   :  { %v1489_v43 = vpop.f32.mrb[58].mxu1  ;;  %v1443_v46 = vpop.f32.mrb[58].mxu0 }
 0x150   :  { %v3909_v51 = vpop.f32.mrb[59].mxu0  ;;  %v3915_v52 = vpop.f32.mrb[59].mxu1 }
 0x155   :  { %v4732_v53 = vpop.f32.mrb[60].mxu0  ;;  %v4734_v54 = vpop.f32.mrb[60].mxu1 }
 0x156   :  { %v3920_v55 = vpop.f32.mrb[61].mxu0  ;;  %v3926_v56 = vpop.f32.mrb[61].mxu1 }
 0x157   :  { %v1581_v57 = vpop.f32.mrb[62].mxu1  ;;  %v1535_v58 = vpop.f32.mrb[62].mxu0  ;;  %v4767_v55 = vmul.f32 0.17677669, %v4726_v26 }
 0x158   :  { %v3921_v59 = vpop.f32.mrb[63].mxu0  ;;  %v3927_v3 = vpop.f32.mrb[63].mxu1 }
 0x16e   :  { %v1619_v4 = vpop.xlane.xlu0 %1618 }
 0x16f   :  { %v1713_v5 = vsub.f32 %v4630_v36, %v1619_v4 }
 0x171   :  { %v1745_v6 = vmul.f32 1.442695, %v1713_v5 }
 0x172   :  { %v1622_v7 = vpop.xlane.xlu0 %1621 }
 0x173   :  { %4122 = vpow2.f32 %v1745_v6  ;;  %v1714_v8 = vsub.f32 %v4632_v38, %v1622_v7 }
 0x175   :  { %v1747_v11 = vmul.f32 1.442695, %v1714_v8 }
 0x176   :  { %v1625_v12 = vpop.xlane.xlu1 %1624 }
 0x177   :  { %4124 = vpow2.f32 %v1747_v11  ;;  %v1715_v17 = vsub.f32 %v4638_v48, %v1625_v12  ;;  %v4789_v11 = vmul.f32 0.17677669, %v4730_v40 }
 0x179   :  { %v1749_v18 = vmul.f32 1.442695, %v1715_v17 }
 0x17a   :  { %v1628_v19 = vpop.xlane.xlu1 %1627 }
 0x17b   :  { %4126 = vpow2.f32 %v1749_v18  ;;  %v1716_v20 = vsub.f32 %v4640_v50, %v1628_v19  ;;  %v1689_v50 = vsel %vm1616_vm2, %v4740_v23, -inf }
 0x17d   :  { %v4742_v24 = vpop.eup %4122  ;;  %v1751_v36 = vmul.f32 1.442695, %v1716_v20 }
 0x17e   :  { %v1634_v27 = vpop.xlane.xlu1 %1633  ;;  %v1631_v30 = vpop.xlane.xlu0 %1630  ;;  %v1809_v38 = vsel %vm1616_vm2, %v4742_v24, 0.0 }
 0x17f   :  { %4128 = vpow2.f32 %v1751_v36  ;;  %v1718_v31 = vsub.f32 %v4646_v60, %v1634_v27  ;;  %v1717_v48 = vsub.f32 %v4648_v61, %v1631_v30  ;;  %1810 = vadd.xlane.f32.xlu0 %v1809_v38  ;;  %v1692_v60 = vsel %vm1616_vm2, %v4748_v32, -inf }
 0x180   :  { %v4758_v61 = vmul.f32 0.17677669, %v1348_v25 }
 0x181   :  { %v4752_v13 = vpop.eup %4124  ;;  %v1755_v35 = vmul.f32 1.442695, %v1718_v31  ;;  %v1753_v37 = vmul.f32 1.442695, %v1717_v48  ;;  %v4809_v31 = vmul.f32 0.17677669, %v4734_v54 }
 0x182   :  { %v1812_v41 = vsel %vm1616_vm2, %v4752_v13, 0.0  ;;  %v1695_v25 = vsel %vm1616_vm2, %v4758_v61, -inf }
 0x183   :  { %1813 = vadd.xlane.f32.xlu1 %v1812_v41  ;;  %1690 = vmax.xlane.f32.xlu0 %v1689_v50  ;;  %4130 = vpow2.f32 %v1753_v37  ;;  %v1710_v54 = vsel %vm1616_vm2, %v4809_v31, -inf  ;;  %v80_v37 = vld [vmem:[%s5345_s2 + $0x1] sm:$0x1] }
 0x184   :  { %4132 = vpow2.f32 %v1755_v35  ;;  %v2053_v41 = vsel %vm2005_vm3, %v80_v37, 0 }
 0x185   :  { %v4760_v16 = vpop.eup %4126  ;;  %3935 = vmatpush3.bf16.msra.mxu1 %v2053_v41 }
 0x186   :  { %v1640_v42 = vpop.xlane.xlu1 %1639  ;;  %v1637_v43 = vpop.xlane.xlu0 %1636  ;;  %v1815_v46 = vsel %vm1616_vm2, %v4760_v16, 0.0  ;;  %3946 = vmatprep.subr.bf16.mxu1 %v4250_v0 }
 0x187   :  { %v1720_v51 = vsub.f32 %v4656_v10, %v1640_v42  ;;  %v1719_v52 = vsub.f32 %v4654_v9, %v1637_v43  ;;  %1693 = vmax.xlane.f32.xlu1 %v1692_v60  ;;  %1816 = vadd.xlane.f32.xlu0 %v1815_v46  ;;  %v1698_v9 = vsel %vm1616_vm2, %v4767_v55, -inf  ;;  %v4778_v10 = vmul.f32 0.17677669, %v4728_v39 }
 0x189   :  { %v4771_v56 = vpop.eup %4128  ;;  %v1759_v57 = vmul.f32 1.442695, %v1720_v51  ;;  %v1757_v58 = vmul.f32 1.442695, %v1719_v52  ;;  %v1701_v17 = vsel %vm1616_vm2, %v4778_v10, -inf }
 0x18a   :  { %v1818_v59 = vsel %vm1616_vm2, %v4771_v56, 0.0 }
 0x18b   :  { %1819 = vadd.xlane.f32.xlu1 %v1818_v59  ;;  %1696 = vmax.xlane.f32.xlu0 %v1695_v25  ;;  %4134 = vpow2.f32 %v1757_v58 }
 0x18c   :  { %4136 = vpow2.f32 %v1759_v57 }
 0x18d   :  { %v4780_v26 = vpop.eup %4130 }
 0x18e   :  { %v1646_v3 = vpop.xlane.xlu1 %1645  ;;  %v1643_v4 = vpop.xlane.xlu0 %1642  ;;  %v1821_v8 = vsel %vm1616_vm2, %v4780_v26, 0.0 }
 0x18f   :  { %v4782_v5 = vpop.eup %4132  ;;  %v1722_v6 = vsub.f32 %v4664_v22, %v1646_v3  ;;  %v1721_v7 = vsub.f32 %v4662_v21, %v1643_v4  ;;  %1699 = vmax.xlane.f32.xlu1 %v1698_v9  ;;  %1822 = vadd.xlane.f32.xlu0 %v1821_v8  ;;  %v1704_v21 = vsel %vm1616_vm2, %v4789_v11, -inf  ;;  %v4798_v22 = vmul.f32 0.17677669, %v4732_v53  ;;  %v79_v53 = vld [vmem:[%s5345_s2] sm:$0x1] }
 0x190   :  { %v1824_v18 = vsel %vm1616_vm2, %v4782_v5, 0.0 }
 0x191   :  { %v1763_v39 = vmul.f32 1.442695, %v1722_v6  ;;  %v1761_v12 = vmul.f32 1.442695, %v1721_v7 }
 0x193   :  { %1825 = vadd.xlane.f32.xlu1 %v1824_v18  ;;  %4138 = vpow2.f32 %v1761_v12  ;;  %1702 = vmax.xlane.f32.xlu0 %v1701_v17 }
 0x194   :  { %4140 = vpow2.f32 %v1763_v39 }
 0x195   :  { %v4800_v40 = vpop.eup %4134 }
 0x196   :  { %v1652_v19 = vpop.xlane.xlu1 %1651  ;;  %v1649_v20 = vpop.xlane.xlu0 %1648  ;;  %v1827_v38 = vsel %vm1616_vm2, %v4800_v40, 0.0 }
 0x197   :  { %v4802_v36 = vpop.eup %4136  ;;  %v1724_v27 = vsub.f32 %v4672_v34, %v1652_v19  ;;  %v1723_v30 = vsub.f32 %v4670_v33, %v1649_v20  ;;  %1705 = vmax.xlane.f32.xlu1 %v1704_v21  ;;  %1828 = vadd.xlane.f32.xlu0 %v1827_v38  ;;  %v1707_v34 = vsel %vm1616_vm2, %v4798_v22, -inf  ;;  %v2007_v33 = vsel %vm2005_vm3, %v79_v53, 0 }
 0x198   :  { %v1830_v35 = vsel %vm1616_vm2, %v4802_v36, 0.0  ;;  %3929 = vmatpush3.bf16.msra.mxu0 %v2007_v33 }
 0x199   :  { %v1767_v48 = vmul.f32 1.442695, %v1724_v27  ;;  %v1765_v50 = vmul.f32 1.442695, %v1723_v30  ;;  %3940 = vmatprep.subr.bf16.mxu0 %v4250_v0 }
 0x19b   :  { %4142 = vpow2.f32 %v1767_v48  ;;  %1831 = vadd.xlane.f32.xlu1 %v1830_v35  ;;  %1708 = vmax.xlane.f32.xlu0 %v1707_v34 }
 0x19c   :  { %4144 = vpow2.f32 %v1765_v50 }
 0x19d   :  { %v4826_v60 = vpop.eup %4138 }
 0x19e   :  { %v1658_v42 = vpop.xlane.xlu1 %1657  ;;  %v1655_v43 = vpop.xlane.xlu0 %1654  ;;  %v1833_v25 = vsel %vm1616_vm2, %v4826_v60, 0.0 }
 0x19f   :  { %v4828_v46 = vpop.eup %4140  ;;  %v1726_v51 = vsub.f32 %v4680_v49, %v1658_v42  ;;  %v1725_v52 = vsub.f32 %v4678_v47, %v1655_v43  ;;  %1711 = vmax.xlane.f32.xlu1 %v1710_v54  ;;  %1834 = vadd.xlane.f32.xlu0 %v1833_v25 }
 0x1a0   :  { %v1836_v59 = vsel %vm1616_vm2, %v4828_v46, 0.0 }
 0x1a1   :  { %v1771_v57 = vmul.f32 1.442695, %v1726_v51  ;;  %v1769_v58 = vmul.f32 1.442695, %v1725_v52 }
 0x1a3   :  { %4146 = vpow2.f32 %v1771_v57  ;;  %1837 = vadd.xlane.f32.xlu1 %v1836_v59 }
 0x1a4   :  { %4148 = vpow2.f32 %v1769_v58 }
 0x1a5   :  { %v4837_v9 = vpop.eup %4142 }
 0x1a6   :  { %v4839_v49 = vpop.eup %4144  ;;  %v1664_v47 = vpop.xlane.xlu1 %1663  ;;  %v1842_v4 = vsel %vm1616_vm2, %v4837_v9, 0.0 }
 0x1a7   :  { %v1661_v3 = vpop.xlane.xlu0 %1660  ;;  %v1728_v6 = vsub.f32 %v4688_v1, %v1664_v47  ;;  %1843 = vadd.xlane.f32.xlu1 %v1842_v4  ;;  %v1839_v8 = vsel %vm1616_vm2, %v4839_v49, 0.0 }
 0x1a8   :  { %v1727_v7 = vsub.f32 %v4686_v63, %v1661_v3  ;;  %1840 = vadd.xlane.f32.xlu0 %v1839_v8 }
 0x1a9   :  { %v1775_v39 = vmul.f32 1.442695, %v1728_v6 }
 0x1aa   :  { %v1773_v12 = vmul.f32 1.442695, %v1727_v7 }
 0x1ab   :  { %4150 = vpow2.f32 %v1775_v39 }
 0x1ac   :  { %4152 = vpow2.f32 %v1773_v12 }
 0x1ad   :  { %v4847_v17 = vpop.eup %4146 }
 0x1ae   :  { %v4849_v18 = vpop.eup %4148  ;;  %v1670_v21 = vpop.xlane.xlu1 %1669  ;;  %v1848_v1 = vsel %vm1616_vm2, %v4847_v17, 0.0 }
 0x1af   :  { %v1667_v19 = vpop.xlane.xlu0 %1666  ;;  %v1730_v63 = vsub.f32 %v4696_v15, %v1670_v21  ;;  %1849 = vadd.xlane.f32.xlu1 %v1848_v1  ;;  %v1845_v27 = vsel %vm1616_vm2, %v4849_v18, 0.0 }
 0x1b0   :  { %v1729_v20 = vsub.f32 %v4694_v14, %v1667_v19  ;;  %1846 = vadd.xlane.f32.xlu0 %v1845_v27 }
 0x1b1   :  { %v1779_v30 = vmul.f32 1.442695, %v1730_v63 }
 0x1b2   :  { %v1777_v38 = vmul.f32 1.442695, %v1729_v20 }
 0x1b3   :  { %4154 = vpow2.f32 %v1779_v30 }
 0x1b4   :  { %4156 = vpow2.f32 %v1777_v38 }
 0x1b5   :  { %v4857_v53 = vpop.eup %4150 }
 0x1b6   :  { %v4859_v48 = vpop.eup %4152  ;;  %v1676_v50 = vpop.xlane.xlu1 %1675  ;;  %v1854_v15 = vsel %vm1616_vm2, %v4857_v53, 0.0 }
 0x1b7   :  { %v1673_v34 = vpop.xlane.xlu0 %1672  ;;  %v1732_v14 = vsub.f32 %v4704_v29, %v1676_v50  ;;  %1855 = vadd.xlane.f32.xlu1 %v1854_v15  ;;  %v1851_v35 = vsel %vm1616_vm2, %v4859_v48, 0.0 }
 0x1b8   :  { %v1731_v33 = vsub.f32 %v4702_v28, %v1673_v34  ;;  %1852 = vadd.xlane.f32.xlu0 %v1851_v35 }
 0x1b9   :  { %v1783_v54 = vmul.f32 1.442695, %v1732_v14 }
 0x1ba   :  { %v1781_v37 = vmul.f32 1.442695, %v1731_v33 }
 0x1bb   :  { %4158 = vpow2.f32 %v1783_v54 }
 0x1bc   :  { %4160 = vpow2.f32 %v1781_v37  ;;  %v81_v37 = vld [vmem:[%s5345_s2 + $0x2] sm:$0x1] }
 0x1bd   :  { %v4867_v41 = vpop.eup %4154 }
 0x1be   :  { %v4869_v42 = vpop.eup %4156  ;;  %v1682_v43 = vpop.xlane.xlu1 %1681  ;;  %v1860_v29 = vsel %vm1616_vm2, %v4867_v41, 0.0 }
 0x1bf   :  { %v1679_v51 = vpop.xlane.xlu0 %1678  ;;  %v1734_v28 = vsub.f32 %v4712_v45, %v1682_v43  ;;  %1861 = vadd.xlane.f32.xlu1 %v1860_v29  ;;  %v1857_v25 = vsel %vm1616_vm2, %v4869_v42, 0.0 }
 0x1c0   :  { %v1733_v52 = vsub.f32 %v4710_v44, %v1679_v51  ;;  %1858 = vadd.xlane.f32.xlu0 %v1857_v25 }
 0x1c1   :  { %v1787_v57 = vmul.f32 1.442695, %v1734_v28 }
 0x1c2   :  { %v1785_v58 = vmul.f32 1.442695, %v1733_v52  ;;  %v2099_v52 = vsel %vm2005_vm3, %v81_v37, 0 }
 0x1c3   :  { %4162 = vpow2.f32 %v1787_v57  ;;  %v82_v57 = vld [vmem:[%s5345_s2 + $0x3] sm:$0x1] }
 0x1c4   :  { %4164 = vpow2.f32 %v1785_v58 }
 0x1c5   :  { %v4877_v59 = vpop.eup %4158 }
 0x1c6   :  { %v4879_v47 = vpop.eup %4160  ;;  %v1688_v3 = vpop.xlane.xlu1 %1687  ;;  %v1866_v45 = vsel %vm1616_vm2, %v4877_v59, 0.0 }
 0x1c7   :  { %v1685_v4 = vpop.xlane.xlu0 %1684  ;;  %v1736_v44 = vsub.f32 %v4720_v2, %v1688_v3  ;;  %1867 = vadd.xlane.f32.xlu1 %v1866_v45  ;;  %v1863_v7 = vsel %vm1616_vm2, %v4879_v47, 0.0  ;;  %v2145_v45 = vsel %vm2005_vm3, %v82_v57, 0 }
 0x1c8   :  { %v1735_v6 = vsub.f32 %v4718_v62, %v1685_v4  ;;  %1864 = vadd.xlane.f32.xlu0 %v1863_v7 }
 0x1c9   :  { %v1791_v8 = vmul.f32 1.442695, %v1736_v44 }
 0x1ca   :  { %v1789_v39 = vmul.f32 1.442695, %v1735_v6 }
 0x1cb   :  { %4166 = vpow2.f32 %v1791_v8  ;;  %v83_v8 = vld [vmem:[%s5345_s2 + $0x4] sm:$0x1] }
 0x1cc   :  { %4168 = vpow2.f32 %v1789_v39 }
 0x1cd   :  { %v4887_v12 = vpop.eup %4162 }
 0x1ce   :  { %v4889_v21 = vpop.eup %4164  ;;  %v1872_v19 = vsel %vm1616_vm2, %v4887_v12, 0.0 }
 0x1cf   :  { %1873 = vadd.xlane.f32.xlu1 %v1872_v19  ;;  %v1869_v62 = vsel %vm1616_vm2, %v4889_v21, 0.0 }
 0x1d0   :  { %1870 = vadd.xlane.f32.xlu0 %v1869_v62 }
 0x1d5   :  { %v4895_v2 = vpop.eup %4166 }
 0x1d6   :  { %v4897_v1 = vpop.eup %4168  ;;  %v1878_v63 = vsel %vm1616_vm2, %v4895_v2, 0.0 }
 0x1d7   :  { %1879 = vadd.xlane.f32.xlu1 %v1878_v63  ;;  %v1875_v20 = vsel %vm1616_vm2, %v4897_v1, 0.0 }
 0x1d8   :  { %1876 = vadd.xlane.f32.xlu0 %v1875_v20 }
 0x20c   :  { %v1811_v27 = vpop.xlane.xlu0 %1810 }
 0x20d   :  { %4170 = vrcp.f32 %v1811_v27  ;;  %v2191_v27 = vsel %vm2005_vm3, %v83_v8, 0  ;;  %v87_v8 = vld [vmem:[%s5345_s2 + $0x8] sm:$0x1] }
 0x210   :  { %v1814_v30 = vpop.xlane.xlu1 %1813  ;;  %v1691_v38 = vpop.xlane.xlu0 %1690 }
 0x211   :  { %4172 = vrcp.f32 %v1814_v30  ;;  %v1737_v50 = vsub.f32 %v4740_v23, %v1691_v38 }
 0x213   :  { %v1793_v34 = vmul.f32 1.442695, %v1737_v50 }
 0x214   :  { %v1694_v15 = vpop.xlane.xlu1 %1693  ;;  %v1817_v14 = vpop.xlane.xlu0 %1816 }
 0x215   :  { %4174 = vpow2.f32 %v1793_v34  ;;  %v1738_v33 = vsub.f32 %v4748_v32, %v1694_v15 }
 0x216   :  { %4176 = vrcp.f32 %v1817_v14 }
 0x217   :  { %v4171_v35 = vpop.eup %4170  ;;  %v1795_v54 = vmul.f32 1.442695, %v1738_v33 }
 0x218   :  { %v1937_v43 = vmul.f32 %v4171_v35, %v4742_v24  ;;  %v1820_v51 = vpop.xlane.xlu1 %1819  ;;  %v1697_v29 = vpop.xlane.xlu0 %1696 }
 0x219   :  { %4178 = vpow2.f32 %v1795_v54  ;;  %v1739_v23 = vsub.f32 %v4758_v61, %v1697_v29 }
 0x21a   :  { %4180 = vrcp.f32 %v1820_v51  ;;  %v1969_v28 = vpack.c.bf16 %v1937_v43, %v1937_v43  ;;  %v85_v51 = vld [vmem:[%s5345_s2 + $0x6] sm:$0x1] }
 0x21b   :  { %v4173_v32 = vpop.eup %4172  ;;  %v1797_v25 = vmul.f32 1.442695, %v1739_v23 }
 0x21c   :  { %v1938_v58 = vmul.f32 %v4173_v32, %v4752_v13  ;;  %v1700_v3 = vpop.xlane.xlu1 %1699  ;;  %3931 = vmatmul.mubr.msk.bf16.vlgmr.msra.gmra.mrb[64].mxu0 %vm2001_vm4, %v1969_v28  ;;  %v1823_v61 = vpop.xlane.xlu0 %1822 }
 0x21d   :  { %4182 = vpow2.f32 %v1797_v25  ;;  %v1740_v24 = vsub.f32 %v4767_v55, %v1700_v3  ;;  %3941 = vmatpush3.bf16.msra.mxu0 %v2099_v52  ;;  %3942 = vmatprep.mubr.msk.bf16.mxu0 %vm4251_vm1, %v4250_v0  ;;  %v2283_v25 = vsel %vm2005_vm3, %v85_v51, 0 }
 0x21e   :  { %4184 = vrcp.f32 %v1823_v61  ;;  %v1970_v4 = vpack.c.bf16 %v1938_v58, %v1938_v58  ;;  %3952 = vmatprep.subr.bf16.mxu0 %v4250_v0 }
 0x21f   :  { %v4921_v44 = vpop.eup %4174  ;;  %v1799_v13 = vmul.f32 1.442695, %v1740_v24 }
 0x220   :  { %v4177_v6 = vpop.eup %4176  ;;  %3937 = vmatmul.mubr.msk.bf16.vlgmr.msra.gmra.mrb[64].mxu1 %vm2001_vm4, %v1970_v4  ;;  %v1826_v7 = vpop.xlane.xlu1 %1825  ;;  %v1881_v55 = vsel %vm1616_vm2, %v4921_v44, 0.0 }
 0x221   :  { %v1939_v39 = vmul.f32 %v4177_v6, %v4760_v16  ;;  %4186 = vpow2.f32 %v1799_v13  ;;  %v1703_v19 = vpop.xlane.xlu0 %1702  ;;  %1882 = vadd.xlane.f32.xlu0 %v1881_v55  ;;  %3947 = vmatpush3.bf16.msra.mxu1 %v2145_v45 }
 0x222   :  { %4188 = vrcp.f32 %v1826_v7  ;;  %v1741_v62 = vsub.f32 %v4778_v10, %v1703_v19  ;;  %3948 = vmatprep.mubr.msk.bf16.mxu1 %vm4251_vm1, %v4250_v0  ;;  %3958 = vmatprep.subr.bf16.mxu1 %v4250_v0  ;;  %v84_v10 = vld [vmem:[%s5345_s2 + $0x5] sm:$0x1] }
 0x223   :  { %v4934_v63 = vpop.eup %4178  ;;  %v1971_v20 = vpack.c.bf16 %v1939_v39, %v1939_v39  ;;  %v2237_v37 = vsel %vm2005_vm3, %v84_v10, 0 }
 0x224   :  { %v4181_v30 = vpop.eup %4180  ;;  %v1801_v38 = vmul.f32 1.442695, %v1741_v62  ;;  %v1706_v16 = vpop.xlane.xlu1 %1705  ;;  %v1884_v50 = vsel %vm1616_vm2, %v4934_v63, 0.0 }
 0x225   :  { %v1940_v34 = vmul.f32 %v4181_v30, %v4771_v56  ;;  %v1742_v15 = vsub.f32 %v4789_v11, %v1706_v16  ;;  %3943 = vmatmul.mubr.msk.bf16.vlgmr.msra.gmra.mrb[68].mxu0 %vm2001_vm4, %v1971_v20  ;;  %v1829_v14 = vpop.xlane.xlu0 %1828  ;;  %1885 = vadd.xlane.f32.xlu1 %v1884_v50 }
 0x226   :  { %4190 = vpow2.f32 %v1801_v38  ;;  %3953 = vmatpush3.bf16.msra.mxu0 %v2191_v27  ;;  %3954 = vmatprep.mubr.msk.bf16.mxu0 %vm4251_vm1, %v4250_v0  ;;  %v2375_v38 = vsel %vm2005_vm3, %v87_v8, 0 }
 0x227   :  { %v4947_v33 = vpop.eup %4182  ;;  %v1803_v35 = vmul.f32 1.442695, %v1742_v15  ;;  %4192 = vrcp.f32 %v1829_v14  ;;  %v1972_v54 = vpack.c.bf16 %v1940_v34, %v1940_v34  ;;  %3964 = vmatprep.subr.bf16.mxu0 %v4250_v0 }
 0x228   :  { %v4185_v56 = vpop.eup %4184  ;;  %v1832_v11 = vpop.xlane.xlu1 %1831  ;;  %v1887_v43 = vsel %vm1616_vm2, %v4947_v33, 0.0 }
 0x229   :  { %v1941_v29 = vmul.f32 %v4185_v56, %v4780_v26  ;;  %4194 = vpow2.f32 %v1803_v35  ;;  %3949 = vmatmul.mubr.msk.bf16.vlgmr.msra.gmra.mrb[68].mxu1 %vm2001_vm4, %v1972_v54  ;;  %v1709_v23 = vpop.xlane.xlu0 %1708  ;;  %1888 = vadd.xlane.f32.xlu0 %v1887_v43  ;;  %v89_v35 = vld [vmem:[%s5345_s2 + $0xa] sm:$0x1] }
 0x22a   :  { %4196 = vrcp.f32 %v1832_v11  ;;  %v1743_v28 = vsub.f32 %v4798_v22, %v1709_v23  ;;  %3959 = vmatpush3.bf16.msra.mxu1 %v2237_v37  ;;  %3960 = vmatprep.mubr.msk.bf16.mxu1 %vm4251_vm1, %v4250_v0  ;;  %v86_v22 = vld [vmem:[%s5345_s2 + $0x7] sm:$0x1] }
 0x22b   :  { %v4961_v52 = vpop.eup %4186  ;;  %v1973_v32 = vpack.c.bf16 %v1941_v29, %v1941_v29  ;;  %3970 = vmatprep.subr.bf16.mxu1 %v4250_v0  ;;  %v2329_v6 = vsel %vm2005_vm3, %v86_v22, 0  ;;  %v2467_v29 = vsel %vm2005_vm3, %v89_v35, 0 }
 0x22c   :  { %v4189_v26 = vpop.eup %4188  ;;  %v1805_v57 = vmul.f32 1.442695, %v1743_v28  ;;  %v1712_v58 = vpop.xlane.xlu1 %1711  ;;  %v1890_v3 = vsel %vm1616_vm2, %v4961_v52, 0.0 }
 0x22d   :  { %v1942_v24 = vmul.f32 %v4189_v26, %v4782_v5  ;;  %v1744_v61 = vsub.f32 %v4809_v31, %v1712_v58  ;;  %3955 = vmatmul.mubr.msk.bf16.vlgmr.msra.gmra.mrb[72].mxu0 %vm2001_vm4, %v1973_v32  ;;  %v1835_v4 = vpop.xlane.xlu0 %1834  ;;  %1891 = vadd.xlane.f32.xlu1 %v1890_v3 }
 0x22e   :  { %4198 = vpow2.f32 %v1805_v57  ;;  %3965 = vmatpush3.bf16.msra.mxu0 %v2283_v25  ;;  %3966 = vmatprep.mubr.msk.bf16.mxu0 %vm4251_vm1, %v4250_v0 }
 0x22f   :  { %v1807_v45 = vmul.f32 1.442695, %v1744_v61  ;;  %4200 = vrcp.f32 %v1835_v4  ;;  %v1974_v13 = vpack.c.bf16 %v1942_v24, %v1942_v24  ;;  %3976 = vmatprep.subr.bf16.mxu0 %v4250_v0 }
 0x230   :  { %v4977_v7 = vpop.eup %4190  ;;  %v1838_v5 = vpop.xlane.xlu1 %1837 }
 0x231   :  { %v4193_v31 = vpop.eup %4192  ;;  %4202 = vpow2.f32 %v1807_v45  ;;  %3961 = vmatmul.mubr.msk.bf16.vlgmr.msra.gmra.mrb[72].mxu1 %vm2001_vm4, %v1974_v13  ;;  %v1893_v55 = vsel %vm1616_vm2, %v4977_v7, 0.0 }
 0x232   :  { %v1943_v39 = vmul.f32 %v4193_v31, %v4800_v40  ;;  %4204 = vrcp.f32 %v1838_v5  ;;  %1894 = vadd.xlane.f32.xlu0 %v1893_v55  ;;  %3971 = vmatpush3.bf16.msra.mxu1 %v2329_v6  ;;  %v88_v40 = vld [vmem:[%s5345_s2 + $0x9] sm:$0x1]  ;;  %v93_v31 = vld [vmem:[%s5345_s2 + $0xe] sm:$0x1] }
 0x233   :  { %v4986_v19 = vpop.eup %4194  ;;  %3972 = vmatprep.mubr.msk.bf16.mxu1 %vm4251_vm1, %v4250_v0  ;;  %3982 = vmatprep.subr.bf16.mxu1 %v4250_v0  ;;  %v2421_v34 = vsel %vm2005_vm3, %v88_v40, 0 }
 0x234   :  { %v4197_v62 = vpop.eup %4196  ;;  %v1844_v20 = vpop.xlane.xlu1 %1843  ;;  %v1975_v27 = vpack.c.bf16 %v1943_v39, %v1943_v39  ;;  %v1896_v30 = vsel %vm1616_vm2, %v4986_v19, 0.0 }
 0x235   :  { %v1944_v16 = vmul.f32 %v4197_v62, %v4802_v36  ;;  %4206 = vrcp.f32 %v1844_v20  ;;  %v1841_v50 = vpop.xlane.xlu0 %1840  ;;  %1897 = vadd.xlane.f32.xlu1 %v1896_v30  ;;  %v2651_v62 = vsel %vm2005_vm3, %v93_v31, 0 }
 0x236   :  { %3967 = vmatmul.mubr.msk.bf16.vlgmr.msra.gmra.mrb[76].mxu0 %vm2001_vm4, %v1975_v27  ;;  %4208 = vrcp.f32 %v1841_v50 }
 0x237   :  { %v1976_v10 = vpack.c.bf16 %v1944_v16, %v1944_v16  ;;  %3977 = vmatpush3.bf16.msra.mxu0 %v2375_v38  ;;  %3978 = vmatprep.mubr.msk.bf16.mxu0 %vm4251_vm1, %v4250_v0  ;;  %v95_v16 = vld [vmem:[%s5345_s2 + $0x10] sm:$0x1] }
 0x238   :  { %v5002_v15 = vpop.eup %4198  ;;  %3988 = vmatprep.subr.bf16.mxu0 %v4250_v0 }
 0x239   :  { %v4201_v14 = vpop.eup %4200  ;;  %3973 = vmatmul.mubr.msk.bf16.vlgmr.msra.gmra.mrb[76].mxu1 %vm2001_vm4, %v1976_v10  ;;  %v1899_v36 = vsel %vm1616_vm2, %v5002_v15, 0.0 }
 0x23a   :  { %v1945_v54 = vmul.f32 %v4201_v14, %v4826_v60  ;;  %1900 = vadd.xlane.f32.xlu0 %v1899_v36  ;;  %3983 = vmatpush3.bf16.msra.mxu1 %v2421_v34  ;;  %v90_v60 = vld [vmem:[%s5345_s2 + $0xb] sm:$0x1]  ;;  %v2743_v14 = vsel %vm2005_vm3, %v95_v16, 0 }
 0x23b   :  { %v5012_v37 = vpop.eup %4202  ;;  %3984 = vmatprep.mubr.msk.bf16.mxu1 %vm4251_vm1, %v4250_v0  ;;  %3994 = vmatprep.subr.bf16.mxu1 %v4250_v0  ;;  %v2513_v26 = vsel %vm2005_vm3, %v90_v60, 0 }
 0x23c   :  { %v4205_v56 = vpop.eup %4204  ;;  %v1850_v11 = vpop.xlane.xlu1 %1849  ;;  %v1977_v43 = vpack.c.bf16 %v1945_v54, %v1945_v54  ;;  %v1902_v51 = vsel %vm1616_vm2, %v5012_v37, 0.0 }
 0x23d   :  { %v1946_v23 = vmul.f32 %v4205_v56, %v4828_v46  ;;  %4210 = vrcp.f32 %v1850_v11  ;;  %v1847_v28 = vpop.xlane.xlu0 %1846  ;;  %1903 = vadd.xlane.f32.xlu1 %v1902_v51  ;;  %v91_v46 = vld [vmem:[%s5345_s2 + $0xc] sm:$0x1] }
 0x23e   :  { %3979 = vmatmul.mubr.msk.bf16.vlgmr.msra.gmra.mrb[80].mxu0 %vm2001_vm4, %v1977_v43  ;;  %4212 = vrcp.f32 %v1847_v28  ;;  %v2559_v61 = vsel %vm2005_vm3, %v91_v46, 0  ;;  %v97_v43 = vld [vmem:[%s5345_s2 + $0x12] sm:$0x1] }
 0x23f   :  { %v4207_v32 = vpop.eup %4206  ;;  %v1978_v25 = vpack.c.bf16 %v1946_v23, %v1946_v23  ;;  %3989 = vmatpush3.bf16.msra.mxu0 %v2467_v29  ;;  %3990 = vmatprep.mubr.msk.bf16.mxu0 %vm4251_vm1, %v4250_v0  ;;  %v2835_v23 = vsel %vm2005_vm3, %v97_v43, 0 }
 0x240   :  { %v4209_v57 = vpop.eup %4208  ;;  %4000 = vmatprep.subr.bf16.mxu0 %v4250_v0  ;;  %v1948_v3 = vmul.f32 %v4207_v32, %v4837_v9 }
 0x241   :  { %v1947_v58 = vmul.f32 %v4209_v57, %v4839_v49  ;;  %3985 = vmatmul.mubr.msk.bf16.vlgmr.msra.gmra.mrb[80].mxu1 %vm2001_vm4, %v1978_v25  ;;  %v92_v49 = vld [vmem:[%s5345_s2 + $0xd] sm:$0x1] }
 0x242   :  { %3995 = vmatpush3.bf16.msra.mxu1 %v2513_v26  ;;  %3996 = vmatprep.mubr.msk.bf16.mxu1 %vm4251_vm1, %v4250_v0  ;;  %v1980_v13 = vpack.c.bf16 %v1948_v3, %v1948_v3  ;;  %v2605_v9 = vsel %vm2005_vm3, %v92_v49, 0 }
 0x243   :  { %v1979_v22 = vpack.c.bf16 %v1947_v58, %v1947_v58  ;;  %4006 = vmatprep.subr.bf16.mxu1 %v4250_v0  ;;  %v99_v58 = vld [vmem:[%s5345_s2 + $0x14] sm:$0x1] }
 0x244   :  { %v1856_v24 = vpop.xlane.xlu1 %1855 }
 0x245   :  { %4214 = vrcp.f32 %v1856_v24  ;;  %v1853_v4 = vpop.xlane.xlu0 %1852  ;;  %v2927_v24 = vsel %vm2005_vm3, %v99_v58, 0 }
 0x246   :  { %3991 = vmatmul.mubr.msk.bf16.vlgmr.msra.gmra.mrb[84].mxu0 %vm2001_vm4, %v1979_v22  ;;  %4216 = vrcp.f32 %v1853_v4 }
 0x247   :  { %v4211_v45 = vpop.eup %4210  ;;  %4001 = vmatpush3.bf16.msra.mxu0 %v2559_v61  ;;  %4002 = vmatprep.mubr.msk.bf16.mxu0 %vm4251_vm1, %v4250_v0 }
 0x248   :  { %v4213_v6 = vpop.eup %4212  ;;  %4012 = vmatprep.subr.bf16.mxu0 %v4250_v0  ;;  %v1950_v55 = vmul.f32 %v4211_v45, %v4847_v17 }
 0x249   :  { %v1949_v5 = vmul.f32 %v4213_v6, %v4849_v18  ;;  %3997 = vmatmul.mubr.msk.bf16.vlgmr.msra.gmra.mrb[84].mxu1 %vm2001_vm4, %v1980_v13  ;;  %v94_v18 = vld [vmem:[%s5345_s2 + $0xf] sm:$0x1] }
 0x24a   :  { %4007 = vmatpush3.bf16.msra.mxu1 %v2605_v9  ;;  %4008 = vmatprep.mubr.msk.bf16.mxu1 %vm4251_vm1, %v4250_v0  ;;  %v1982_v30 = vpack.c.bf16 %v1950_v55, %v1950_v55  ;;  %v2697_v17 = vsel %vm2005_vm3, %v94_v18, 0  ;;  %v101_v9 = vld [vmem:[%s5345_s2 + $0x16] sm:$0x1]  ;;  %v103_v18 = vld [vmem:[%s5345_s2 + $0x18] sm:$0x1] }
 0x24b   :  { %v1981_v8 = vpack.c.bf16 %v1949_v5, %v1949_v5  ;;  %4018 = vmatprep.subr.bf16.mxu1 %v4250_v0  ;;  %v3019_v31 = vsel %vm2005_vm3, %v101_v9, 0 }
 0x24c   :  { %v1862_v39 = vpop.xlane.xlu1 %1861 }
 0x24d   :  { %4218 = vrcp.f32 %v1862_v39  ;;  %v1859_v20 = vpop.xlane.xlu0 %1858 }
 0x24e   :  { %4003 = vmatmul.mubr.msk.bf16.vlgmr.msra.gmra.mrb[88].mxu0 %vm2001_vm4, %v1981_v8  ;;  %4220 = vrcp.f32 %v1859_v20 }
 0x24f   :  { %v4215_v27 = vpop.eup %4214  ;;  %4013 = vmatpush3.bf16.msra.mxu0 %v2651_v62  ;;  %4014 = vmatprep.mubr.msk.bf16.mxu0 %vm4251_vm1, %v4250_v0 }
 0x250   :  { %v4217_v38 = vpop.eup %4216  ;;  %4024 = vmatprep.subr.bf16.mxu0 %v4250_v0  ;;  %v1952_v50 = vmul.f32 %v4215_v27, %v4857_v53 }
 0x251   :  { %v1951_v40 = vmul.f32 %v4217_v38, %v4859_v48  ;;  %4009 = vmatmul.mubr.msk.bf16.vlgmr.msra.gmra.mrb[88].mxu1 %vm2001_vm4, %v1982_v30  ;;  %v96_v48 = vld [vmem:[%s5345_s2 + $0x11] sm:$0x1]  ;;  %v3111_v30 = vsel %vm2005_vm3, %v103_v18, 0 }
 0x252   :  { %4019 = vmatpush3.bf16.msra.mxu1 %v2697_v17  ;;  %4020 = vmatprep.mubr.msk.bf16.mxu1 %vm4251_vm1, %v4250_v0  ;;  %v1984_v54 = vpack.c.bf16 %v1952_v50, %v1952_v50  ;;  %v2789_v53 = vsel %vm2005_vm3, %v96_v48, 0 }
 0x253   :  { %v1983_v10 = vpack.c.bf16 %v1951_v40, %v1951_v40  ;;  %4030 = vmatprep.subr.bf16.mxu1 %v4250_v0 }
 0x254   :  { %v1868_v34 = vpop.xlane.xlu1 %1867 }
 0x255   :  { %4222 = vrcp.f32 %v1868_v34  ;;  %v1865_v36 = vpop.xlane.xlu0 %1864 }
 0x256   :  { %4015 = vmatmul.mubr.msk.bf16.vlgmr.msra.gmra.mrb[92].mxu0 %vm2001_vm4, %v1983_v10  ;;  %4224 = vrcp.f32 %v1865_v36  ;;  %v105_v10 = vld [vmem:[%s5345_s2 + $0x1a] sm:$0x1] }
 0x257   :  { %v4219_v35 = vpop.eup %4218  ;;  %4025 = vmatpush3.bf16.msra.mxu0 %v2743_v14  ;;  %4026 = vmatprep.mubr.msk.bf16.mxu0 %vm4251_vm1, %v4250_v0  ;;  %v3203_v36 = vsel %vm2005_vm3, %v105_v10, 0 }
 0x258   :  { %v4221_v56 = vpop.eup %4220  ;;  %4036 = vmatprep.subr.bf16.mxu0 %v4250_v0  ;;  %v1954_v51 = vmul.f32 %v4219_v35, %v4867_v41 }
 0x259   :  { %v1953_v11 = vmul.f32 %v4221_v56, %v4869_v42  ;;  %4021 = vmatmul.mubr.msk.bf16.vlgmr.msra.gmra.mrb[92].mxu1 %vm2001_vm4, %v1984_v54  ;;  %v98_v42 = vld [vmem:[%s5345_s2 + $0x13] sm:$0x1]  ;;  %v106_v54 = vld [vmem:[%s5345_s2 + $0x1b] sm:$0x1] }
 0x25a   :  { %4031 = vmatpush3.bf16.msra.mxu1 %v2789_v53  ;;  %4032 = vmatprep.mubr.msk.bf16.mxu1 %vm4251_vm1, %v4250_v0  ;;  %v1986_v25 = vpack.c.bf16 %v1954_v51, %v1954_v51  ;;  %v2881_v41 = vsel %vm2005_vm3, %v98_v42, 0  ;;  %v107_v51 = vld [vmem:[%s5345_s2 + $0x1c] sm:$0x1] }
 0x25b   :  { %v1985_v29 = vpack.c.bf16 %v1953_v11, %v1953_v11  ;;  %4042 = vmatprep.subr.bf16.mxu1 %v4250_v0  ;;  %v3249_v11 = vsel %vm2005_vm3, %v106_v54, 0 }
 0x25c   :  { %v1874_v60 = vpop.xlane.xlu1 %1873 }
 0x25d   :  { %4226 = vrcp.f32 %v1874_v60  ;;  %v1871_v28 = vpop.xlane.xlu0 %1870 }
 0x25e   :  { %4027 = vmatmul.mubr.msk.bf16.vlgmr.msra.gmra.mrb[96].mxu0 %vm2001_vm4, %v1985_v29  ;;  %4228 = vrcp.f32 %v1871_v28  ;;  %v108_v28 = vld [vmem:[%s5345_s2 + $0x1d] sm:$0x1] }
 0x25f   :  { %v4223_v32 = vpop.eup %4222  ;;  %4037 = vmatpush3.bf16.msra.mxu0 %v2835_v23  ;;  %4038 = vmatprep.mubr.msk.bf16.mxu0 %vm4251_vm1, %v4250_v0  ;;  %v3295_v23 = vsel %vm2005_vm3, %v107_v51, 0 }
 0x260   :  { %v4225_v26 = vpop.eup %4224  ;;  %4048 = vmatprep.subr.bf16.mxu0 %v4250_v0  ;;  %v1956_v46 = vmul.f32 %v4223_v32, %v4877_v59 }
 0x261   :  { %v1955_v57 = vmul.f32 %v4225_v26, %v4879_v47  ;;  %4033 = vmatmul.mubr.msk.bf16.vlgmr.msra.gmra.mrb[96].mxu1 %vm2001_vm4, %v1986_v25  ;;  %v100_v47 = vld [vmem:[%s5345_s2 + $0x15] sm:$0x1] }
 0x262   :  { %4043 = vmatpush3.bf16.msra.mxu1 %v2881_v41  ;;  %4044 = vmatprep.mubr.msk.bf16.mxu1 %vm4251_vm1, %v4250_v0  ;;  %v1988_v4 = vpack.c.bf16 %v1956_v46, %v1956_v46  ;;  %v2973_v59 = vsel %vm2005_vm3, %v100_v47, 0  ;;  %v3341_v41 = vsel %vm2005_vm3, %v108_v28, 0 }
 0x263   :  { %v1987_v3 = vpack.c.bf16 %v1955_v57, %v1955_v57  ;;  %4054 = vmatprep.subr.bf16.mxu1 %v4250_v0 }
 0x264   :  { %v1880_v22 = vpop.xlane.xlu1 %1879 }
 0x265   :  { %4230 = vrcp.f32 %v1880_v22  ;;  %v1877_v61 = vpop.xlane.xlu0 %1876 }
 0x266   :  { %4039 = vmatmul.mubr.msk.bf16.vlgmr.msra.gmra.mrb[100].mxu0 %vm2001_vm4, %v1987_v3  ;;  %4232 = vrcp.f32 %v1877_v61 }
 0x267   :  { %v4227_v49 = vpop.eup %4226  ;;  %4049 = vmatpush3.bf16.msra.mxu0 %v2927_v24  ;;  %4050 = vmatprep.mubr.msk.bf16.mxu0 %vm4251_vm1, %v4250_v0  ;;  %v110_v24 = vld [vmem:[%s5345_s2 + $0x1f] sm:$0x1] }
 0x268   :  { %v4229_v45 = vpop.eup %4228  ;;  %4060 = vmatprep.subr.bf16.mxu0 %v4250_v0  ;;  %v1958_v6 = vmul.f32 %v4227_v49, %v4887_v12  ;;  %v3433_v61 = vsel %vm2005_vm3, %v110_v24, 0 }
 0x269   :  { %v1957_v13 = vmul.f32 %v4229_v45, %v4889_v21  ;;  %4045 = vmatmul.mubr.msk.bf16.vlgmr.msra.gmra.mrb[100].mxu1 %vm2001_vm4, %v1988_v4  ;;  %v102_v21 = vld [vmem:[%s5345_s2 + $0x17] sm:$0x1] }
 0x26a   :  { %4055 = vmatpush3.bf16.msra.mxu1 %v2973_v59  ;;  %4056 = vmatprep.mubr.msk.bf16.mxu1 %vm4251_vm1, %v4250_v0  ;;  %v1990_v8 = vpack.c.bf16 %v1958_v6, %v1958_v6  ;;  %v3065_v39 = vsel %vm2005_vm3, %v102_v21, 0 }
 0x26b   :  { %v1989_v5 = vpack.c.bf16 %v1957_v13, %v1957_v13  ;;  %4066 = vmatprep.subr.bf16.mxu1 %v4250_v0 }
 0x26e   :  { %4051 = vmatmul.mubr.msk.bf16.vlgmr.msra.gmra.mrb[104].mxu0 %vm2001_vm4, %v1989_v5 }
 0x26f   :  { %v4231_v55 = vpop.eup %4230  ;;  %4061 = vmatpush3.bf16.msra.mxu0 %v3019_v31  ;;  %4062 = vmatprep.mubr.msk.bf16.mxu0 %vm4251_vm1, %v4250_v0 }
 0x270   :  { %v4233_v12 = vpop.eup %4232  ;;  %4072 = vmatprep.subr.bf16.mxu0 %v4250_v0  ;;  %v1960_v20 = vmul.f32 %v4231_v55, %v4895_v2 }
 0x271   :  { %v1959_v62 = vmul.f32 %v4233_v12, %v4897_v1  ;;  %4057 = vmatmul.mubr.msk.bf16.vlgmr.msra.gmra.mrb[104].mxu1 %vm2001_vm4, %v1990_v8  ;;  %v104_v1 = vld [vmem:[%s5345_s2 + $0x19] sm:$0x1] }
 0x272   :  { %4067 = vmatpush3.bf16.msra.mxu1 %v3065_v39  ;;  %4068 = vmatprep.mubr.msk.bf16.mxu1 %vm4251_vm1, %v4250_v0  ;;  %v1992_v17 = vpack.c.bf16 %v1960_v20, %v1960_v20  ;;  %v3157_v38 = vsel %vm2005_vm3, %v104_v1, 0 }
 0x273   :  { %v1991_v27 = vpack.c.bf16 %v1959_v62, %v1959_v62  ;;  %4078 = vmatprep.subr.bf16.mxu1 %v4250_v0 }
 0x276   :  { %4063 = vmatmul.mubr.msk.bf16.vlgmr.msra.gmra.mrb[108].mxu0 %vm2001_vm4, %v1991_v27 }
 0x277   :  { %4073 = vmatpush3.bf16.msra.mxu0 %v3111_v30  ;;  %4074 = vmatprep.mubr.msk.bf16.mxu0 %vm4251_vm1, %v4250_v0 }
 0x278   :  { %4084 = vmatprep.subr.bf16.mxu0 %v4250_v0 }
 0x279   :  { %4069 = vmatmul.mubr.msk.bf16.vlgmr.msra.gmra.mrb[108].mxu1 %vm2001_vm4, %v1992_v17 }
 0x27a   :  { %4079 = vmatpush3.bf16.msra.mxu1 %v3157_v38  ;;  %4080 = vmatprep.mubr.msk.bf16.mxu1 %vm4251_vm1, %v4250_v0 }
 0x27b   :  { %4090 = vmatprep.subr.bf16.mxu1 %v4250_v0 }
 0x2ae   :  { %v1883_v2 = vpop.xlane.xlu0 %1882 }
 0x2af   :  { %4234 = vrcp.f32 %v1883_v2 }
 0x2b2   :  { %v1886_v40 = vpop.xlane.xlu1 %1885 }
 0x2b3   :  { %4236 = vrcp.f32 %v1886_v40 }
 0x2b6   :  { %v1889_v16 = vpop.xlane.xlu0 %1888 }
 0x2b7   :  { %4238 = vrcp.f32 %v1889_v16 }
 0x2b9   :  { %v4235_v50 = vpop.eup %4234 }
 0x2ba   :  { %v1961_v34 = vmul.f32 %v4235_v50, %v4921_v44  ;;  %v1892_v14 = vpop.xlane.xlu1 %1891 }
 0x2bb   :  { %4240 = vrcp.f32 %v1892_v14 }
 0x2bc   :  { %v1993_v48 = vpack.c.bf16 %v1961_v34, %v1961_v34 }
 0x2bd   :  { %v4237_v35 = vpop.eup %4236 }
 0x2be   :  { %v1962_v53 = vmul.f32 %v4237_v35, %v4934_v63  ;;  %4075 = vmatmul.mubr.msk.bf16.vlgmr.msra.gmra.mrb[112].mxu0 %vm2001_vm4, %v1993_v48 }
 0x2bf   :  { %v1895_v56 = vpop.xlane.xlu0 %1894  ;;  %4085 = vmatpush3.bf16.msra.mxu0 %v3203_v36  ;;  %4086 = vmatprep.mubr.msk.bf16.mxu0 %vm4251_vm1, %v4250_v0 }
 0x2c0   :  { %4242 = vrcp.f32 %v1895_v56  ;;  %v1994_v44 = vpack.c.bf16 %v1962_v53, %v1962_v53  ;;  %4096 = vmatprep.subr.bf16.mxu0 %v4250_v0 }
 0x2c1   :  { %v4239_v43 = vpop.eup %4238 }
 0x2c2   :  { %v1963_v63 = vmul.f32 %v4239_v43, %v4947_v33  ;;  %4081 = vmatmul.mubr.msk.bf16.vlgmr.msra.gmra.mrb[112].mxu1 %vm2001_vm4, %v1994_v44  ;;  %v1898_v29 = vpop.xlane.xlu1 %1897 }
 0x2c3   :  { %4244 = vrcp.f32 %v1898_v29  ;;  %4091 = vmatpush3.bf16.msra.mxu1 %v3249_v11  ;;  %4092 = vmatprep.mubr.msk.bf16.mxu1 %vm4251_vm1, %v4250_v0 }
 0x2c4   :  { %v1995_v60 = vpack.c.bf16 %v1963_v63, %v1963_v63  ;;  %4102 = vmatprep.subr.bf16.mxu1 %v4250_v0 }
 0x2c5   :  { %v4241_v42 = vpop.eup %4240 }
 0x2c6   :  { %v1964_v33 = vmul.f32 %v4241_v42, %v4961_v52  ;;  %4087 = vmatmul.mubr.msk.bf16.vlgmr.msra.gmra.mrb[116].mxu0 %vm2001_vm4, %v1995_v60  ;;  %v109_v52 = vld [vmem:[%s5345_s2 + $0x1e] sm:$0x1] }
 0x2c7   :  { %v1901_v32 = vpop.xlane.xlu0 %1900  ;;  %4097 = vmatpush3.bf16.msra.mxu0 %v3295_v23  ;;  %4098 = vmatprep.mubr.msk.bf16.mxu0 %vm4251_vm1, %v4250_v0  ;;  %v3387_v22 = vsel %vm2005_vm3, %v109_v52, 0 }
 0x2c8   :  { %4246 = vrcp.f32 %v1901_v32  ;;  %v1996_v25 = vpack.c.bf16 %v1964_v33, %v1964_v33  ;;  %4108 = vmatprep.subr.bf16.mxu0 %v4250_v0 }
 0x2ca   :  { %v4243_v26 = vpop.eup %4242  ;;  %4093 = vmatmul.mubr.msk.bf16.vlgmr.msra.gmra.mrb[116].mxu1 %vm2001_vm4, %v1996_v25  ;;  %v1904_v57 = vpop.xlane.xlu1 %1903 }
 0x2cb   :  { %v1965_v58 = vmul.f32 %v4243_v26, %v4977_v7  ;;  %4248 = vrcp.f32 %v1904_v57  ;;  %4103 = vmatpush3.bf16.msra.mxu1 %v3341_v41  ;;  %4104 = vmatprep.mubr.msk.bf16.mxu1 %vm4251_vm1, %v4250_v0 }
 0x2cc   :  { %4114 = vmatprep.subr.bf16.mxu1 %v4250_v0 }
 0x2cd   :  { %v4245_v46 = vpop.eup %4244  ;;  %v1997_v3 = vpack.c.bf16 %v1965_v58, %v1965_v58 }
 0x2ce   :  { %v1966_v47 = vmul.f32 %v4245_v46, %v4986_v19 }
 0x2cf   :  { %4099 = vmatmul.mubr.msk.bf16.vlgmr.msra.gmra.mrb[120].mxu0 %vm2001_vm4, %v1997_v3 }
 0x2d0   :  { %v1998_v7 = vpack.c.bf16 %v1966_v47, %v1966_v47  ;;  %4109 = vmatpush3.bf16.msra.mxu0 %v3387_v22  ;;  %4110 = vmatprep.mubr.msk.bf16.mxu0 %vm4251_vm1, %v4250_v0 }
 0x2d2   :  { %v4247_v49 = vpop.eup %4246  ;;  %4105 = vmatmul.mubr.msk.bf16.vlgmr.msra.gmra.mrb[120].mxu1 %vm2001_vm4, %v1998_v7 }
 0x2d3   :  { %v1967_v4 = vmul.f32 %v4247_v49, %v5002_v15  ;;  %4115 = vmatpush3.bf16.msra.mxu1 %v3433_v61  ;;  %4116 = vmatprep.mubr.msk.bf16.mxu1 %vm4251_vm1, %v4250_v0 }
 0x2d5   :  { %v4249_v59 = vpop.eup %4248  ;;  %v1999_v19 = vpack.c.bf16 %v1967_v4, %v1967_v4 }
 0x2d6   :  { %v1968_v45 = vmul.f32 %v4249_v59, %v5012_v37 }
 0x2d7   :  { %4111 = vmatmul.mubr.msk.bf16.vlgmr.msra.gmra.mrb[124].mxu0 %vm2001_vm4, %v1999_v19 }
 0x2d8   :  { %v2000_v13 = vpack.c.bf16 %v1968_v45, %v1968_v45 }
 0x2da   :  { %4117 = vmatmul.mubr.msk.bf16.vlgmr.msra.gmra.mrb[124].mxu1 %vm2001_vm4, %v2000_v13 }
 0x2ef   :  { %v2043_v9 = vpop.f32.mrb[64].mxu0 }
 0x2f0   :  { %v3475_v6 = vpack.c.bf16 %v2043_v9, %v2043_v9  ;;  %v3932_v5 = vpop.f32.mrb[65].mxu0 }
 0x2f1   :  { %v2046_v31 = vpop.f32.mrb[66].mxu0 }
 0x2f2   :  { %3508 = vst.msk [vmem:[%s5346_s3] sm:$0x1] %vm3507_vm5, %v3475_v6  ;;  %v3933_v0 = vpop.f32.mrb[67].mxu0 }
 0x2f3   :  { %v2089_v15 = vpop.f32.mrb[64].mxu1 }
 0x2f4   :  { %v3476_v21 = vpack.c.bf16 %v2089_v15, %v2089_v15  ;;  %v3938_v55 = vpop.f32.mrb[65].mxu1 }
 0x2f5   :  { %v2092_v37 = vpop.f32.mrb[66].mxu1 }
 0x2f6   :  { %3509 = vst.msk [vmem:[%s5346_s3 + $0x1] sm:$0x1] %vm3507_vm5, %v3476_v21  ;;  %v3939_v8 = vpop.f32.mrb[67].mxu1 }
 0x2f8   :  { %v2135_v39 = vpop.f32.mrb[68].mxu0 }
 0x2f9   :  { %v3477_v12 = vpack.c.bf16 %v2135_v39, %v2135_v39  ;;  %v3944_v62 = vpop.f32.mrb[69].mxu0 }
 0x2fa   :  { %v2138_v18 = vpop.f32.mrb[70].mxu0 }
 0x2fb   :  { %3510 = vst.msk [vmem:[%s5346_s3 + $0x2] sm:$0x1] %vm3507_vm5, %v3477_v12  ;;  %v3945_v20 = vpop.f32.mrb[71].mxu0 }
 0x2fc   :  { %v2181_v27 = vpop.f32.mrb[68].mxu1 }
 0x2fd   :  { %v3478_v30 = vpack.c.bf16 %v2181_v27, %v2181_v27  ;;  %v3950_v1 = vpop.f32.mrb[69].mxu1 }
 0x2fe   :  { %v2184_v17 = vpop.f32.mrb[70].mxu1 }
 0x2ff   :  { %3511 = vst.msk [vmem:[%s5346_s3 + $0x3] sm:$0x1] %vm3507_vm5, %v3478_v30  ;;  %v3951_v38 = vpop.f32.mrb[71].mxu1 }
 0x300   :  { %v2227_v2 = vpop.f32.mrb[72].mxu0 }
 0x301   :  { %v3479_v40 = vpack.c.bf16 %v2227_v2, %v2227_v2  ;;  %v3956_v16 = vpop.f32.mrb[73].mxu0 }
 0x302   :  { %v2230_v50 = vpop.f32.mrb[74].mxu0 }
 0x303   :  { %3512 = vst.msk [vmem:[%s5346_s3 + $0x4] sm:$0x1] %vm3507_vm5, %v3479_v40  ;;  %v3957_v10 = vpop.f32.mrb[75].mxu0 }
 0x304   :  { %v2273_v34 = vpop.f32.mrb[72].mxu1 }
 0x305   :  { %v3480_v14 = vpack.c.bf16 %v2273_v34, %v2273_v34  ;;  %v3962_v48 = vpop.f32.mrb[73].mxu1 }
 0x306   :  { %v2276_v36 = vpop.f32.mrb[74].mxu1 }
 0x307   :  { %3513 = vst.msk [vmem:[%s5346_s3 + $0x5] sm:$0x1] %vm3507_vm5, %v3480_v14  ;;  %v3963_v35 = vpop.f32.mrb[75].mxu1 }
 0x309   :  { %v2319_v54 = vpop.f32.mrb[76].mxu0 }
 0x30a   :  { %v3481_v53 = vpack.c.bf16 %v2319_v54, %v2319_v54  ;;  %v3968_v56 = vpop.f32.mrb[77].mxu0 }
 0x30b   :  { %v2322_v44 = vpop.f32.mrb[78].mxu0 }
 0x30c   :  { %3514 = vst.msk [vmem:[%s5346_s3 + $0x6] sm:$0x1] %vm3507_vm5, %v3481_v53  ;;  %v3969_v11 = vpop.f32.mrb[79].mxu0  ;;  %v2365_v43 = vpop.f32.mrb[76].mxu1 }
 0x30d   :  { %v3482_v51 = vpack.c.bf16 %v2365_v43, %v2365_v43  ;;  %v3974_v63 = vpop.f32.mrb[77].mxu1 }
 0x30e   :  { %v2368_v29 = vpop.f32.mrb[78].mxu1 }
 0x30f   :  { %3515 = vst.msk [vmem:[%s5346_s3 + $0x7] sm:$0x1] %vm3507_vm5, %v3482_v51  ;;  %v3975_v60 = vpop.f32.mrb[79].mxu1 }
 0x311   :  { %v2411_v23 = vpop.f32.mrb[80].mxu0 }
 0x312   :  { %v3483_v42 = vpack.c.bf16 %v2411_v23, %v2411_v23  ;;  %v3980_v28 = vpop.f32.mrb[81].mxu0 }
 0x313   :  { %v2414_v33 = vpop.f32.mrb[82].mxu0 }
 0x314   :  { %3516 = vst.msk [vmem:[%s5346_s3 + $0x8] sm:$0x1] %vm3507_vm5, %v3483_v42  ;;  %v3981_v32 = vpop.f32.mrb[83].mxu0  ;;  %v2457_v25 = vpop.f32.mrb[80].mxu1 }
 0x315   :  { %v3484_v41 = vpack.c.bf16 %v2457_v25, %v2457_v25  ;;  %v3986_v26 = vpop.f32.mrb[81].mxu1 }
 0x316   :  { %v2460_v57 = vpop.f32.mrb[82].mxu1 }
 0x317   :  { %3517 = vst.msk [vmem:[%s5346_s3 + $0x9] sm:$0x1] %vm3507_vm5, %v3484_v41  ;;  %v3987_v52 = vpop.f32.mrb[83].mxu1 }
 0x319   :  { %v2503_v58 = vpop.f32.mrb[84].mxu0 }
 0x31a   :  { %v3485_v46 = vpack.c.bf16 %v2503_v58, %v2503_v58  ;;  %v3992_v3 = vpop.f32.mrb[85].mxu0 }
 0x31b   :  { %v2506_v22 = vpop.f32.mrb[86].mxu0 }
 0x31c   :  { %3518 = vst.msk [vmem:[%s5346_s3 + $0xa] sm:$0x1] %vm3507_vm5, %v3485_v46  ;;  %v3993_v24 = vpop.f32.mrb[87].mxu0  ;;  %v2549_v47 = vpop.f32.mrb[84].mxu1 }
 0x31d   :  { %v3486_v7 = vpack.c.bf16 %v2549_v47, %v2549_v47  ;;  %v3998_v61 = vpop.f32.mrb[85].mxu1 }
 0x31e   :  { %v2552_v49 = vpop.f32.mrb[86].mxu1 }
 0x31f   :  { %3519 = vst.msk [vmem:[%s5346_s3 + $0xb] sm:$0x1] %vm3507_vm5, %v3486_v7  ;;  %v3999_v4 = vpop.f32.mrb[87].mxu1 }
 0x321   :  { %v2595_v59 = vpop.f32.mrb[88].mxu0 }
 0x322   :  { %v3487_v19 = vpack.c.bf16 %v2595_v59, %v2595_v59  ;;  %v4004_v45 = vpop.f32.mrb[89].mxu0 }
 0x323   :  { %v2598_v13 = vpop.f32.mrb[90].mxu0 }
 0x324   :  { %3520 = vst.msk [vmem:[%s5346_s3 + $0xc] sm:$0x1] %vm3507_vm5, %v3487_v19  ;;  %v4005_v9 = vpop.f32.mrb[91].mxu0  ;;  %v2641_v6 = vpop.f32.mrb[88].mxu1 }
 0x325   :  { %v3488_v5 = vpack.c.bf16 %v2641_v6, %v2641_v6  ;;  %v4010_v31 = vpop.f32.mrb[89].mxu1 }
 0x326   :  { %v2644_v0 = vpop.f32.mrb[90].mxu1 }
 0x327   :  { %3521 = vst.msk [vmem:[%s5346_s3 + $0xd] sm:$0x1] %vm3507_vm5, %v3488_v5  ;;  %v4011_v15 = vpop.f32.mrb[91].mxu1 }
 0x329   :  { %v2687_v21 = vpop.f32.mrb[92].mxu0 }
 0x32a   :  { %v3489_v55 = vpack.c.bf16 %v2687_v21, %v2687_v21  ;;  %v4016_v37 = vpop.f32.mrb[93].mxu0 }
 0x32b   :  { %v2690_v8 = vpop.f32.mrb[94].mxu0 }
 0x32c   :  { %3522 = vst.msk [vmem:[%s5346_s3 + $0xe] sm:$0x1] %vm3507_vm5, %v3489_v55  ;;  %v4017_v39 = vpop.f32.mrb[95].mxu0  ;;  %v2733_v12 = vpop.f32.mrb[92].mxu1 }
 0x32d   :  { %v3490_v62 = vpack.c.bf16 %v2733_v12, %v2733_v12  ;;  %v4022_v18 = vpop.f32.mrb[93].mxu1 }
 0x32e   :  { %v2736_v20 = vpop.f32.mrb[94].mxu1 }
 0x32f   :  { %3523 = vst.msk [vmem:[%s5346_s3 + $0xf] sm:$0x1] %vm3507_vm5, %v3490_v62  ;;  %v4023_v27 = vpop.f32.mrb[95].mxu1 }
 0x331   :  { %v2779_v30 = vpop.f32.mrb[96].mxu0 }
 0x332   :  { %v3491_v1 = vpack.c.bf16 %v2779_v30, %v2779_v30  ;;  %v4028_v17 = vpop.f32.mrb[97].mxu0 }
 0x333   :  { %v2782_v38 = vpop.f32.mrb[98].mxu0 }
 0x334   :  { %3524 = vst.msk [vmem:[%s5346_s3 + $0x10] sm:$0x1] %vm3507_vm5, %v3491_v1  ;;  %v4029_v2 = vpop.f32.mrb[99].mxu0  ;;  %v2825_v40 = vpop.f32.mrb[96].mxu1 }
 0x335   :  { %v3492_v16 = vpack.c.bf16 %v2825_v40, %v2825_v40  ;;  %v4034_v50 = vpop.f32.mrb[97].mxu1 }
 0x336   :  { %v2828_v10 = vpop.f32.mrb[98].mxu1 }
 0x337   :  { %3525 = vst.msk [vmem:[%s5346_s3 + $0x11] sm:$0x1] %vm3507_vm5, %v3492_v16  ;;  %v4035_v34 = vpop.f32.mrb[99].mxu1 }
 0x339   :  { %v2871_v14 = vpop.f32.mrb[100].mxu0 }
 0x33a   :  { %v3493_v48 = vpack.c.bf16 %v2871_v14, %v2871_v14  ;;  %v4040_v36 = vpop.f32.mrb[101].mxu0 }
 0x33b   :  { %v2874_v35 = vpop.f32.mrb[102].mxu0 }
 0x33c   :  { %3526 = vst.msk [vmem:[%s5346_s3 + $0x12] sm:$0x1] %vm3507_vm5, %v3493_v48  ;;  %v4041_v54 = vpop.f32.mrb[103].mxu0  ;;  %v2917_v53 = vpop.f32.mrb[100].mxu1 }
 0x33d   :  { %v3494_v56 = vpack.c.bf16 %v2917_v53, %v2917_v53  ;;  %v4046_v44 = vpop.f32.mrb[101].mxu1 }
 0x33e   :  { %v2920_v11 = vpop.f32.mrb[102].mxu1 }
 0x33f   :  { %3527 = vst.msk [vmem:[%s5346_s3 + $0x13] sm:$0x1] %vm3507_vm5, %v3494_v56  ;;  %v4047_v43 = vpop.f32.mrb[103].mxu1 }
 0x341   :  { %v2963_v51 = vpop.f32.mrb[104].mxu0 }
 0x342   :  { %v3495_v63 = vpack.c.bf16 %v2963_v51, %v2963_v51  ;;  %v4052_v29 = vpop.f32.mrb[105].mxu0 }
 0x343   :  { %v2966_v60 = vpop.f32.mrb[106].mxu0 }
 0x344   :  { %3528 = vst.msk [vmem:[%s5346_s3 + $0x14] sm:$0x1] %vm3507_vm5, %v3495_v63  ;;  %v4053_v23 = vpop.f32.mrb[107].mxu0  ;;  %v3009_v42 = vpop.f32.mrb[104].mxu1 }
 0x345   :  { %v3496_v28 = vpack.c.bf16 %v3009_v42, %v3009_v42  ;;  %v4058_v33 = vpop.f32.mrb[105].mxu1 }
 0x346   :  { %v3012_v32 = vpop.f32.mrb[106].mxu1 }
 0x347   :  { %3529 = vst.msk [vmem:[%s5346_s3 + $0x15] sm:$0x1] %vm3507_vm5, %v3496_v28  ;;  %v4059_v25 = vpop.f32.mrb[107].mxu1 }
 0x349   :  { %v3055_v41 = vpop.f32.mrb[108].mxu0 }
 0x34a   :  { %v3497_v26 = vpack.c.bf16 %v3055_v41, %v3055_v41  ;;  %v4064_v57 = vpop.f32.mrb[109].mxu0 }
 0x34b   :  { %v3058_v52 = vpop.f32.mrb[110].mxu0 }
 0x34c   :  { %3530 = vst.msk [vmem:[%s5346_s3 + $0x16] sm:$0x1] %vm3507_vm5, %v3497_v26  ;;  %v4065_v58 = vpop.f32.mrb[111].mxu0  ;;  %v3101_v46 = vpop.f32.mrb[108].mxu1 }
 0x34d   :  { %v3498_v3 = vpack.c.bf16 %v3101_v46, %v3101_v46  ;;  %v4070_v22 = vpop.f32.mrb[109].mxu1 }
 0x34e   :  { %v3104_v24 = vpop.f32.mrb[110].mxu1 }
 0x34f   :  { %3531 = vst.msk [vmem:[%s5346_s3 + $0x17] sm:$0x1] %vm3507_vm5, %v3498_v3  ;;  %v4071_v47 = vpop.f32.mrb[111].mxu1 }
 0x391   :  { %v3147_v7 = vpop.f32.mrb[112].mxu0 }
 0x392   :  { %v3499_v61 = vpack.c.bf16 %v3147_v7, %v3147_v7  ;;  %v4076_v49 = vpop.f32.mrb[113].mxu0 }
 0x393   :  { %v3150_v4 = vpop.f32.mrb[114].mxu0 }
 0x394   :  { %3532 = vst.msk [vmem:[%s5346_s3 + $0x18] sm:$0x1] %vm3507_vm5, %v3499_v61  ;;  %v4077_v59 = vpop.f32.mrb[115].mxu0 }
 0x395   :  { %v3193_v19 = vpop.f32.mrb[112].mxu1 }
 0x396   :  { %v3500_v45 = vpack.c.bf16 %v3193_v19, %v3193_v19  ;;  %v4082_v13 = vpop.f32.mrb[113].mxu1 }
 0x397   :  { %v3196_v9 = vpop.f32.mrb[114].mxu1 }
 0x398   :  { %3533 = vst.msk [vmem:[%s5346_s3 + $0x19] sm:$0x1] %vm3507_vm5, %v3500_v45  ;;  %v4083_v6 = vpop.f32.mrb[115].mxu1 }
 0x399   :  { %v3239_v5 = vpop.f32.mrb[116].mxu0 }
 0x39a   :  { %v3501_v31 = vpack.c.bf16 %v3239_v5, %v3239_v5  ;;  %v4088_v0 = vpop.f32.mrb[117].mxu0 }
 0x39b   :  { %v3242_v15 = vpop.f32.mrb[118].mxu0 }
 0x39c   :  { %3534 = vst.msk [vmem:[%s5346_s3 + $0x1a] sm:$0x1] %vm3507_vm5, %v3501_v31  ;;  %v4089_v21 = vpop.f32.mrb[119].mxu0 }
 0x39d   :  { %v3285_v55 = vpop.f32.mrb[116].mxu1 }
 0x39e   :  { %v3502_v37 = vpack.c.bf16 %v3285_v55, %v3285_v55  ;;  %v4094_v8 = vpop.f32.mrb[117].mxu1 }
 0x39f   :  { %v3288_v39 = vpop.f32.mrb[118].mxu1 }
 0x3a0   :  { %3535 = vst.msk [vmem:[%s5346_s3 + $0x1b] sm:$0x1] %vm3507_vm5, %v3502_v37  ;;  %v4095_v12 = vpop.f32.mrb[119].mxu1 }
 0x3a2   :  { %v3331_v62 = vpop.f32.mrb[120].mxu0 }
 0x3a3   :  { %v3503_v18 = vpack.c.bf16 %v3331_v62, %v3331_v62  ;;  %v4100_v20 = vpop.f32.mrb[121].mxu0 }
 0x3a4   :  { %v3334_v27 = vpop.f32.mrb[122].mxu0 }
 0x3a5   :  { %3536 = vst.msk [vmem:[%s5346_s3 + $0x1c] sm:$0x1] %vm3507_vm5, %v3503_v18  ;;  %v4101_v30 = vpop.f32.mrb[123].mxu0  ;;  %v3377_v1 = vpop.f32.mrb[120].mxu1 }
 0x3a6   :  { %v3504_v17 = vpack.c.bf16 %v3377_v1, %v3377_v1  ;;  %v4106_v38 = vpop.f32.mrb[121].mxu1 }
 0x3a7   :  { %v3380_v2 = vpop.f32.mrb[122].mxu1 }
 0x3a8   :  { %3537 = vst.msk [vmem:[%s5346_s3 + $0x1d] sm:$0x1] %vm3507_vm5, %v3504_v17  ;;  %v4107_v40 = vpop.f32.mrb[123].mxu1 }
 0x3aa   :  { %v3423_v16 = vpop.f32.mrb[124].mxu0 }
 0x3ab   :  { %v3505_v50 = vpack.c.bf16 %v3423_v16, %v3423_v16  ;;  %v4112_v10 = vpop.f32.mrb[125].mxu0 }
 0x3ac   :  { %v3426_v34 = vpop.f32.mrb[126].mxu0 }
 0x3ad   :  { %3538 = vst.msk [vmem:[%s5346_s3 + $0x1e] sm:$0x1] %vm3507_vm5, %v3505_v50  ;;  %v4113_v14 = vpop.f32.mrb[127].mxu0  ;;  %v3469_v48 = vpop.f32.mrb[124].mxu1 }
 0x3ae   :  { %v3506_v36 = vpack.c.bf16 %v3469_v48, %v3469_v48  ;;  %v4118_v35 = vpop.f32.mrb[125].mxu1 }
 0x3af   :  { %v3472_v54 = vpop.f32.mrb[126].mxu1 }
 0x3b0   :  { %3539 = vst.msk [vmem:[%s5346_s3 + $0x1f] sm:$0x1] %vm3507_vm5, %v3506_v36  ;;  %v4119_v53 = vpop.f32.mrb[127].mxu1 }

// kernel: _lambda_.35
= control target key start
LH: loop header
LB: loop body
LE: loop exit
PB: predicated region body
PF: predicated region fallthrough
CT: control target
= control target key end

     0   :  { %vm63_vm0 = vcmask 261120   ;;  %v2176_v0 = vmov 0.0   ;;  %vm2177_vm1 = vmmov 0   ;;  %vm816_vm2 = vcmask 36864   ;;  %s2881_s1 = inlined_call_operand.vmem [shape: bf16[16,5,32], index: 1, kind: input, shape index: {}]   ;;  %s2882_s0 = inlined_call_operand.vmem [shape: bf16[16,5,32], index: 0, kind: input, shape index: {}]   ;;  %s2883_s2 = inlined_call_operand.vmem [shape: bf16[16,5,32], index: 2, kind: input, shape index: {}]   ;;  %s2884_s3 = inlined_call_operand.vmem [shape: bf16[16,5,32], index: 3, kind: output, shape index: {}]  }
   0x1   :  { %1917 = vmatprep.subr.bf16.mxu0 %v2176_v0  ;;  %1923 = vmatprep.subr.bf16.mxu1 %v2176_v0  ;;  %v31_v1 = vld [vmem:[%s2881_s1] sm:$0x7]  ;;  %v32_v2 = vld [vmem:[%s2881_s1 + $0x4] sm:$0x7]  ;;  %v33_v5 = vld [vmem:[%s2881_s1 + $0x8] sm:$0x7] }
   0x2   :  { %v68_v3 = vsel %vm63_vm0, %v31_v1, 0  ;;  %v114_v4 = vsel %vm63_vm0, %v32_v2, 0  ;;  %1919 = vmatprep.mubr.msk.bf16.mxu0 %vm2177_vm1, %v2176_v0  ;;  %1925 = vmatprep.mubr.msk.bf16.mxu1 %vm2177_vm1, %v2176_v0  ;;  %v34_v6 = vld [vmem:[%s2881_s1 + $0xc] sm:$0x7]  ;;  %v15_v7 = vld [vmem:[%s2882_s0] sm:$0x7] }
   0x3   :  { %1918 = vmatpush3.bf16.xpose.msra.mxu0 %v68_v3  ;;  %1924 = vmatpush3.bf16.xpose.msra.mxu1 %v114_v4  ;;  %v16_v8 = vld [vmem:[%s2882_s0 + $0x4] sm:$0x7]  ;;  %v160_v9 = vsel %vm63_vm0, %v33_v5, 0  ;;  %v206_v10 = vsel %vm63_vm0, %v34_v6, 0  ;;  %v35_v11 = vld [vmem:[%s2881_s1 + $0x10] sm:$0x7] }
   0x4   :  { %1929 = vmatprep.subr.bf16.mxu0 %v2176_v0  ;;  %1935 = vmatprep.subr.bf16.mxu1 %v2176_v0  ;;  %v36_v12 = vld [vmem:[%s2881_s1 + $0x14] sm:$0x7]  ;;  %v17_v13 = vld [vmem:[%s2882_s0 + $0x8] sm:$0x7]  ;;  %v18_v14 = vld [vmem:[%s2882_s0 + $0xc] sm:$0x7] }
   0x5   :  { %v252_v15 = vsel %vm63_vm0, %v35_v11, 0  ;;  %v298_v16 = vsel %vm63_vm0, %v36_v12, 0  ;;  %v37_v17 = vld [vmem:[%s2881_s1 + $0x18] sm:$0x7]  ;;  %v38_v18 = vld [vmem:[%s2881_s1 + $0x1c] sm:$0x7] }
   0x6   :  { %v19_v19 = vld [vmem:[%s2882_s0 + $0x10] sm:$0x7]  ;;  %v20_v20 = vld [vmem:[%s2882_s0 + $0x14] sm:$0x7]  ;;  %v344_v21 = vsel %vm63_vm0, %v37_v17, 0  ;;  %v390_v22 = vsel %vm63_vm0, %v38_v18, 0 }
   0x7   :  { %v39_v23 = vld [vmem:[%s2881_s1 + $0x20] sm:$0x7]  ;;  %v40_v24 = vld [vmem:[%s2881_s1 + $0x24] sm:$0x7]  ;;  %v21_v25 = vld [vmem:[%s2882_s0 + $0x18] sm:$0x7] }
   0x8   :  { %v22_v26 = vld [vmem:[%s2882_s0 + $0x1c] sm:$0x7]  ;;  %v436_v27 = vsel %vm63_vm0, %v39_v23, 0  ;;  %v482_v28 = vsel %vm63_vm0, %v40_v24, 0  ;;  %v41_v29 = vld [vmem:[%s2881_s1 + $0x28] sm:$0x7] }
   0x9   :  { %v42_v30 = vld [vmem:[%s2881_s1 + $0x2c] sm:$0x7]  ;;  %v23_v31 = vld [vmem:[%s2882_s0 + $0x20] sm:$0x7]  ;;  %v24_v32 = vld [vmem:[%s2882_s0 + $0x24] sm:$0x7] }
   0xa   :  { %1920 = vmatmul.mubr.msk.bf16.vlgmr.msra.gmra.mrb[0].mxu0 %vm63_vm0, %v15_v7  ;;  %1926 = vmatmul.mubr.msk.bf16.vlgmr.msra.gmra.mrb[0].mxu1 %vm63_vm0, %v16_v8  ;;  %v528_v33 = vsel %vm63_vm0, %v41_v29, 0  ;;  %v574_v34 = vsel %vm63_vm0, %v42_v30, 0  ;;  %v43_v35 = vld [vmem:[%s2881_s1 + $0x30] sm:$0x7]  ;;  %v44_v36 = vld [vmem:[%s2881_s1 + $0x34] sm:$0x7] }
   0xb   :  { %1930 = vmatpush3.bf16.xpose.msra.mxu0 %v160_v9  ;;  %1936 = vmatpush3.bf16.xpose.msra.mxu1 %v206_v10  ;;  %v25_v37 = vld [vmem:[%s2882_s0 + $0x28] sm:$0x7]  ;;  %v26_v38 = vld [vmem:[%s2882_s0 + $0x2c] sm:$0x7]  ;;  %v620_v39 = vsel %vm63_vm0, %v43_v35, 0  ;;  %v666_v40 = vsel %vm63_vm0, %v44_v36, 0 }
   0xc   :  { %1931 = vmatprep.mubr.msk.bf16.mxu0 %vm2177_vm1, %v2176_v0  ;;  %1937 = vmatprep.mubr.msk.bf16.mxu1 %vm2177_vm1, %v2176_v0  ;;  %v45_v41 = vld [vmem:[%s2881_s1 + $0x38] sm:$0x7]  ;;  %v46_v42 = vld [vmem:[%s2881_s1 + $0x3c] sm:$0x7]  ;;  %v27_v43 = vld [vmem:[%s2882_s0 + $0x30] sm:$0x7] }
   0xd   :  { %1941 = vmatprep.subr.bf16.mxu0 %v2176_v0  ;;  %1947 = vmatprep.subr.bf16.mxu1 %v2176_v0  ;;  %v28_v44 = vld [vmem:[%s2882_s0 + $0x34] sm:$0x7]  ;;  %v712_v45 = vsel %vm63_vm0, %v45_v41, 0  ;;  %v758_v46 = vsel %vm63_vm0, %v46_v42, 0  ;;  %v29_v47 = vld [vmem:[%s2882_s0 + $0x38] sm:$0x7] }
   0xe   :  { %v30_v48 = vld [vmem:[%s2882_s0 + $0x3c] sm:$0x7]  ;;  %vm1013_vm3 = vcmask 1041408   ;;  %vm1014_vm4 = vcmask 1042432   ;;  %vm1009_vm5 = vcmask 39936   ;;  %vm1766_vm6 = vcmask 256000  }
   0xf   :  { %vm1767_vm7 = vsmask.f32 2304 }
  0x10   :  { %vm2749_vm8 = vmand %vm1766_vm6, %vm1767_vm7 }
  0x12   :  { %1932 = vmatmul.mubr.msk.bf16.vlgmr.msra.gmra.mrb[4].mxu0 %vm63_vm0, %v17_v13  ;;  %1938 = vmatmul.mubr.msk.bf16.vlgmr.msra.gmra.mrb[4].mxu1 %vm63_vm0, %v18_v14 }
  0x13   :  { %1942 = vmatpush3.bf16.xpose.msra.mxu0 %v252_v15  ;;  %1948 = vmatpush3.bf16.xpose.msra.mxu1 %v298_v16 }
  0x14   :  { %1943 = vmatprep.mubr.msk.bf16.mxu0 %vm2177_vm1, %v2176_v0  ;;  %1949 = vmatprep.mubr.msk.bf16.mxu1 %vm2177_vm1, %v2176_v0 }
  0x15   :  { %1953 = vmatprep.subr.bf16.mxu0 %v2176_v0  ;;  %1959 = vmatprep.subr.bf16.mxu1 %v2176_v0 }
  0x1a   :  { %1944 = vmatmul.mubr.msk.bf16.vlgmr.msra.gmra.mrb[8].mxu0 %vm63_vm0, %v19_v19  ;;  %1950 = vmatmul.mubr.msk.bf16.vlgmr.msra.gmra.mrb[8].mxu1 %vm63_vm0, %v20_v20 }
  0x1b   :  { %1954 = vmatpush3.bf16.xpose.msra.mxu0 %v344_v21  ;;  %1960 = vmatpush3.bf16.xpose.msra.mxu1 %v390_v22 }
  0x1c   :  { %1955 = vmatprep.mubr.msk.bf16.mxu0 %vm2177_vm1, %v2176_v0  ;;  %1961 = vmatprep.mubr.msk.bf16.mxu1 %vm2177_vm1, %v2176_v0 }
  0x1d   :  { %1965 = vmatprep.subr.bf16.mxu0 %v2176_v0  ;;  %1971 = vmatprep.subr.bf16.mxu1 %v2176_v0 }
  0x22   :  { %1956 = vmatmul.mubr.msk.bf16.vlgmr.msra.gmra.mrb[12].mxu0 %vm63_vm0, %v21_v25  ;;  %1962 = vmatmul.mubr.msk.bf16.vlgmr.msra.gmra.mrb[12].mxu1 %vm63_vm0, %v22_v26 }
  0x23   :  { %1966 = vmatpush3.bf16.xpose.msra.mxu0 %v436_v27  ;;  %1972 = vmatpush3.bf16.xpose.msra.mxu1 %v482_v28 }
  0x24   :  { %1967 = vmatprep.mubr.msk.bf16.mxu0 %vm2177_vm1, %v2176_v0  ;;  %1973 = vmatprep.mubr.msk.bf16.mxu1 %vm2177_vm1, %v2176_v0 }
  0x25   :  { %1977 = vmatprep.subr.bf16.mxu0 %v2176_v0  ;;  %1983 = vmatprep.subr.bf16.mxu1 %v2176_v0 }
  0x2a   :  { %1968 = vmatmul.mubr.msk.bf16.vlgmr.msra.gmra.mrb[16].mxu0 %vm63_vm0, %v23_v31  ;;  %1974 = vmatmul.mubr.msk.bf16.vlgmr.msra.gmra.mrb[16].mxu1 %vm63_vm0, %v24_v32 }
  0x2b   :  { %1978 = vmatpush3.bf16.xpose.msra.mxu0 %v528_v33  ;;  %1984 = vmatpush3.bf16.xpose.msra.mxu1 %v574_v34 }
  0x2c   :  { %1979 = vmatprep.mubr.msk.bf16.mxu0 %vm2177_vm1, %v2176_v0  ;;  %1985 = vmatprep.mubr.msk.bf16.mxu1 %vm2177_vm1, %v2176_v0 }
  0x2d   :  { %1989 = vmatprep.subr.bf16.mxu0 %v2176_v0  ;;  %1995 = vmatprep.subr.bf16.mxu1 %v2176_v0 }
  0x32   :  { %1980 = vmatmul.mubr.msk.bf16.vlgmr.msra.gmra.mrb[20].mxu0 %vm63_vm0, %v25_v37  ;;  %1986 = vmatmul.mubr.msk.bf16.vlgmr.msra.gmra.mrb[20].mxu1 %vm63_vm0, %v26_v38 }
  0x33   :  { %1990 = vmatpush3.bf16.xpose.msra.mxu0 %v620_v39  ;;  %1996 = vmatpush3.bf16.xpose.msra.mxu1 %v666_v40 }
  0x34   :  { %1991 = vmatprep.mubr.msk.bf16.mxu0 %vm2177_vm1, %v2176_v0  ;;  %1997 = vmatprep.mubr.msk.bf16.mxu1 %vm2177_vm1, %v2176_v0 }
  0x35   :  { %2001 = vmatprep.subr.bf16.mxu0 %v2176_v0  ;;  %2007 = vmatprep.subr.bf16.mxu1 %v2176_v0 }
  0x3a   :  { %1992 = vmatmul.mubr.msk.bf16.vlgmr.msra.gmra.mrb[24].mxu0 %vm63_vm0, %v27_v43  ;;  %1998 = vmatmul.mubr.msk.bf16.vlgmr.msra.gmra.mrb[24].mxu1 %vm63_vm0, %v28_v44 }
  0x3b   :  { %2002 = vmatpush3.bf16.xpose.msra.mxu0 %v712_v45  ;;  %2008 = vmatpush3.bf16.xpose.msra.mxu1 %v758_v46 }
  0x3c   :  { %2003 = vmatprep.mubr.msk.bf16.mxu0 %vm2177_vm1, %v2176_v0  ;;  %2009 = vmatprep.mubr.msk.bf16.mxu1 %vm2177_vm1, %v2176_v0 }
  0x3d   :  { %2013 = vmatprep.subr.bf16.mxu0 %v2176_v0  ;;  %2019 = vmatprep.subr.bf16.mxu1 %v2176_v0 }
  0x42   :  { %2004 = vmatmul.mubr.msk.bf16.vlgmr.msra.gmra.mrb[28].mxu0 %vm63_vm0, %v29_v47  ;;  %2010 = vmatmul.mubr.msk.bf16.vlgmr.msra.gmra.mrb[28].mxu1 %vm63_vm0, %v30_v48 }
  0x43   :  { %2015 = vmatprep.mubr.msk.bf16.mxu0 %vm2177_vm1, %v2176_v0  ;;  %2021 = vmatprep.mubr.msk.bf16.mxu1 %vm2177_vm1, %v2176_v0 }
  0xdd   :  { %v104_v49 = vpop.f32.mrb[0].mxu0  ;;  %v150_v50 = vpop.f32.mrb[0].mxu1 }
  0xde   :  { %v2381_v51 = vmul.f32 0.17677669, %v104_v49  ;;  %v1921_v52 = vpop.f32.mrb[1].mxu0  ;;  %v2383_v53 = vmul.f32 0.17677669, %v150_v50  ;;  %v1927_v54 = vpop.f32.mrb[1].mxu1 }
  0xdf   :  { %v107_v55 = vpop.f32.mrb[2].mxu0  ;;  %v153_v56 = vpop.f32.mrb[2].mxu1 }
  0xe0   :  { %v1922_v57 = vpop.f32.mrb[3].mxu0  ;;  %v817_v58 = vsel %vm816_vm2, %v2381_v51, -inf  ;;  %v1928_v59 = vpop.f32.mrb[3].mxu1  ;;  %v820_v60 = vsel %vm816_vm2, %v2383_v53, -inf }
  0xe1   :  { %818 = vmax.xlane.f32.xlu0 %v817_v58 }
  0xe5   :  { %821 = vmax.xlane.f32.xlu0 %v820_v60  ;;  %v196_v61 = vpop.f32.mrb[4].mxu0  ;;  %v242_v62 = vpop.f32.mrb[4].mxu1 }
  0xe6   :  { %v2389_v63 = vmul.f32 0.17677669, %v196_v61  ;;  %v1933_v1 = vpop.f32.mrb[5].mxu0  ;;  %v2391_v2 = vmul.f32 0.17677669, %v242_v62  ;;  %v1939_v3 = vpop.f32.mrb[5].mxu1 }
  0xe7   :  { %v199_v4 = vpop.f32.mrb[6].mxu0  ;;  %v245_v5 = vpop.f32.mrb[6].mxu1 }
  0xe8   :  { %v1934_v6 = vpop.f32.mrb[7].mxu0  ;;  %v823_v7 = vsel %vm816_vm2, %v2389_v63, -inf  ;;  %v1940_v8 = vpop.f32.mrb[7].mxu1  ;;  %v826_v9 = vsel %vm816_vm2, %v2391_v2, -inf }
  0xe9   :  { %824 = vmax.xlane.f32.xlu1 %v823_v7 }
  0xed   :  { %v334_v10 = vpop.f32.mrb[8].mxu1  ;;  %827 = vmax.xlane.f32.xlu1 %v826_v9  ;;  %v288_v11 = vpop.f32.mrb[8].mxu0 }
  0xee   :  { %v2397_v12 = vmul.f32 0.17677669, %v334_v10  ;;  %v2399_v13 = vmul.f32 0.17677669, %v288_v11  ;;  %v1945_v14 = vpop.f32.mrb[9].mxu0  ;;  %v1951_v15 = vpop.f32.mrb[9].mxu1 }
  0xef   :  { %v337_v16 = vpop.f32.mrb[10].mxu1  ;;  %v291_v17 = vpop.f32.mrb[10].mxu0 }
  0xf0   :  { %v832_v18 = vsel %vm816_vm2, %v2397_v12, -inf  ;;  %v829_v19 = vsel %vm816_vm2, %v2399_v13, -inf  ;;  %v1946_v20 = vpop.f32.mrb[11].mxu0  ;;  %v1952_v21 = vpop.f32.mrb[11].mxu1 }
  0xf1   :  { %833 = vmax.xlane.f32.xlu1 %v832_v18  ;;  %830 = vmax.xlane.f32.xlu0 %v829_v19 }
  0xf5   :  { %v380_v22 = vpop.f32.mrb[12].mxu0  ;;  %v426_v23 = vpop.f32.mrb[12].mxu1 }
  0xf6   :  { %v2405_v24 = vmul.f32 0.17677669, %v380_v22  ;;  %v2407_v25 = vmul.f32 0.17677669, %v426_v23  ;;  %v1957_v26 = vpop.f32.mrb[13].mxu0  ;;  %v1963_v27 = vpop.f32.mrb[13].mxu1 }
  0xf7   :  { %v429_v28 = vpop.f32.mrb[14].mxu1  ;;  %v383_v29 = vpop.f32.mrb[14].mxu0 }
  0xf8   :  { %v838_v30 = vsel %vm816_vm2, %v2407_v25, -inf  ;;  %v835_v31 = vsel %vm816_vm2, %v2405_v24, -inf  ;;  %v1958_v32 = vpop.f32.mrb[15].mxu0  ;;  %v1964_v33 = vpop.f32.mrb[15].mxu1 }
  0xf9   :  { %839 = vmax.xlane.f32.xlu1 %v838_v30  ;;  %836 = vmax.xlane.f32.xlu0 %v835_v31 }
  0xfd   :  { %v472_v34 = vpop.f32.mrb[16].mxu0  ;;  %v518_v35 = vpop.f32.mrb[16].mxu1 }
  0xfe   :  { %v2413_v36 = vmul.f32 0.17677669, %v472_v34  ;;  %v2415_v37 = vmul.f32 0.17677669, %v518_v35  ;;  %v1969_v38 = vpop.f32.mrb[17].mxu0  ;;  %v1975_v39 = vpop.f32.mrb[17].mxu1 }
  0xff   :  { %v521_v40 = vpop.f32.mrb[18].mxu1  ;;  %v475_v41 = vpop.f32.mrb[18].mxu0 }
 0x100   :  { %v844_v42 = vsel %vm816_vm2, %v2415_v37, -inf  ;;  %v841_v43 = vsel %vm816_vm2, %v2413_v36, -inf  ;;  %v1970_v44 = vpop.f32.mrb[19].mxu0  ;;  %v1976_v45 = vpop.f32.mrb[19].mxu1 }
 0x101   :  { %845 = vmax.xlane.f32.xlu1 %v844_v42  ;;  %842 = vmax.xlane.f32.xlu0 %v841_v43 }
 0x105   :  { %v564_v46 = vpop.f32.mrb[20].mxu0  ;;  %v610_v47 = vpop.f32.mrb[20].mxu1 }
 0x106   :  { %v2421_v48 = vmul.f32 0.17677669, %v564_v46  ;;  %v2423_v49 = vmul.f32 0.17677669, %v610_v47  ;;  %v1981_v50 = vpop.f32.mrb[21].mxu0  ;;  %v1987_v52 = vpop.f32.mrb[21].mxu1 }
 0x107   :  { %v613_v54 = vpop.f32.mrb[22].mxu1  ;;  %v567_v55 = vpop.f32.mrb[22].mxu0 }
 0x108   :  { %v850_v56 = vsel %vm816_vm2, %v2423_v49, -inf  ;;  %v847_v57 = vsel %vm816_vm2, %v2421_v48, -inf  ;;  %v1982_v58 = vpop.f32.mrb[23].mxu0  ;;  %v1988_v59 = vpop.f32.mrb[23].mxu1 }
 0x109   :  { %851 = vmax.xlane.f32.xlu1 %v850_v56  ;;  %848 = vmax.xlane.f32.xlu0 %v847_v57 }
 0x10d   :  { %v656_v60 = vpop.f32.mrb[24].mxu0  ;;  %v702_v61 = vpop.f32.mrb[24].mxu1 }
 0x10e   :  { %v2429_v62 = vmul.f32 0.17677669, %v656_v60  ;;  %v2431_v1 = vmul.f32 0.17677669, %v702_v61  ;;  %v1993_v3 = vpop.f32.mrb[25].mxu0  ;;  %v1999_v4 = vpop.f32.mrb[25].mxu1 }
 0x10f   :  { %v705_v5 = vpop.f32.mrb[26].mxu1  ;;  %v659_v6 = vpop.f32.mrb[26].mxu0 }
 0x110   :  { %v856_v7 = vsel %vm816_vm2, %v2431_v1, -inf  ;;  %v853_v8 = vsel %vm816_vm2, %v2429_v62, -inf  ;;  %v1994_v9 = vpop.f32.mrb[27].mxu0  ;;  %v2000_v10 = vpop.f32.mrb[27].mxu1 }
 0x111   :  { %857 = vmax.xlane.f32.xlu1 %v856_v7  ;;  %854 = vmax.xlane.f32.xlu0 %v853_v8 }
 0x115   :  { %v748_v11 = vpop.f32.mrb[28].mxu0  ;;  %v794_v14 = vpop.f32.mrb[28].mxu1 }
 0x116   :  { %v2437_v15 = vmul.f32 0.17677669, %v748_v11  ;;  %v2439_v16 = vmul.f32 0.17677669, %v794_v14  ;;  %v2005_v17 = vpop.f32.mrb[29].mxu0  ;;  %v2011_v18 = vpop.f32.mrb[29].mxu1 }
 0x117   :  { %v797_v19 = vpop.f32.mrb[30].mxu1  ;;  %v751_v20 = vpop.f32.mrb[30].mxu0 }
 0x118   :  { %v862_v21 = vsel %vm816_vm2, %v2439_v16, -inf  ;;  %v859_v22 = vsel %vm816_vm2, %v2437_v15, -inf  ;;  %v2006_v23 = vpop.f32.mrb[31].mxu0  ;;  %v2012_v26 = vpop.f32.mrb[31].mxu1  ;;  %v47_v20 = vld [vmem:[%s2883_s2] sm:$0x7] }
 0x119   :  { %863 = vmax.xlane.f32.xlu1 %v862_v21  ;;  %860 = vmax.xlane.f32.xlu0 %v859_v22 }
 0x16e   :  { %v819_v27 = vpop.xlane.xlu0 %818 }
 0x16f   :  { %v865_v28 = vsub.f32 %v2381_v51, %v819_v27 }
 0x171   :  { %v881_v29 = vmul.f32 1.442695, %v865_v28 }
 0x172   :  { %v822_v30 = vpop.xlane.xlu0 %821 }
 0x173   :  { %2112 = vpow2.f32 %v881_v29  ;;  %v866_v31 = vsub.f32 %v2383_v53, %v822_v30 }
 0x175   :  { %v883_v32 = vmul.f32 1.442695, %v866_v31 }
 0x176   :  { %v825_v33 = vpop.xlane.xlu1 %824 }
 0x177   :  { %2114 = vpow2.f32 %v883_v32  ;;  %v867_v34 = vsub.f32 %v2389_v63, %v825_v33 }
 0x179   :  { %v885_v35 = vmul.f32 1.442695, %v867_v34 }
 0x17a   :  { %v828_v38 = vpop.xlane.xlu1 %827 }
 0x17b   :  { %2116 = vpow2.f32 %v885_v35  ;;  %v868_v39 = vsub.f32 %v2391_v2, %v828_v38  ;;  %v2514_v35 = vld [vmem:[%s2883_s2 + $0x8] sm:$0x7] }
 0x17d   :  { %v2449_v40 = vpop.eup %2112  ;;  %v887_v41 = vmul.f32 1.442695, %v868_v39 }
 0x17e   :  { %v834_v42 = vpop.xlane.xlu1 %833  ;;  %v831_v51 = vpop.xlane.xlu0 %830  ;;  %v913_v43 = vsel %vm816_vm2, %v2449_v40, 0.0 }
 0x17f   :  { %2118 = vpow2.f32 %v887_v41  ;;  %v870_v53 = vsub.f32 %v2397_v12, %v834_v42  ;;  %v869_v44 = vsub.f32 %v2399_v13, %v831_v51  ;;  %914 = vadd.xlane.f32.xlu0 %v913_v43 }
 0x181   :  { %v2455_v63 = vpop.eup %2114  ;;  %v891_v45 = vmul.f32 1.442695, %v870_v53  ;;  %v889_v46 = vmul.f32 1.442695, %v869_v44 }
 0x182   :  { %v916_v2 = vsel %vm816_vm2, %v2455_v63, 0.0 }
 0x183   :  { %2120 = vpow2.f32 %v891_v45  ;;  %917 = vadd.xlane.f32.xlu1 %v916_v2 }
 0x184   :  { %2122 = vpow2.f32 %v889_v46 }
 0x185   :  { %v2459_v47 = vpop.eup %2116 }
 0x186   :  { %v840_v50 = vpop.xlane.xlu1 %839  ;;  %v837_v52 = vpop.xlane.xlu0 %836  ;;  %v919_v12 = vsel %vm816_vm2, %v2459_v47, 0.0 }
 0x187   :  { %v872_v13 = vsub.f32 %v2407_v25, %v840_v50  ;;  %v871_v54 = vsub.f32 %v2405_v24, %v837_v52  ;;  %920 = vadd.xlane.f32.xlu0 %v919_v12  ;;  %v2538_v50 = vld [vmem:[%s2883_s2 + $0x10] sm:$0x7] }
 0x189   :  { %v2465_v55 = vpop.eup %2118  ;;  %v895_v56 = vmul.f32 1.442695, %v872_v13  ;;  %v893_v57 = vmul.f32 1.442695, %v871_v54 }
 0x18a   :  { %v922_v58 = vsel %vm816_vm2, %v2465_v55, 0.0 }
 0x18b   :  { %2124 = vpow2.f32 %v895_v56  ;;  %923 = vadd.xlane.f32.xlu1 %v922_v58 }
 0x18c   :  { %2126 = vpow2.f32 %v893_v57 }
 0x18d   :  { %v2469_v59 = vpop.eup %2120 }
 0x18e   :  { %v2471_v60 = vpop.eup %2122  ;;  %v846_v61 = vpop.xlane.xlu1 %845  ;;  %v928_v24 = vsel %vm816_vm2, %v2469_v59, 0.0 }
 0x18f   :  { %v843_v3 = vpop.xlane.xlu0 %842  ;;  %v874_v25 = vsub.f32 %v2415_v37, %v846_v61  ;;  %929 = vadd.xlane.f32.xlu1 %v928_v24  ;;  %v925_v5 = vsel %vm816_vm2, %v2471_v60, 0.0  ;;  %v2560_v61 = vld [vmem:[%s2883_s2 + $0x18] sm:$0x7]  ;;  %v2567_v24 = vld [vmem:[%s2883_s2 + $0x1c] sm:$0x7] }
 0x190   :  { %v873_v4 = vsub.f32 %v2413_v36, %v843_v3  ;;  %926 = vadd.xlane.f32.xlu0 %v925_v5  ;;  %v2178_v36 = vmov 65535  }
 0x191   :  { %v899_v6 = vmul.f32 1.442695, %v874_v25  ;;  %v1015_v14 = vsel %vm1013_vm3, 4294967295, %v2178_v36 }
 0x192   :  { %v897_v7 = vmul.f32 1.442695, %v873_v4  ;;  %v2492_v21 = vsel %vm1014_vm4, %v1015_v14, 0  ;;  %v2596_v14 = vld [vmem:[%s2883_s2 + $0x28] sm:$0x7] }
 0x193   :  { %2128 = vpow2.f32 %v899_v6  ;;  %v1018_v22 = vand.u32 %v2492_v21, %v47_v20  ;;  %v1110_v38 = vand.u32 %v2492_v21, %v2514_v35  ;;  %v1202_v52 = vand.u32 %v2492_v21, %v2538_v50  ;;  %v2610_v20 = vld [vmem:[%s2883_s2 + $0x30] sm:$0x7] }
 0x194   :  { %2130 = vpow2.f32 %v897_v7  ;;  %v1294_v3 = vand.u32 %v2492_v21, %v2560_v61  ;;  %v1340_v25 = vand.u32 %v2492_v21, %v2567_v24 }
 0x195   :  { %v2479_v8 = vpop.eup %2124  ;;  %2014 = vmatpush3.bf16.msra.mxu0 %v1018_v22  ;;  %v1570_v22 = vand.u32 %v2492_v21, %v2610_v20 }
 0x196   :  { %v2481_v9 = vpop.eup %2126  ;;  %v852_v10 = vpop.xlane.xlu1 %851  ;;  %v934_v37 = vsel %vm816_vm2, %v2479_v8, 0.0  ;;  %2025 = vmatprep.subr.bf16.mxu0 %v2176_v0 }
 0x197   :  { %v849_v11 = vpop.xlane.xlu0 %848  ;;  %v876_v17 = vsub.f32 %v2423_v49, %v852_v10  ;;  %935 = vadd.xlane.f32.xlu1 %v934_v37  ;;  %v931_v19 = vsel %vm816_vm2, %v2481_v9, 0.0  ;;  %v2582_v10 = vld [vmem:[%s2883_s2 + $0x20] sm:$0x7]  ;;  %v2589_v37 = vld [vmem:[%s2883_s2 + $0x24] sm:$0x7] }
 0x198   :  { %v875_v18 = vsub.f32 %v2421_v48, %v849_v11  ;;  %932 = vadd.xlane.f32.xlu0 %v931_v19  ;;  %v48_v48 = vld [vmem:[%s2883_s2 + $0x4] sm:$0x7]  ;;  %v1386_v11 = vand.u32 %v2492_v21, %v2582_v10  ;;  %v1432_v36 = vand.u32 %v2492_v21, %v2589_v37 }
 0x199   :  { %v903_v23 = vmul.f32 1.442695, %v876_v17  ;;  %v1064_v49 = vand.u32 %v2492_v21, %v48_v48  ;;  %v1478_v17 = vand.u32 %v2492_v21, %v2596_v14  ;;  %v2624_v48 = vld [vmem:[%s2883_s2 + $0x38] sm:$0x7] }
 0x19a   :  { %v901_v26 = vmul.f32 1.442695, %v875_v18  ;;  %v2603_v18 = vld [vmem:[%s2883_s2 + $0x2c] sm:$0x7] }
 0x19b   :  { %2132 = vpow2.f32 %v903_v23  ;;  %2020 = vmatpush3.bf16.msra.mxu1 %v1064_v49  ;;  %v1524_v19 = vand.u32 %v2492_v21, %v2603_v18  ;;  %v2617_v23 = vld [vmem:[%s2883_s2 + $0x34] sm:$0x7]  ;;  %v1662_v49 = vand.u32 %v2492_v21, %v2624_v48 }
 0x19c   :  { %2134 = vpow2.f32 %v901_v26  ;;  %2031 = vmatprep.subr.bf16.mxu1 %v2176_v0  ;;  %v1616_v26 = vand.u32 %v2492_v21, %v2617_v23 }
 0x19d   :  { %v2500_v27 = vpop.eup %2128 }
 0x19e   :  { %v2502_v28 = vpop.eup %2130  ;;  %v858_v29 = vpop.xlane.xlu1 %857  ;;  %v940_v31 = vsel %vm816_vm2, %v2500_v27, 0.0 }
 0x19f   :  { %v855_v30 = vpop.xlane.xlu0 %854  ;;  %v878_v32 = vsub.f32 %v2431_v1, %v858_v29  ;;  %941 = vadd.xlane.f32.xlu1 %v940_v31  ;;  %v937_v34 = vsel %vm816_vm2, %v2502_v28, 0.0  ;;  %v2631_v29 = vld [vmem:[%s2883_s2 + $0x3c] sm:$0x7] }
 0x1a0   :  { %v877_v33 = vsub.f32 %v2429_v62, %v855_v30  ;;  %938 = vadd.xlane.f32.xlu0 %v937_v34  ;;  %v2521_v62 = vld [vmem:[%s2883_s2 + $0xc] sm:$0x7]  ;;  %v1708_v30 = vand.u32 %v2492_v21, %v2631_v29 }
 0x1a1   :  { %v907_v39 = vmul.f32 1.442695, %v878_v32  ;;  %v1156_v1 = vand.u32 %v2492_v21, %v2521_v62 }
 0x1a2   :  { %v905_v41 = vmul.f32 1.442695, %v877_v33 }
 0x1a3   :  { %2136 = vpow2.f32 %v907_v39 }
 0x1a4   :  { %2138 = vpow2.f32 %v905_v41 }
 0x1a5   :  { %v2525_v42 = vpop.eup %2132 }
 0x1a6   :  { %v2527_v51 = vpop.eup %2134  ;;  %v864_v43 = vpop.xlane.xlu1 %863  ;;  %v946_v44 = vsel %vm816_vm2, %v2525_v42, 0.0 }
 0x1a7   :  { %v861_v53 = vpop.xlane.xlu0 %860  ;;  %v880_v45 = vsub.f32 %v2439_v16, %v864_v43  ;;  %947 = vadd.xlane.f32.xlu1 %v946_v44  ;;  %v943_v2 = vsel %vm816_vm2, %v2527_v51, 0.0 }
 0x1a8   :  { %v879_v46 = vsub.f32 %v2437_v15, %v861_v53  ;;  %944 = vadd.xlane.f32.xlu0 %v943_v2  ;;  %v2545_v15 = vld [vmem:[%s2883_s2 + $0x14] sm:$0x7] }
 0x1a9   :  { %v911_v12 = vmul.f32 1.442695, %v880_v45  ;;  %v1248_v16 = vand.u32 %v2492_v21, %v2545_v15  ;;  %v1769_v21 = vld [vmem:[%s2884_s3] sm:$0x7] }
 0x1aa   :  { %v909_v13 = vmul.f32 1.442695, %v879_v46 }
 0x1ab   :  { %2140 = vpow2.f32 %v911_v12 }
 0x1ac   :  { %2142 = vpow2.f32 %v909_v13 }
 0x1ad   :  { %v2549_v54 = vpop.eup %2136 }
 0x1ae   :  { %v2551_v56 = vpop.eup %2138  ;;  %v952_v57 = vsel %vm816_vm2, %v2549_v54, 0.0 }
 0x1af   :  { %953 = vadd.xlane.f32.xlu1 %v952_v57  ;;  %v949_v58 = vsel %vm816_vm2, %v2551_v56, 0.0 }
 0x1b0   :  { %950 = vadd.xlane.f32.xlu0 %v949_v58 }
 0x1b5   :  { %v2571_v4 = vpop.eup %2140 }
 0x1b6   :  { %v2573_v5 = vpop.eup %2142  ;;  %v958_v6 = vsel %vm816_vm2, %v2571_v4, 0.0 }
 0x1b7   :  { %959 = vadd.xlane.f32.xlu1 %v958_v6  ;;  %v955_v7 = vsel %vm816_vm2, %v2573_v5, 0.0 }
 0x1b8   :  { %956 = vadd.xlane.f32.xlu0 %v955_v7 }
 0x20c   :  { %v915_v31 = vpop.xlane.xlu0 %914 }
 0x20d   :  { %2144 = vrcp.f32 %v915_v31 }
 0x210   :  { %v918_v32 = vpop.xlane.xlu1 %917 }
 0x211   :  { %2146 = vrcp.f32 %v918_v32 }
 0x214   :  { %v921_v33 = vpop.xlane.xlu0 %920 }
 0x215   :  { %2148 = vrcp.f32 %v921_v33 }
 0x217   :  { %v2145_v34 = vpop.eup %2144 }
 0x218   :  { %v977_v39 = vmul.f32 %v2145_v34, %v2449_v40  ;;  %v924_v41 = vpop.xlane.xlu1 %923 }
 0x219   :  { %2150 = vrcp.f32 %v924_v41 }
 0x21a   :  { %v993_v43 = vpack.c.bf16 %v977_v39, %v977_v39 }
 0x21b   :  { %v2147_v53 = vpop.eup %2146 }
 0x21c   :  { %v978_v44 = vmul.f32 %v2147_v53, %v2455_v63  ;;  %v930_v45 = vpop.xlane.xlu1 %929  ;;  %2016 = vmatmul.mubr.msk.bf16.vlgmr.msra.gmra.mrb[32].mxu0 %vm1009_vm5, %v993_v43 }
 0x21d   :  { %2152 = vrcp.f32 %v930_v45  ;;  %v927_v46 = vpop.xlane.xlu0 %926  ;;  %2026 = vmatpush3.bf16.msra.mxu0 %v1110_v38  ;;  %2027 = vmatprep.mubr.msk.bf16.mxu0 %vm2177_vm1, %v2176_v0  ;;  %v1772_v45 = vld [vmem:[%s2884_s3 + $0x4] sm:$0x7] }
 0x21e   :  { %2154 = vrcp.f32 %v927_v46  ;;  %v994_v40 = vpack.c.bf16 %v978_v44, %v978_v44  ;;  %2037 = vmatprep.subr.bf16.mxu0 %v2176_v0 }
 0x21f   :  { %v2149_v2 = vpop.eup %2148 }
 0x220   :  { %v979_v12 = vmul.f32 %v2149_v2, %v2459_v47  ;;  %2022 = vmatmul.mubr.msk.bf16.vlgmr.msra.gmra.mrb[32].mxu1 %vm1009_vm5, %v994_v40 }
 0x221   :  { %2032 = vmatpush3.bf16.msra.mxu1 %v1156_v1  ;;  %2033 = vmatprep.mubr.msk.bf16.mxu1 %vm2177_vm1, %v2176_v0 }
 0x222   :  { %v995_v63 = vpack.c.bf16 %v979_v12, %v979_v12  ;;  %2043 = vmatprep.subr.bf16.mxu1 %v2176_v0 }
 0x223   :  { %v2151_v35 = vpop.eup %2150 }
 0x224   :  { %v980_v38 = vmul.f32 %v2151_v35, %v2465_v55  ;;  %v936_v13 = vpop.xlane.xlu1 %935  ;;  %2028 = vmatmul.mubr.msk.bf16.vlgmr.msra.gmra.mrb[36].mxu0 %vm1009_vm5, %v995_v63 }
 0x225   :  { %2156 = vrcp.f32 %v936_v13  ;;  %v933_v47 = vpop.xlane.xlu0 %932  ;;  %2038 = vmatpush3.bf16.msra.mxu0 %v1202_v52  ;;  %2039 = vmatprep.mubr.msk.bf16.mxu0 %vm2177_vm1, %v2176_v0 }
 0x226   :  { %2158 = vrcp.f32 %v933_v47  ;;  %v996_v62 = vpack.c.bf16 %v980_v38, %v980_v38  ;;  %2049 = vmatprep.subr.bf16.mxu0 %v2176_v0  ;;  %v1775_v38 = vld [vmem:[%s2884_s3 + $0x8] sm:$0x7] }
 0x227   :  { %v2153_v1 = vpop.eup %2152 }
 0x228   :  { %v2155_v57 = vpop.eup %2154  ;;  %2034 = vmatmul.mubr.msk.bf16.vlgmr.msra.gmra.mrb[36].mxu1 %vm1009_vm5, %v996_v62  ;;  %v982_v50 = vmul.f32 %v2153_v1, %v2469_v59 }
 0x229   :  { %v981_v55 = vmul.f32 %v2155_v57, %v2471_v60  ;;  %2044 = vmatpush3.bf16.msra.mxu1 %v1248_v16  ;;  %2045 = vmatprep.mubr.msk.bf16.mxu1 %vm2177_vm1, %v2176_v0 }
 0x22a   :  { %2055 = vmatprep.subr.bf16.mxu1 %v2176_v0  ;;  %v998_v7 = vpack.c.bf16 %v982_v50, %v982_v50  ;;  %v1778_v50 = vld [vmem:[%s2884_s3 + $0xc] sm:$0x7] }
 0x22b   :  { %v997_v52 = vpack.c.bf16 %v981_v55, %v981_v55 }
 0x22c   :  { %v942_v58 = vpop.xlane.xlu1 %941 }
 0x22d   :  { %2160 = vrcp.f32 %v942_v58  ;;  %2040 = vmatmul.mubr.msk.bf16.vlgmr.msra.gmra.mrb[40].mxu0 %vm1009_vm5, %v997_v52  ;;  %v939_v6 = vpop.xlane.xlu0 %938 }
 0x22e   :  { %2162 = vrcp.f32 %v939_v6  ;;  %2050 = vmatpush3.bf16.msra.mxu0 %v1294_v3  ;;  %2051 = vmatprep.mubr.msk.bf16.mxu0 %vm2177_vm1, %v2176_v0 }
 0x22f   :  { %v2157_v60 = vpop.eup %2156  ;;  %2061 = vmatprep.subr.bf16.mxu0 %v2176_v0 }
 0x230   :  { %v2159_v59 = vpop.eup %2158  ;;  %2046 = vmatmul.mubr.msk.bf16.vlgmr.msra.gmra.mrb[40].mxu1 %vm1009_vm5, %v998_v7  ;;  %v984_v16 = vmul.f32 %v2157_v60, %v2479_v8 }
 0x231   :  { %v983_v15 = vmul.f32 %v2159_v59, %v2481_v9  ;;  %2056 = vmatpush3.bf16.msra.mxu1 %v1340_v25  ;;  %2057 = vmatprep.mubr.msk.bf16.mxu1 %vm2177_vm1, %v2176_v0 }
 0x232   :  { %2067 = vmatprep.subr.bf16.mxu1 %v2176_v0  ;;  %v1000_v32 = vpack.c.bf16 %v984_v16, %v984_v16 }
 0x233   :  { %v999_v61 = vpack.c.bf16 %v983_v15, %v983_v15  ;;  %v1781_v15 = vld [vmem:[%s2884_s3 + $0x10] sm:$0x7] }
 0x234   :  { %v948_v3 = vpop.xlane.xlu1 %947 }
 0x235   :  { %2164 = vrcp.f32 %v948_v3  ;;  %2052 = vmatmul.mubr.msk.bf16.vlgmr.msra.gmra.mrb[44].mxu0 %vm1009_vm5, %v999_v61  ;;  %v945_v31 = vpop.xlane.xlu0 %944 }
 0x236   :  { %2166 = vrcp.f32 %v945_v31  ;;  %2062 = vmatpush3.bf16.msra.mxu0 %v1386_v11  ;;  %2063 = vmatprep.mubr.msk.bf16.mxu0 %vm2177_vm1, %v2176_v0 }
 0x237   :  { %v2161_v9 = vpop.eup %2160  ;;  %2073 = vmatprep.subr.bf16.mxu0 %v2176_v0 }
 0x238   :  { %v2163_v8 = vpop.eup %2162  ;;  %2058 = vmatmul.mubr.msk.bf16.vlgmr.msra.gmra.mrb[44].mxu1 %vm1009_vm5, %v1000_v32  ;;  %v986_v25 = vmul.f32 %v2161_v9, %v2500_v27 }
 0x239   :  { %v985_v24 = vmul.f32 %v2163_v8, %v2502_v28  ;;  %2068 = vmatpush3.bf16.msra.mxu1 %v1432_v36  ;;  %2069 = vmatprep.mubr.msk.bf16.mxu1 %vm2177_vm1, %v2176_v0  ;;  %v1784_v8 = vld [vmem:[%s2884_s3 + $0x14] sm:$0x7] }
 0x23a   :  { %2079 = vmatprep.subr.bf16.mxu1 %v2176_v0  ;;  %v1002_v34 = vpack.c.bf16 %v986_v25, %v986_v25 }
 0x23b   :  { %v1001_v10 = vpack.c.bf16 %v985_v24, %v985_v24 }
 0x23c   :  { %v954_v11 = vpop.xlane.xlu1 %953 }
 0x23d   :  { %2168 = vrcp.f32 %v954_v11  ;;  %2064 = vmatmul.mubr.msk.bf16.vlgmr.msra.gmra.mrb[48].mxu0 %vm1009_vm5, %v1001_v10  ;;  %v951_v33 = vpop.xlane.xlu0 %950 }
 0x23e   :  { %2170 = vrcp.f32 %v951_v33  ;;  %2074 = vmatpush3.bf16.msra.mxu0 %v1478_v17  ;;  %2075 = vmatprep.mubr.msk.bf16.mxu0 %vm2177_vm1, %v2176_v0 }
 0x23f   :  { %v2165_v28 = vpop.eup %2164  ;;  %2085 = vmatprep.subr.bf16.mxu0 %v2176_v0 }
 0x240   :  { %v2167_v27 = vpop.eup %2166  ;;  %2070 = vmatmul.mubr.msk.bf16.vlgmr.msra.gmra.mrb[48].mxu1 %vm1009_vm5, %v1002_v34  ;;  %v988_v36 = vmul.f32 %v2165_v28, %v2525_v42  ;;  %v1787_v28 = vld [vmem:[%s2884_s3 + $0x18] sm:$0x7] }
 0x241   :  { %v987_v37 = vmul.f32 %v2167_v27, %v2527_v51  ;;  %2080 = vmatpush3.bf16.msra.mxu1 %v1524_v19  ;;  %2081 = vmatprep.mubr.msk.bf16.mxu1 %vm2177_vm1, %v2176_v0 }
 0x242   :  { %2091 = vmatprep.subr.bf16.mxu1 %v2176_v0  ;;  %v1004_v41 = vpack.c.bf16 %v988_v36, %v988_v36 }
 0x243   :  { %v1003_v14 = vpack.c.bf16 %v987_v37, %v987_v37 }
 0x244   :  { %v960_v17 = vpop.xlane.xlu1 %959 }
 0x245   :  { %2172 = vrcp.f32 %v960_v17  ;;  %2076 = vmatmul.mubr.msk.bf16.vlgmr.msra.gmra.mrb[52].mxu0 %vm1009_vm5, %v1003_v14  ;;  %v957_v39 = vpop.xlane.xlu0 %956 }
 0x246   :  { %2174 = vrcp.f32 %v957_v39  ;;  %2086 = vmatpush3.bf16.msra.mxu0 %v1570_v22  ;;  %2087 = vmatprep.mubr.msk.bf16.mxu0 %vm2177_vm1, %v2176_v0 }
 0x247   :  { %v2169_v51 = vpop.eup %2168  ;;  %2097 = vmatprep.subr.bf16.mxu0 %v2176_v0 }
 0x248   :  { %v2171_v42 = vpop.eup %2170  ;;  %2082 = vmatmul.mubr.msk.bf16.vlgmr.msra.gmra.mrb[52].mxu1 %vm1009_vm5, %v1004_v41  ;;  %v990_v19 = vmul.f32 %v2169_v51, %v2549_v54  ;;  %v1790_v41 = vld [vmem:[%s2884_s3 + $0x1c] sm:$0x7] }
 0x249   :  { %v989_v18 = vmul.f32 %v2171_v42, %v2551_v56  ;;  %2092 = vmatpush3.bf16.msra.mxu1 %v1616_v26  ;;  %2093 = vmatprep.mubr.msk.bf16.mxu1 %vm2177_vm1, %v2176_v0 }
 0x24a   :  { %2103 = vmatprep.subr.bf16.mxu1 %v2176_v0  ;;  %v1006_v22 = vpack.c.bf16 %v990_v19, %v990_v19 }
 0x24b   :  { %v1005_v20 = vpack.c.bf16 %v989_v18, %v989_v18 }
 0x24d   :  { %2088 = vmatmul.mubr.msk.bf16.vlgmr.msra.gmra.mrb[56].mxu0 %vm1009_vm5, %v1005_v20 }
 0x24e   :  { %2098 = vmatpush3.bf16.msra.mxu0 %v1662_v49  ;;  %2099 = vmatprep.mubr.msk.bf16.mxu0 %vm2177_vm1, %v2176_v0 }
 0x24f   :  { %v2173_v56 = vpop.eup %2172 }
 0x250   :  { %v2175_v23 = vpop.eup %2174  ;;  %2094 = vmatmul.mubr.msk.bf16.vlgmr.msra.gmra.mrb[56].mxu1 %vm1009_vm5, %v1006_v22  ;;  %v992_v54 = vmul.f32 %v2173_v56, %v2571_v4  ;;  %v1793_v56 = vld [vmem:[%s2884_s3 + $0x20] sm:$0x7] }
 0x251   :  { %v991_v26 = vmul.f32 %v2175_v23, %v2573_v5  ;;  %2104 = vmatpush3.bf16.msra.mxu1 %v1708_v30  ;;  %2105 = vmatprep.mubr.msk.bf16.mxu1 %vm2177_vm1, %v2176_v0 }
 0x252   :  { %v1008_v49 = vpack.c.bf16 %v992_v54, %v992_v54 }
 0x253   :  { %v1007_v48 = vpack.c.bf16 %v991_v26, %v991_v26 }
 0x255   :  { %2100 = vmatmul.mubr.msk.bf16.vlgmr.msra.gmra.mrb[60].mxu0 %vm1009_vm5, %v1007_v48 }
 0x258   :  { %2106 = vmatmul.mubr.msk.bf16.vlgmr.msra.gmra.mrb[60].mxu1 %vm1009_vm5, %v1008_v49 }
 0x2ef   :  { %v1054_v43 = vpop.f32.mrb[32].mxu0 }
 0x2f0   :  { %v1750_v0 = vpack.c.bf16 %v1054_v43, %v1054_v43  ;;  %v2017_v29 = vpop.f32.mrb[33].mxu0 }
 0x2f1   :  { %v1057_v4 = vpop.f32.mrb[34].mxu0 }
 0x2f2   :  { %v1770_v30 = vsel %vm2749_vm8, %v1750_v0, %v1769_v21  ;;  %v2018_v53 = vpop.f32.mrb[35].mxu0  ;;  %v1796_v21 = vld [vmem:[%s2884_s3 + $0x24] sm:$0x7] }
 0x2f3   :  { %1771 = vst [vmem:[%s2884_s3] sm:$0x7] %v1770_v30  ;;  %v1100_v44 = vpop.f32.mrb[32].mxu1 }
 0x2f4   :  { %v1751_v46 = vpack.c.bf16 %v1100_v44, %v1100_v44  ;;  %v2023_v40 = vpop.f32.mrb[33].mxu1 }
 0x2f5   :  { %v1103_v2 = vpop.f32.mrb[34].mxu1 }
 0x2f6   :  { %v1773_v12 = vsel %vm2749_vm8, %v1751_v46, %v1772_v45  ;;  %v2024_v63 = vpop.f32.mrb[35].mxu1  ;;  %v1799_v45 = vld [vmem:[%s2884_s3 + $0x28] sm:$0x7] }
 0x2f7   :  { %1774 = vst [vmem:[%s2884_s3 + $0x4] sm:$0x7] %v1773_v12  ;;  %v1146_v35 = vpop.f32.mrb[36].mxu0 }
 0x2f8   :  { %v1752_v13 = vpack.c.bf16 %v1146_v35, %v1146_v35  ;;  %v2029_v47 = vpop.f32.mrb[37].mxu0 }
 0x2f9   :  { %v1149_v62 = vpop.f32.mrb[38].mxu0 }
 0x2fa   :  { %v1776_v1 = vsel %vm2749_vm8, %v1752_v13, %v1775_v38  ;;  %v2030_v57 = vpop.f32.mrb[39].mxu0  ;;  %v1802_v38 = vld [vmem:[%s2884_s3 + $0x2c] sm:$0x7] }
 0x2fb   :  { %1777 = vst [vmem:[%s2884_s3 + $0x8] sm:$0x7] %v1776_v1  ;;  %v1192_v55 = vpop.f32.mrb[36].mxu1 }
 0x2fc   :  { %v1753_v52 = vpack.c.bf16 %v1192_v55, %v1192_v55  ;;  %v2035_v58 = vpop.f32.mrb[37].mxu1 }
 0x2fd   :  { %v1195_v6 = vpop.f32.mrb[38].mxu1 }
 0x2fe   :  { %v1779_v7 = vsel %vm2749_vm8, %v1753_v52, %v1778_v50  ;;  %v2036_v60 = vpop.f32.mrb[39].mxu1  ;;  %v1805_v50 = vld [vmem:[%s2884_s3 + $0x30] sm:$0x7] }
 0x2ff   :  { %1780 = vst [vmem:[%s2884_s3 + $0xc] sm:$0x7] %v1779_v7 }
 0x300   :  { %v1238_v59 = vpop.f32.mrb[40].mxu0 }
 0x301   :  { %v1754_v16 = vpack.c.bf16 %v1238_v59, %v1238_v59  ;;  %v2041_v61 = vpop.f32.mrb[41].mxu0 }
 0x302   :  { %v1241_v3 = vpop.f32.mrb[42].mxu0 }
 0x303   :  { %v1782_v31 = vsel %vm2749_vm8, %v1754_v16, %v1781_v15  ;;  %v2042_v32 = vpop.f32.mrb[43].mxu0  ;;  %v1284_v9 = vpop.f32.mrb[40].mxu1  ;;  %v1808_v15 = vld [vmem:[%s2884_s3 + $0x34] sm:$0x7] }
 0x304   :  { %1783 = vst [vmem:[%s2884_s3 + $0x10] sm:$0x7] %v1782_v31  ;;  %v1755_v24 = vpack.c.bf16 %v1284_v9, %v1284_v9  ;;  %v2047_v25 = vpop.f32.mrb[41].mxu1 }
 0x305   :  { %v1287_v10 = vpop.f32.mrb[42].mxu1 }
 0x306   :  { %v1785_v11 = vsel %vm2749_vm8, %v1755_v24, %v1784_v8  ;;  %v2048_v33 = vpop.f32.mrb[43].mxu1  ;;  %v1811_v8 = vld [vmem:[%s2884_s3 + $0x38] sm:$0x7] }
 0x307   :  { %1786 = vst [vmem:[%s2884_s3 + $0x14] sm:$0x7] %v1785_v11 }
 0x308   :  { %v1330_v34 = vpop.f32.mrb[44].mxu0 }
 0x309   :  { %v1756_v27 = vpack.c.bf16 %v1330_v34, %v1330_v34  ;;  %v2053_v37 = vpop.f32.mrb[45].mxu0 }
 0x30a   :  { %v1333_v36 = vpop.f32.mrb[46].mxu0 }
 0x30b   :  { %v1788_v14 = vsel %vm2749_vm8, %v1756_v27, %v1787_v28  ;;  %v2054_v17 = vpop.f32.mrb[47].mxu0  ;;  %v1376_v39 = vpop.f32.mrb[44].mxu1  ;;  %v1814_v28 = vld [vmem:[%s2884_s3 + $0x3c] sm:$0x7] }
 0x30c   :  { %1789 = vst [vmem:[%s2884_s3 + $0x18] sm:$0x7] %v1788_v14  ;;  %v1757_v51 = vpack.c.bf16 %v1376_v39, %v1376_v39  ;;  %v2059_v42 = vpop.f32.mrb[45].mxu1 }
 0x30d   :  { %v1379_v18 = vpop.f32.mrb[46].mxu1 }
 0x30e   :  { %v1791_v19 = vsel %vm2749_vm8, %v1757_v51, %v1790_v41  ;;  %v2060_v20 = vpop.f32.mrb[47].mxu1 }
 0x30f   :  { %1792 = vst [vmem:[%s2884_s3 + $0x1c] sm:$0x7] %v1791_v19 }
 0x310   :  { %v1422_v22 = vpop.f32.mrb[48].mxu0 }
 0x311   :  { %v1758_v23 = vpack.c.bf16 %v1422_v22, %v1422_v22  ;;  %v2065_v26 = vpop.f32.mrb[49].mxu0 }
 0x312   :  { %v1425_v54 = vpop.f32.mrb[50].mxu0 }
 0x313   :  { %v1794_v48 = vsel %vm2749_vm8, %v1758_v23, %v1793_v56  ;;  %v2066_v49 = vpop.f32.mrb[51].mxu0  ;;  %v1468_v43 = vpop.f32.mrb[48].mxu1 }
 0x314   :  { %1795 = vst [vmem:[%s2884_s3 + $0x20] sm:$0x7] %v1794_v48  ;;  %v1759_v0 = vpack.c.bf16 %v1468_v43, %v1468_v43  ;;  %v2071_v29 = vpop.f32.mrb[49].mxu1 }
 0x315   :  { %v1471_v4 = vpop.f32.mrb[50].mxu1 }
 0x316   :  { %v1797_v30 = vsel %vm2749_vm8, %v1759_v0, %v1796_v21  ;;  %v2072_v53 = vpop.f32.mrb[51].mxu1 }
 0x317   :  { %1798 = vst [vmem:[%s2884_s3 + $0x24] sm:$0x7] %v1797_v30 }
 0x318   :  { %v1514_v44 = vpop.f32.mrb[52].mxu0 }
 0x319   :  { %v1760_v46 = vpack.c.bf16 %v1514_v44, %v1514_v44  ;;  %v2077_v40 = vpop.f32.mrb[53].mxu0 }
 0x31a   :  { %v1517_v2 = vpop.f32.mrb[54].mxu0 }
 0x31b   :  { %v1800_v12 = vsel %vm2749_vm8, %v1760_v46, %v1799_v45  ;;  %v2078_v63 = vpop.f32.mrb[55].mxu0  ;;  %v1560_v35 = vpop.f32.mrb[52].mxu1 }
 0x31c   :  { %1801 = vst [vmem:[%s2884_s3 + $0x28] sm:$0x7] %v1800_v12  ;;  %v1761_v13 = vpack.c.bf16 %v1560_v35, %v1560_v35  ;;  %v2083_v47 = vpop.f32.mrb[53].mxu1 }
 0x31d   :  { %v1563_v62 = vpop.f32.mrb[54].mxu1 }
 0x31e   :  { %v1803_v1 = vsel %vm2749_vm8, %v1761_v13, %v1802_v38  ;;  %v2084_v57 = vpop.f32.mrb[55].mxu1 }
 0x31f   :  { %1804 = vst [vmem:[%s2884_s3 + $0x2c] sm:$0x7] %v1803_v1 }
 0x320   :  { %v1606_v55 = vpop.f32.mrb[56].mxu0 }
 0x321   :  { %v1762_v52 = vpack.c.bf16 %v1606_v55, %v1606_v55  ;;  %v2089_v58 = vpop.f32.mrb[57].mxu0 }
 0x322   :  { %v1609_v6 = vpop.f32.mrb[58].mxu0 }
 0x323   :  { %v1806_v7 = vsel %vm2749_vm8, %v1762_v52, %v1805_v50  ;;  %v2090_v60 = vpop.f32.mrb[59].mxu0  ;;  %v1652_v59 = vpop.f32.mrb[56].mxu1 }
 0x324   :  { %1807 = vst [vmem:[%s2884_s3 + $0x30] sm:$0x7] %v1806_v7  ;;  %v1763_v16 = vpack.c.bf16 %v1652_v59, %v1652_v59  ;;  %v2095_v61 = vpop.f32.mrb[57].mxu1 }
 0x325   :  { %v1655_v3 = vpop.f32.mrb[58].mxu1 }
 0x326   :  { %v1809_v31 = vsel %vm2749_vm8, %v1763_v16, %v1808_v15  ;;  %v2096_v32 = vpop.f32.mrb[59].mxu1 }
 0x327   :  { %1810 = vst [vmem:[%s2884_s3 + $0x34] sm:$0x7] %v1809_v31 }
 0x328   :  { %v1698_v9 = vpop.f32.mrb[60].mxu0 }
 0x329   :  { %v1764_v24 = vpack.c.bf16 %v1698_v9, %v1698_v9  ;;  %v2101_v25 = vpop.f32.mrb[61].mxu0 }
 0x32a   :  { %v1701_v10 = vpop.f32.mrb[62].mxu0 }
 0x32b   :  { %v1812_v11 = vsel %vm2749_vm8, %v1764_v24, %v1811_v8  ;;  %v2102_v33 = vpop.f32.mrb[63].mxu0  ;;  %v1744_v34 = vpop.f32.mrb[60].mxu1 }
 0x32c   :  { %1813 = vst [vmem:[%s2884_s3 + $0x38] sm:$0x7] %v1812_v11  ;;  %v1765_v27 = vpack.c.bf16 %v1744_v34, %v1744_v34  ;;  %v2107_v37 = vpop.f32.mrb[61].mxu1 }
 0x32d   :  { %v1747_v36 = vpop.f32.mrb[62].mxu1 }
 0x32e   :  { %v1815_v14 = vsel %vm2749_vm8, %v1765_v27, %v1814_v28  ;;  %v2108_v17 = vpop.f32.mrb[63].mxu1 }
 0x32f   :  { %1816 = vst [vmem:[%s2884_s3 + $0x3c] sm:$0x7] %v1815_v14 }

// kernel: _lambda_.37
= control target key start
LH: loop header
LB: loop body
LE: loop exit
PB: predicated region body
PF: predicated region fallthrough
CT: control target
= control target key end

     0   :  { %vm36_vm0 = vcmask 1041408   ;;  %v1124_v43 = vmov 0   ;;  %s1523_s0 = inlined_call_operand.vmem [shape: f32[18,128], index: 0, kind: input, shape index: {}]   ;;  %s1524_s3 = inlined_call_operand.vmem [shape: bf16[128,512], index: 3, kind: input, shape index: {}]   ;;  %s1525_s1 = inlined_call_operand.vmem [shape: f32[1,128], index: 1, kind: input, shape index: {}]   ;;  %s1526_s2 = inlined_call_operand.vmem [shape: f32[1,128], index: 2, kind: input, shape index: {}, may-alias: {2,6}]   ;;  %s1527_s5 = inlined_call_operand.vmem [shape: bf16[512,128], index: 5, kind: input, shape index: {}]   ;;  %s1528_s4 = inlined_call_operand.vmem [shape: f32[1,512], index: 4, kind: input, shape index: {}]   ;;  %s1529_s6 = inlined_call_operand.vmem [shape: f32[1,128], index: 6, kind: input, shape index: {}, may-alias: {2,6}]   ;;  %s1530_s7 = inlined_call_operand.vmem [shape: f32[18,128], index: 7, kind: output, shape index: {}]  }
   0x1   :  { %v1168_v0 = vld [vmem:[%s1523_s0] sm:$0xff]  ;;  %v1173_v1 = vld [vmem:[%s1523_s0 + $0x10] sm:$0x3]  ;;  %v1181_v3 = vld [vmem:[%s1523_s0 + $0x8] sm:$0xff]  ;;  %335 = vmatprep.mubr.bf16.mxu0 %v1124_v43  ;;  %386 = vmatprep.mubr.bf16.mxu1 %v1124_v43 }
   0x2   :  { %32 = vadd.xlane.f32.xlu0 %v1168_v0  ;;  %v37_v2 = vsel %vm36_vm0, %v1173_v1, 0.0  ;;  %v1014_v4 = vld [vmem:[%s1524_s3 + $0x4] ss:$16 sps:$4 sm:$0xff]   ;;  %v1016_v5 = vld [vmem:[%s1524_s3 + $0xc] ss:$16 sps:$4 sm:$0xff]  }
   0x3   :  { %38 = vadd.xlane.f32.xlu1 %v37_v2  ;;  %303 = vmatprep.subr.bf16.mxu0 %v1014_v4  ;;  %v1018_v6 = vld [vmem:[%s1524_s3] ss:$16 sps:$4 sm:$0xff]   ;;  %v1019_v7 = vld [vmem:[%s1524_s3 + $0x8] ss:$16 sps:$4 sm:$0xff]   ;;  %v1020_v8 = vld [vmem:[%s1524_s3 + $0x24] ss:$16 sps:$4 sm:$0xff]  }
   0x4   :  { %354 = vmatprep.subr.bf16.mxu1 %v1016_v5  ;;  %304 = vmatpush1.bf16.msra.mxu0 %v1018_v6  ;;  %v1022_v9 = vld [vmem:[%s1524_s3 + $0x2c] ss:$16 sps:$4 sm:$0xff]   ;;  %v1024_v23 = vld [vmem:[%s1524_s3 + $0x20] ss:$16 sps:$4 sm:$0xff]   ;;  %v1025_v24 = vld [vmem:[%s1524_s3 + $0x28] ss:$16 sps:$4 sm:$0xff]  }
   0x5   :  { %355 = vmatpush1.bf16.msra.mxu1 %v1019_v7  ;;  %305 = vmatprep.subr.bf16.mxu0 %v1020_v8  ;;  %v1026_v25 = vld [vmem:[%s1524_s3 + $0x44] ss:$16 sps:$4 sm:$0xff]   ;;  %v1028_v26 = vld [vmem:[%s1524_s3 + $0x4c] ss:$16 sps:$4 sm:$0xff]   ;;  %v1030_v27 = vld [vmem:[%s1524_s3 + $0x40] ss:$16 sps:$4 sm:$0xff]  }
   0x6   :  { %34 = vadd.xlane.f32.xlu0 %v1181_v3  ;;  %356 = vmatprep.subr.bf16.mxu1 %v1022_v9  ;;  %v1031_v28 = vld [vmem:[%s1524_s3 + $0x48] ss:$16 sps:$4 sm:$0xff]   ;;  %v1032_v29 = vld [vmem:[%s1524_s3 + $0x64] ss:$16 sps:$4 sm:$0xff]   ;;  %v1034_v30 = vld [vmem:[%s1524_s3 + $0x6c] ss:$16 sps:$4 sm:$0xff]  }
   0x7   :  { %v1036_v31 = vld [vmem:[%s1524_s3 + $0x60] ss:$16 sps:$4 sm:$0xff]   ;;  %v1037_v32 = vld [vmem:[%s1524_s3 + $0x68] ss:$16 sps:$4 sm:$0xff]   ;;  %v1038_v33 = vld [vmem:[%s1524_s3 + $0x84] ss:$16 sps:$4 sm:$0xff]  }
   0x8   :  { %306 = vmatpush1.bf16.msra.mxu0 %v1024_v23  ;;  %v1040_v34 = vld [vmem:[%s1524_s3 + $0x8c] ss:$16 sps:$4 sm:$0xff]   ;;  %v1042_v35 = vld [vmem:[%s1524_s3 + $0x80] ss:$16 sps:$4 sm:$0xff]   ;;  %v1043_v36 = vld [vmem:[%s1524_s3 + $0x88] ss:$16 sps:$4 sm:$0xff]  }
   0x9   :  { %357 = vmatpush1.bf16.msra.mxu1 %v1025_v24  ;;  %307 = vmatprep.subr.bf16.mxu0 %v1026_v25  ;;  %v1044_v37 = vld [vmem:[%s1524_s3 + $0xa4] ss:$16 sps:$4 sm:$0xff]   ;;  %v1046_v38 = vld [vmem:[%s1524_s3 + $0xac] ss:$16 sps:$4 sm:$0xff]   ;;  %v1048_v39 = vld [vmem:[%s1524_s3 + $0xa0] ss:$16 sps:$4 sm:$0xff]  }
   0xa   :  { %358 = vmatprep.subr.bf16.mxu1 %v1028_v26  ;;  %v1049_v40 = vld [vmem:[%s1524_s3 + $0xa8] ss:$16 sps:$4 sm:$0xff]   ;;  %v1050_v41 = vld [vmem:[%s1524_s3 + $0xc4] ss:$16 sps:$4 sm:$0xff]   ;;  %v1052_v42 = vld [vmem:[%s1524_s3 + $0xcc] ss:$16 sps:$4 sm:$0xff]  }
   0xb   :  { %v1054_v44 = vld [vmem:[%s1524_s3 + $0xc0] ss:$16 sps:$4 sm:$0xff]   ;;  %v1055_v45 = vld [vmem:[%s1524_s3 + $0xc8] ss:$16 sps:$4 sm:$0xff]   ;;  %v1056_v46 = vld [vmem:[%s1524_s3 + $0xe4] ss:$16 sps:$4 sm:$0xff]  }
   0xc   :  { %308 = vmatpush1.bf16.msra.mxu0 %v1030_v27  ;;  %v1058_v47 = vld [vmem:[%s1524_s3 + $0xec] ss:$16 sps:$4 sm:$0xff]   ;;  %v1060_v48 = vld [vmem:[%s1524_s3 + $0xe0] ss:$16 sps:$4 sm:$0xff]   ;;  %v1061_v49 = vld [vmem:[%s1524_s3 + $0xe8] ss:$16 sps:$4 sm:$0xff]  }
   0xd   :  { %359 = vmatpush1.bf16.msra.mxu1 %v1031_v28  ;;  %309 = vmatprep.subr.bf16.mxu0 %v1032_v29  ;;  %v890_v61 = vld [vmem:[%s1525_s1] ss:$0 sm:$0xff]  ;;  %v1071_v23 = vld [vmem:[%s1527_s5 + $0xd0] sm:$0xff]   ;;  %v1074_v26 = vld [vmem:[%s1527_s5 + $0x58] sm:$0xff]  }
   0xe   :  { %360 = vmatprep.subr.bf16.mxu1 %v1034_v30  ;;  %v891_v5 = vld [vmem:[%s1526_s2] ss:$0 sm:$0xff]  ;;  %v1072_v24 = vld [vmem:[%s1527_s5 + $0x10] sm:$0xff]   ;;  %v1075_v27 = vld [vmem:[%s1527_s5 + $0xd8] sm:$0xff]  }
   0xf   :  { %v1073_v25 = vld [vmem:[%s1527_s5 + $0x90] sm:$0xff]   ;;  %v1076_v28 = vld [vmem:[%s1527_s5 + $0x18] sm:$0xff]   ;;  %v1078_v30 = vld [vmem:[%s1527_s5 + $0x60] sm:$0xff]  }
  0x10   :  { %310 = vmatpush1.bf16.msra.mxu0 %v1036_v31  ;;  %v1077_v29 = vld [vmem:[%s1527_s5 + $0x98] sm:$0xff]   ;;  %v1079_v31 = vld [vmem:[%s1527_s5 + $0xe0] sm:$0xff]  }
  0x11   :  { %361 = vmatpush1.bf16.msra.mxu1 %v1037_v32  ;;  %311 = vmatprep.subr.bf16.mxu0 %v1038_v33  ;;  %v1080_v32 = vld [vmem:[%s1527_s5 + $0x20] sm:$0xff]  }
  0x12   :  { %362 = vmatprep.subr.bf16.mxu1 %v1040_v34  ;;  %v1081_v33 = vld [vmem:[%s1527_s5 + $0xa0] sm:$0xff]   ;;  %v1082_v34 = vld [vmem:[%s1527_s5 + $0x68] sm:$0xff]  }
  0x14   :  { %312 = vmatpush1.bf16.msra.mxu0 %v1042_v35  ;;  %v1083_v35 = vld [vmem:[%s1527_s5 + $0xe8] sm:$0xff]  }
  0x15   :  { %363 = vmatpush1.bf16.msra.mxu1 %v1043_v36  ;;  %313 = vmatprep.subr.bf16.mxu0 %v1044_v37  ;;  %v1084_v36 = vld [vmem:[%s1527_s5 + $0x28] sm:$0xff]  }
  0x16   :  { %364 = vmatprep.subr.bf16.mxu1 %v1046_v38  ;;  %v1085_v37 = vld [vmem:[%s1527_s5 + $0xa8] sm:$0xff]   ;;  %v1086_v38 = vld [vmem:[%s1527_s5 + $0x70] sm:$0xff]  }
  0x18   :  { %314 = vmatpush1.bf16.msra.mxu0 %v1048_v39  ;;  %v1087_v39 = vld [vmem:[%s1527_s5 + $0xf0] sm:$0xff]  }
  0x19   :  { %365 = vmatpush1.bf16.msra.mxu1 %v1049_v40  ;;  %315 = vmatprep.subr.bf16.mxu0 %v1050_v41  ;;  %v1088_v40 = vld [vmem:[%s1527_s5 + $0x30] sm:$0xff]  }
  0x1a   :  { %366 = vmatprep.subr.bf16.mxu1 %v1052_v42  ;;  %v1089_v41 = vld [vmem:[%s1527_s5 + $0xb0] sm:$0xff]   ;;  %v1090_v42 = vld [vmem:[%s1527_s5 + $0x78] sm:$0xff]  }
  0x1c   :  { %316 = vmatpush1.bf16.msra.mxu0 %v1054_v44  ;;  %v1092_v44 = vld [vmem:[%s1527_s5 + $0x38] sm:$0xff]  }
  0x1d   :  { %367 = vmatpush1.bf16.msra.mxu1 %v1055_v45  ;;  %317 = vmatprep.subr.bf16.mxu0 %v1056_v46  ;;  %v1093_v45 = vld [vmem:[%s1527_s5 + $0xb8] sm:$0xff]   ;;  %v123_v46 = vlaneseq }
  0x1e   :  { %368 = vmatprep.subr.bf16.mxu1 %v1058_v47 }
  0x1f   :  { %v124_v47 = vshrl.u32 %v123_v46, 7 }
  0x20   :  { %318 = vmatpush1.bf16.msra.mxu0 %v1060_v48 }
  0x21   :  { %369 = vmatpush1.bf16.msra.mxu1 %v1061_v49  ;;  %v125_v48 = vsub.s32 0, %v124_v47  ;;  %v133_v49 = vsub.s32 2, %v124_v47 }
  0x8f   :  { %v33_v10 = vpop.xlane.xlu0 %32 }
  0x90   :  { %v41_v11 = vmul.f32 0.0078125, %v33_v10  ;;  %v39_v12 = vpop.xlane.xlu1 %38 }
  0x91   :  { %v43_v13 = vmul.f32 0.0078125, %v39_v12 }
  0x92   :  { %v1203_v14 = vsub.f32 %v1168_v0, %v41_v11 }
  0x93   :  { %v1206_v15 = vsub.f32 %v1173_v1, %v43_v13  ;;  %v35_v16 = vpop.xlane.xlu0 %34 }
  0x94   :  { %v42_v17 = vmul.f32 0.0078125, %v35_v16  ;;  %v47_v18 = vmul.f32 %v1203_v14, %v1203_v14  ;;  %v1064_v16 = vld [vmem:[%s1527_s5] sm:$0xff]  }
  0x95   :  { %v49_v19 = vmul.f32 %v1206_v15, %v1206_v15 }
  0x96   :  { %v1213_v20 = vsub.f32 %v1181_v3, %v42_v17  ;;  %50 = vadd.xlane.f32.xlu1 %v47_v18  ;;  %v1065_v17 = vld [vmem:[%s1527_s5 + $0x80] sm:$0xff]   ;;  %v1066_v18 = vld [vmem:[%s1527_s5 + $0x48] sm:$0xff]  }
  0x97   :  { %v54_v21 = vsel %vm36_vm0, %v49_v19, 0.0  ;;  %v1067_v19 = vld [vmem:[%s1527_s5 + $0xc8] sm:$0xff]  }
  0x98   :  { %v48_v22 = vmul.f32 %v1213_v20, %v1213_v20 }
  0x9a   :  { %55 = vadd.xlane.f32.xlu1 %v54_v21  ;;  %52 = vadd.xlane.f32.xlu0 %v48_v22  ;;  %v1069_v21 = vld [vmem:[%s1527_s5 + $0x88] sm:$0xff]   ;;  %v1070_v22 = vld [vmem:[%s1527_s5 + $0x50] sm:$0xff]  }
 0x123   :  { %v51_v50 = vpop.xlane.xlu1 %50 }
 0x124   :  { %v57_v51 = vmul.f32 0.0078125, %v51_v50  ;;  %v121_v50 = vld [vmem:[%s1528_s4] sm:$0xf] }
 0x126   :  { %v60_v52 = vadd.f32 1e-06, %v57_v51  ;;  %v129_v51 = vsub.s32 1, %v124_v47 }
 0x127   :  { %v56_v53 = vpop.xlane.xlu1 %55  ;;  %v53_v54 = vpop.xlane.xlu0 %52 }
 0x128   :  { %1094 = vrsqrt.f32 %v60_v52  ;;  %v59_v55 = vmul.f32 0.0078125, %v56_v53  ;;  %v58_v56 = vmul.f32 0.0078125, %v53_v54  ;;  %v137_v52 = vsub.s32 3, %v124_v47 }
 0x129   :  { %v1404_v53 = vrot.slane %v121_v50, %v125_v48  ;;  %v1406_v54 = vrot.slane %v121_v50, %v133_v49 }
 0x12a   :  { %v62_v57 = vadd.f32 1e-06, %v59_v55  ;;  %v61_v58 = vadd.f32 1e-06, %v58_v56  ;;  %v1408_v55 = vrot.slane %v121_v50, %v129_v51  ;;  %v1410_v56 = vrot.slane %v121_v50, %v137_v52 }
 0x12c   :  { %1096 = vrsqrt.f32 %v62_v57 }
 0x12d   :  { %1098 = vrsqrt.f32 %v61_v58 }
 0x132   :  { %v1095_v59 = vpop.eup %1094 }
 0x133   :  { %v66_v60 = vmul.f32 %v1095_v59, %v1203_v14  ;;  %v1062_v14 = vld [vmem:[%s1527_s5 + $0x40] sm:$0xff]  }
 0x134   :  { %957 = vmatprep.subr.bf16.mxu0 %v1062_v14 }
 0x135   :  { %v75_v4 = vmul.f32 %v890_v61, %v66_v60 }
 0x136   :  { %v1097_v62 = vpop.eup %1096 }
 0x137   :  { %v1099_v63 = vpop.eup %1098  ;;  %v68_v7 = vmul.f32 %v1097_v62, %v1206_v15  ;;  %v84_v8 = vadd.f32 %v891_v5, %v75_v4  ;;  %v1063_v15 = vld [vmem:[%s1527_s5 + $0xc0] sm:$0xff]  }
 0x138   :  { %v67_v2 = vmul.f32 %v1099_v63, %v1213_v20  ;;  %985 = vmatprep.subr.bf16.mxu1 %v1063_v15  ;;  %v1068_v20 = vld [vmem:[%s1527_s5 + $0x8] sm:$0xff]  }
 0x139   :  { %v77_v11 = vmul.f32 %v890_v61, %v68_v7 }
 0x13a   :  { %v76_v6 = vmul.f32 %v890_v61, %v67_v2 }
 0x13b   :  { %v86_v12 = vadd.f32 %v891_v5, %v77_v11 }
 0x13c   :  { %v85_v9 = vadd.f32 %v891_v5, %v76_v6 }
 0x13d   :  { %v88_v13 = vpack.c.bf16 %v86_v12, %v86_v12 }
 0x13e   :  { %v87_v10 = vpack.c.bf16 %v85_v9, %v84_v8 }
 0x140   :  { %336 = vmatmul.mubr.bf16.vlgmr.msra.gmra.mrb[0].mxu0 %v87_v10  ;;  %387 = vmatmul.mubr.bf16.vlgmr.msra.gmra.mrb[0].mxu1 %v87_v10 }
 0x141   :  { %345 = vmatprep.mubr.bf16.mxu0 %v1124_v43  ;;  %396 = vmatprep.mubr.bf16.mxu1 %v1124_v43  ;;  %v1091_v43 = vld [vmem:[%s1527_s5 + $0xf8] sm:$0xff]  }
 0x142   :  { %958 = vmatpush3.bf16.msra.mxu0 %v1064_v16  ;;  %986 = vmatpush3.bf16.msra.mxu1 %v1065_v17 }
 0x143   :  { %959 = vmatprep.subr.bf16.mxu0 %v1066_v18  ;;  %987 = vmatprep.subr.bf16.mxu1 %v1067_v19 }
 0x146   :  { %960 = vmatpush3.bf16.msra.mxu0 %v1068_v20  ;;  %988 = vmatpush3.bf16.msra.mxu1 %v1069_v21 }
 0x147   :  { %961 = vmatprep.subr.bf16.mxu0 %v1070_v22  ;;  %989 = vmatprep.subr.bf16.mxu1 %v1071_v23 }
 0x148   :  { %346 = vmatmul.mubr.bf16.gmra.mrb[4].mxu0 %v88_v13  ;;  %397 = vmatmul.mubr.bf16.gmra.mrb[4].mxu1 %v88_v13 }
 0x14a   :  { %962 = vmatpush3.bf16.msra.mxu0 %v1072_v24  ;;  %990 = vmatpush3.bf16.msra.mxu1 %v1073_v25 }
 0x14b   :  { %963 = vmatprep.subr.bf16.mxu0 %v1074_v26  ;;  %991 = vmatprep.subr.bf16.mxu1 %v1075_v27 }
 0x14e   :  { %964 = vmatpush3.bf16.msra.mxu0 %v1076_v28  ;;  %992 = vmatpush3.bf16.msra.mxu1 %v1077_v29 }
 0x14f   :  { %965 = vmatprep.subr.bf16.mxu0 %v1078_v30  ;;  %993 = vmatprep.subr.bf16.mxu1 %v1079_v31 }
 0x152   :  { %966 = vmatpush3.bf16.msra.mxu0 %v1080_v32  ;;  %994 = vmatpush3.bf16.msra.mxu1 %v1081_v33 }
 0x153   :  { %967 = vmatprep.subr.bf16.mxu0 %v1082_v34  ;;  %995 = vmatprep.subr.bf16.mxu1 %v1083_v35 }
 0x156   :  { %968 = vmatpush3.bf16.msra.mxu0 %v1084_v36  ;;  %996 = vmatpush3.bf16.msra.mxu1 %v1085_v37 }
 0x157   :  { %969 = vmatprep.subr.bf16.mxu0 %v1086_v38  ;;  %997 = vmatprep.subr.bf16.mxu1 %v1087_v39 }
 0x15a   :  { %970 = vmatpush3.bf16.msra.mxu0 %v1088_v40  ;;  %998 = vmatpush3.bf16.msra.mxu1 %v1089_v41 }
 0x15b   :  { %971 = vmatprep.subr.bf16.mxu0 %v1090_v42  ;;  %999 = vmatprep.subr.bf16.mxu1 %v1091_v43 }
 0x15e   :  { %972 = vmatpush3.bf16.msra.mxu0 %v1092_v44  ;;  %1000 = vmatpush3.bf16.msra.mxu1 %v1093_v45 }
 0x213   :  { %v337_v57 = vpop.f32.mrb[0].mxu0  ;;  %v388_v58 = vpop.f32.mrb[0].mxu1 }
 0x214   :  { %v1413_v59 = vadd.f32 %v337_v57, %v1404_v53  ;;  %v1416_v60 = vadd.f32 %v388_v58, %v1406_v54  ;;  %v339_v61 = vpop.f32.mrb[1].mxu0  ;;  %v390_v62 = vpop.f32.mrb[1].mxu1 }
 0x215   :  { %v1419_v63 = vadd.f32 %v339_v61, %v1408_v55  ;;  %v1422_v2 = vadd.f32 %v390_v62, %v1410_v56  ;;  %v341_v4 = vpop.f32.mrb[2].mxu0  ;;  %v392_v5 = vpop.f32.mrb[2].mxu1 }
 0x216   :  { %v405_v6 = vmul.f32 %v1413_v59, %v1413_v59  ;;  %v407_v7 = vmul.f32 %v1416_v60, %v1416_v60  ;;  %v1429_v8 = vadd.f32 %v341_v4, %v1404_v53  ;;  %v1432_v9 = vadd.f32 %v392_v5, %v1406_v54  ;;  %v343_v10 = vpop.f32.mrb[3].mxu0  ;;  %v394_v11 = vpop.f32.mrb[3].mxu1 }
 0x217   :  { %v406_v12 = vmul.f32 %v1419_v63, %v1419_v63  ;;  %v408_v13 = vmul.f32 %v1422_v2, %v1422_v2  ;;  %v1439_v14 = vadd.f32 %v343_v10, %v1408_v55  ;;  %v1442_v15 = vadd.f32 %v394_v11, %v1410_v56 }
 0x218   :  { %v417_v16 = vmul.f32 %v405_v6, %v1413_v59  ;;  %v419_v17 = vmul.f32 %v407_v7, %v1416_v60  ;;  %v409_v18 = vmul.f32 %v1429_v8, %v1429_v8  ;;  %v411_v19 = vmul.f32 %v1432_v9, %v1432_v9 }
 0x219   :  { %v418_v20 = vmul.f32 %v406_v12, %v1419_v63  ;;  %v420_v21 = vmul.f32 %v408_v13, %v1422_v2  ;;  %v410_v22 = vmul.f32 %v1439_v14, %v1439_v14  ;;  %v412_v23 = vmul.f32 %v1442_v15, %v1442_v15 }
 0x21a   :  { %v429_v24 = vmul.f32 0.044715, %v417_v16  ;;  %v431_v25 = vmul.f32 0.044715, %v419_v17  ;;  %v421_v26 = vmul.f32 %v409_v18, %v1429_v8  ;;  %v423_v27 = vmul.f32 %v411_v19, %v1432_v9 }
 0x21b   :  { %v430_v28 = vmul.f32 0.044715, %v418_v20  ;;  %v432_v29 = vmul.f32 0.044715, %v420_v21  ;;  %v422_v30 = vmul.f32 %v410_v22, %v1439_v14  ;;  %v424_v31 = vmul.f32 %v412_v23, %v1442_v15  ;;  %v347_v32 = vpop.f32.mrb[4].mxu0  ;;  %v398_v33 = vpop.f32.mrb[4].mxu1 }
 0x21c   :  { %v441_v34 = vadd.f32 %v429_v24, %v1413_v59  ;;  %v443_v35 = vadd.f32 %v431_v25, %v1416_v60  ;;  %v433_v36 = vmul.f32 0.044715, %v421_v26  ;;  %v435_v37 = vmul.f32 0.044715, %v423_v27  ;;  %v349_v38 = vpop.f32.mrb[5].mxu0  ;;  %v400_v39 = vpop.f32.mrb[5].mxu1 }
 0x21d   :  { %v442_v40 = vadd.f32 %v430_v28, %v1419_v63  ;;  %v444_v41 = vadd.f32 %v432_v29, %v1422_v2  ;;  %v434_v42 = vmul.f32 0.044715, %v422_v30  ;;  %v436_v43 = vmul.f32 0.044715, %v424_v31  ;;  %v351_v44 = vpop.f32.mrb[6].mxu0  ;;  %v402_v45 = vpop.f32.mrb[6].mxu1 }
 0x21e   :  { %v453_v46 = vmul.f32 0.7978846, %v441_v34  ;;  %v455_v47 = vmul.f32 0.7978846, %v443_v35  ;;  %v445_v48 = vadd.f32 %v433_v36, %v1429_v8  ;;  %v447_v49 = vadd.f32 %v435_v37, %v1432_v9  ;;  %v352_v50 = vpop.f32.mrb[7].mxu0  ;;  %v403_v51 = vpop.f32.mrb[7].mxu1 }
 0x21f   :  { %v454_v52 = vmul.f32 0.7978846, %v442_v40  ;;  %v456_v57 = vmul.f32 0.7978846, %v444_v41  ;;  %v446_v58 = vadd.f32 %v434_v42, %v1439_v14  ;;  %v448_v61 = vadd.f32 %v436_v43, %v1442_v15 }
 0x220   :  { %1100 = vtanh.f32 %v453_v46  ;;  %v457_v62 = vmul.f32 0.7978846, %v445_v48  ;;  %v1469_v4 = vadd.f32 %v347_v32, %v1404_v53  ;;  %v459_v5 = vmul.f32 0.7978846, %v447_v49 }
 0x221   :  { %1102 = vtanh.f32 %v455_v47  ;;  %v458_v6 = vmul.f32 0.7978846, %v446_v58  ;;  %v1472_v7 = vadd.f32 %v398_v33, %v1406_v54  ;;  %v1477_v11 = vadd.f32 %v349_v38, %v1408_v55 }
 0x222   :  { %1104 = vtanh.f32 %v454_v52  ;;  %v413_v10 = vmul.f32 %v1469_v4, %v1469_v4  ;;  %v1480_v12 = vadd.f32 %v400_v39, %v1410_v56  ;;  %v460_v13 = vmul.f32 0.7978846, %v448_v61 }
 0x223   :  { %1106 = vtanh.f32 %v456_v57  ;;  %v415_v53 = vmul.f32 %v1472_v7, %v1472_v7  ;;  %v414_v54 = vmul.f32 %v1477_v11, %v1477_v11 }
 0x224   :  { %1108 = vtanh.f32 %v457_v62  ;;  %v425_v16 = vmul.f32 %v413_v10, %v1469_v4  ;;  %v416_v17 = vmul.f32 %v1480_v12, %v1480_v12 }
 0x225   :  { %1110 = vtanh.f32 %v459_v5  ;;  %v427_v55 = vmul.f32 %v415_v53, %v1472_v7  ;;  %v426_v18 = vmul.f32 %v414_v54, %v1477_v11 }
 0x226   :  { %1112 = vtanh.f32 %v458_v6  ;;  %v437_v56 = vmul.f32 0.044715, %v425_v16  ;;  %v428_v19 = vmul.f32 %v416_v17, %v1480_v12 }
 0x227   :  { %1114 = vtanh.f32 %v460_v13  ;;  %v439_v20 = vmul.f32 0.044715, %v427_v55  ;;  %v438_v22 = vmul.f32 0.044715, %v426_v18 }
 0x228   :  { %v449_v21 = vadd.f32 %v437_v56, %v1469_v4  ;;  %v440_v23 = vmul.f32 0.044715, %v428_v19 }
 0x229   :  { %v451_v24 = vadd.f32 %v439_v20, %v1472_v7  ;;  %v450_v27 = vadd.f32 %v438_v22, %v1477_v11 }
 0x22a   :  { %v1101_v25 = vpop.eup %1100  ;;  %v461_v26 = vmul.f32 0.7978846, %v449_v21  ;;  %v452_v28 = vadd.f32 %v440_v23, %v1480_v12 }
 0x22b   :  { %v1103_v29 = vpop.eup %1102  ;;  %v477_v30 = vadd.f32 1.0, %v1101_v25  ;;  %v463_v31 = vmul.f32 0.7978846, %v451_v24  ;;  %v462_v34 = vmul.f32 0.7978846, %v450_v27 }
 0x22c   :  { %v1105_v32 = vpop.eup %1104  ;;  %v479_v33 = vadd.f32 1.0, %v1103_v29  ;;  %1116 = vtanh.f32 %v461_v26  ;;  %v464_v35 = vmul.f32 0.7978846, %v452_v28 }
 0x22d   :  { %v1107_v36 = vpop.eup %1106  ;;  %1118 = vtanh.f32 %v463_v31  ;;  %v478_v37 = vadd.f32 1.0, %v1105_v32  ;;  %v489_v41 = vmul.f32 0.5, %v477_v30 }
 0x22e   :  { %v1109_v38 = vpop.eup %1108  ;;  %1120 = vtanh.f32 %v462_v34  ;;  %v480_v39 = vadd.f32 1.0, %v1107_v36  ;;  %v491_v44 = vmul.f32 0.5, %v479_v33 }
 0x22f   :  { %v1111_v40 = vpop.eup %1110  ;;  %v481_v42 = vadd.f32 1.0, %v1109_v38  ;;  %1122 = vtanh.f32 %v464_v35  ;;  %v490_v49 = vmul.f32 0.5, %v478_v37  ;;  %v501_v57 = vmul.f32 %v489_v41, %v1413_v59 }
 0x230   :  { %v1113_v43 = vpop.eup %1112  ;;  %v483_v45 = vadd.f32 1.0, %v1111_v40  ;;  %v492_v52 = vmul.f32 0.5, %v480_v39  ;;  %v503_v62 = vmul.f32 %v491_v44, %v1416_v60 }
 0x231   :  { %v1115_v46 = vpop.eup %1114  ;;  %v493_v47 = vmul.f32 0.5, %v481_v42  ;;  %v482_v48 = vadd.f32 1.0, %v1113_v43  ;;  %v502_v13 = vmul.f32 %v490_v49, %v1419_v63 }
 0x232   :  { %v495_v50 = vmul.f32 0.5, %v483_v45  ;;  %v484_v51 = vadd.f32 1.0, %v1115_v46  ;;  %v504_v17 = vmul.f32 %v492_v52, %v1422_v2 }
 0x233   :  { %v505_v58 = vmul.f32 %v493_v47, %v1429_v8  ;;  %v494_v61 = vmul.f32 0.5, %v482_v48 }
 0x234   :  { %v507_v5 = vmul.f32 %v495_v50, %v1432_v9  ;;  %v496_v6 = vmul.f32 0.5, %v484_v51 }
 0x235   :  { %v513_v10 = vpack.c.bf16 %v505_v58, %v501_v57  ;;  %v506_v53 = vmul.f32 %v494_v61, %v1439_v14 }
 0x236   :  { %v1117_v16 = vpop.eup %1116  ;;  %v515_v54 = vpack.c.bf16 %v507_v5, %v503_v62  ;;  %v508_v55 = vmul.f32 %v496_v6, %v1442_v15 }
 0x237   :  { %v1119_v59 = vpop.eup %1118  ;;  %v514_v56 = vpack.c.bf16 %v506_v53, %v502_v13  ;;  %v485_v8 = vadd.f32 1.0, %v1117_v16 }
 0x238   :  { %v1121_v18 = vpop.eup %1120  ;;  %v516_v19 = vpack.c.bf16 %v508_v55, %v504_v17  ;;  %v487_v60 = vadd.f32 1.0, %v1119_v59 }
 0x239   :  { %v1123_v20 = vpop.eup %1122  ;;  %816 = vmatprep.mubr.bf16.mxu0 %v514_v56  ;;  %v486_v9 = vadd.f32 1.0, %v1121_v18  ;;  %v497_v21 = vmul.f32 0.5, %v485_v8 }
 0x23a   :  { %864 = vmatprep.mubr.bf16.mxu1 %v516_v19  ;;  %817 = vmatmul.mubr.bf16.vlgmr.msra.gmra.mrb[8].mxu0 %v513_v10  ;;  %v488_v63 = vadd.f32 1.0, %v1123_v20  ;;  %v499_v14 = vmul.f32 0.5, %v487_v60 }
 0x23b   :  { %865 = vmatmul.mubr.bf16.vlgmr.msra.gmra.mrb[8].mxu1 %v515_v54  ;;  %v498_v22 = vmul.f32 0.5, %v486_v9  ;;  %v509_v2 = vmul.f32 %v497_v21, %v1469_v4  ;;  %v924_v4 = vld [vmem:[%s1529_s6] ss:$0 sm:$0xff] }
 0x23c   :  { %v500_v23 = vmul.f32 0.5, %v488_v63  ;;  %v511_v24 = vmul.f32 %v499_v14, %v1472_v7 }
 0x23d   :  { %v510_v15 = vmul.f32 %v498_v22, %v1477_v11  ;;  %v517_v28 = vpack.c.bf16 %v509_v2, %v509_v2 }
 0x23e   :  { %v512_v25 = vmul.f32 %v500_v23, %v1480_v12  ;;  %v519_v29 = vpack.c.bf16 %v511_v24, %v511_v24 }
 0x23f   :  { %v518_v26 = vpack.c.bf16 %v510_v15, %v510_v15 }
 0x240   :  { %v520_v27 = vpack.c.bf16 %v512_v25, %v512_v25 }
 0x241   :  { %824 = vmatprep.mubr.bf16.mxu0 %v518_v26 }
 0x242   :  { %872 = vmatprep.mubr.bf16.mxu1 %v520_v27  ;;  %825 = vmatmul.mubr.bf16.gmra.mrb[12].mxu0 %v517_v28 }
 0x243   :  { %873 = vmatmul.mubr.bf16.gmra.mrb[12].mxu1 %v519_v29 }
 0x30d   :  { %v973_v30 = vpop.f32.mrb[8].mxu0 }
 0x30e   :  { %v1001_v31 = vpop.f32.mrb[8].mxu1  ;;  %v974_v32 = vpop.f32.mrb[9].mxu0 }
 0x30f   :  { %v975_v11 = vadd.f32 %v974_v32, %v973_v30  ;;  %v1002_v33 = vpop.f32.mrb[9].mxu1  ;;  %v976_v7 = vpop.f32.mrb[10].mxu0 }
 0x310   :  { %v1003_v34 = vadd.f32 %v1002_v33, %v1001_v31  ;;  %v1004_v12 = vpop.f32.mrb[10].mxu1  ;;  %v977_v35 = vpop.f32.mrb[11].mxu0 }
 0x311   :  { %v819_v36 = vadd.f32 %v975_v11, %v924_v4  ;;  %v978_v37 = vadd.f32 %v977_v35, %v976_v7  ;;  %v1005_v38 = vpop.f32.mrb[11].mxu1 }
 0x312   :  { %v1006_v39 = vadd.f32 %v1005_v38, %v1004_v12 }
 0x313   :  { %v867_v40 = vadd.f32 %v1003_v34, %v819_v36  ;;  %v822_v41 = vadd.f32 %v978_v37, %v924_v4 }
 0x315   :  { %v880_v42 = vadd.f32 %v867_v40, %v1168_v0  ;;  %v870_v43 = vadd.f32 %v1006_v39, %v822_v41  ;;  %v979_v44 = vpop.f32.mrb[12].mxu0 }
 0x316   :  { %v1007_v45 = vpop.f32.mrb[12].mxu1  ;;  %v980_v46 = vpop.f32.mrb[13].mxu0 }
 0x317   :  { %883 = vst [vmem:[%s1530_s7] sm:$0xff] %v880_v42  ;;  %v881_v47 = vadd.f32 %v870_v43, %v1181_v3  ;;  %v981_v48 = vadd.f32 %v980_v46, %v979_v44  ;;  %v1008_v49 = vpop.f32.mrb[13].mxu1  ;;  %v982_v50 = vpop.f32.mrb[14].mxu0 }
 0x318   :  { %v1009_v51 = vadd.f32 %v1008_v49, %v1007_v45  ;;  %v1010_v52 = vpop.f32.mrb[14].mxu1  ;;  %v983_v57 = vpop.f32.mrb[15].mxu0 }
 0x319   :  { %884 = vst [vmem:[%s1530_s7 + $0x8] sm:$0xff] %v881_v47  ;;  %v827_v0 = vadd.f32 %v981_v48, %v924_v4  ;;  %v1011_v58 = vpop.f32.mrb[15].mxu1 }
 0x31b   :  { %v875_v61 = vadd.f32 %v1009_v51, %v827_v0 }
 0x31d   :  { %v882_v62 = vadd.f32 %v875_v61, %v1173_v1 }
 0x31f   :  { %885 = vst [vmem:[%s1530_s7 + $0x10] sm:$0x3] %v882_v62 }

// kernel: _lambda_.59
= control target key start
LH: loop header
LB: loop body
LE: loop exit
PB: predicated region body
PF: predicated region fallthrough
CT: control target
= control target key end

     0   :  { %vm25_vm0 = vcmask 1041408   ;;  %s1249_s0 = inlined_call_operand.vmem [shape: f32[4,2,128], index: 0, kind: input, shape index: {}]   ;;  %s1250_s1 = inlined_call_operand.vmem [shape: f32[1,128], index: 1, kind: input, shape index: {}]   ;;  %s1251_s2 = inlined_call_operand.vmem [shape: f32[1,128], index: 2, kind: input, shape index: {}]   ;;  %s1252_s3 = inlined_call_operand.vmem [shape: bf16[4,128,256], index: 3, kind: input, shape index: {}]   ;;  %s1253_s4 = inlined_call_operand.vmem [shape: f32[1,256], index: 4, kind: input, shape index: {}]   ;;  %s1254_s5 = inlined_call_operand.hbm [shape: f32[2,256], index: 5, kind: output, shape index: {}]  }
   0x1   :  { %v706_v0 = vld [vmem:[%s1249_s0 + $0x2] sm:$0x3]  ;;  %v755_v1 = vld [vmem:[%s1249_s0 + $0x4] sm:$0x3]  ;;  %v22_v4 = vld [vmem:[%s1249_s0] sm:$0x3] }
   0x2   :  { %v73_v2 = vsel %vm25_vm0, %v706_v0, 0.0  ;;  %v350_v3 = vsel %vm25_vm0, %v755_v1, 0.0  ;;  %v788_v5 = vld [vmem:[%s1249_s0 + $0x6] sm:$0x3]  ;;  %v26_v6 = vsel %vm25_vm0, %v22_v4, 0.0 }
   0x3   :  { %74 = vadd.xlane.f32.xlu0 %v73_v2  ;;  %351 = vadd.xlane.f32.xlu1 %v350_v3  ;;  %v508_v7 = vsel %vm25_vm0, %v788_v5, 0.0 }
   0x7   :  { %27 = vadd.xlane.f32.xlu0 %v26_v6  ;;  %509 = vadd.xlane.f32.xlu1 %v508_v7 }
   0x8   :  { %10 = vsyncpa [#allocation3], 0  ;;  %v824_v8 = vld [vmem:[%s1252_s3 + $0x84] ss:$8 sps:$4 sm:$0xff]   ;;  %v826_v9 = vld [vmem:[%s1252_s3 + $0x80] ss:$8 sps:$4 sm:$0xff]  }
   0x9   :  { %v827_v10 = vld [vmem:[%s1252_s3 + $0x94] ss:$8 sps:$4 sm:$0xff]   ;;  %v829_v11 = vld [vmem:[%s1252_s3 + $0x4] ss:$8 sps:$4 sm:$0xff]   ;;  %v832_v12 = vld [vmem:[%s1252_s3] ss:$8 sps:$4 sm:$0xff]   ;;  %186 = vmatprep.subr.bf16.mxu0 %v824_v8 }
   0xa   :  { %v835_v13 = vld [vmem:[%s1252_s3 + $0x14] ss:$8 sps:$4 sm:$0xff]   ;;  %187 = vmatpush1.bf16.msra.mxu0 %v826_v9  ;;  %307 = vmatprep.subr.bf16.mxu1 %v829_v11  ;;  %v831_v14 = vld [vmem:[%s1252_s3 + $0x90] ss:$8 sps:$4 sm:$0xff]   ;;  %v833_v15 = vld [vmem:[%s1252_s3 + $0xa4] ss:$8 sps:$4 sm:$0xff]  }
   0xb   :  { %188 = vmatprep.subr.bf16.mxu0 %v827_v10  ;;  %308 = vmatpush1.bf16.msra.mxu1 %v832_v12  ;;  %v838_v16 = vld [vmem:[%s1252_s3 + $0x10] ss:$8 sps:$4 sm:$0xff]   ;;  %v837_v17 = vld [vmem:[%s1252_s3 + $0xa0] ss:$8 sps:$4 sm:$0xff]   ;;  %v839_v38 = vld [vmem:[%s1252_s3 + $0xb4] ss:$8 sps:$4 sm:$0xff]  }
   0xc   :  { %309 = vmatprep.subr.bf16.mxu1 %v835_v13  ;;  %v841_v39 = vld [vmem:[%s1252_s3 + $0x24] ss:$8 sps:$4 sm:$0xff]   ;;  %v843_v40 = vld [vmem:[%s1252_s3 + $0xb0] ss:$8 sps:$4 sm:$0xff]   ;;  %v844_v41 = vld [vmem:[%s1252_s3 + $0x20] ss:$8 sps:$4 sm:$0xff]  }
   0xd   :  { %v845_v42 = vld [vmem:[%s1252_s3 + $0xc4] ss:$8 sps:$4 sm:$0xff]   ;;  %v847_v43 = vld [vmem:[%s1252_s3 + $0x34] ss:$8 sps:$4 sm:$0xff]   ;;  %v849_v44 = vld [vmem:[%s1252_s3 + $0xc0] ss:$8 sps:$4 sm:$0xff]  }
   0xe   :  { %189 = vmatpush1.bf16.msra.mxu0 %v831_v14  ;;  %v850_v45 = vld [vmem:[%s1252_s3 + $0x30] ss:$8 sps:$4 sm:$0xff]   ;;  %v851_v46 = vld [vmem:[%s1252_s3 + $0xd4] ss:$8 sps:$4 sm:$0xff]   ;;  %v853_v47 = vld [vmem:[%s1252_s3 + $0x44] ss:$8 sps:$4 sm:$0xff]  }
   0xf   :  { %190 = vmatprep.subr.bf16.mxu0 %v833_v15  ;;  %310 = vmatpush1.bf16.msra.mxu1 %v838_v16  ;;  %v855_v48 = vld [vmem:[%s1252_s3 + $0xd0] ss:$8 sps:$4 sm:$0xff]   ;;  %v856_v49 = vld [vmem:[%s1252_s3 + $0x40] ss:$8 sps:$4 sm:$0xff]   ;;  %v857_v50 = vld [vmem:[%s1252_s3 + $0xe4] ss:$8 sps:$4 sm:$0xff]  }
  0x10   :  { %311 = vmatprep.subr.bf16.mxu1 %v841_v39  ;;  %v859_v51 = vld [vmem:[%s1252_s3 + $0x54] ss:$8 sps:$4 sm:$0xff]   ;;  %v861_v52 = vld [vmem:[%s1252_s3 + $0xe0] ss:$8 sps:$4 sm:$0xff]   ;;  %v862_v53 = vld [vmem:[%s1252_s3 + $0x50] ss:$8 sps:$4 sm:$0xff]  }
  0x11   :  { %v863_v54 = vld [vmem:[%s1252_s3 + $0xf4] ss:$8 sps:$4 sm:$0xff]   ;;  %v865_v55 = vld [vmem:[%s1252_s3 + $0x64] ss:$8 sps:$4 sm:$0xff]   ;;  %v867_v56 = vld [vmem:[%s1252_s3 + $0xf0] ss:$8 sps:$4 sm:$0xff]  }
  0x12   :  { %191 = vmatpush1.bf16.msra.mxu0 %v837_v17  ;;  %v868_v57 = vld [vmem:[%s1252_s3 + $0x60] ss:$8 sps:$4 sm:$0xff]   ;;  %v869_v58 = vld [vmem:[%s1252_s3 + $0x74] ss:$8 sps:$4 sm:$0xff]   ;;  %v873_v59 = vld [vmem:[%s1252_s3 + $0x104] ss:$8 sps:$4 sm:$0xff]  }
  0x13   :  { %192 = vmatprep.subr.bf16.mxu0 %v839_v38  ;;  %312 = vmatpush1.bf16.msra.mxu1 %v844_v41  ;;  %v874_v60 = vld [vmem:[%s1252_s3 + $0x70] ss:$8 sps:$4 sm:$0xff]   ;;  %v952_v61 = vmov 0   ;;  %v880_v62 = vld [vmem:[%s1252_s3 + $0x184] ss:$8 sps:$4 sm:$0xff]   ;;  %s953_s23 = smov [#allocation2]  }
  0x14   :  { %313 = vmatprep.subr.bf16.mxu1 %v847_v43  ;;  %218 = vmatprep.mubr.bf16.mxu0 %v952_v61  ;;  %v1125_v6 = vld [vmem:[%s1250_s1] ss:$0 sm:$0xff]  ;;  %v898_v38 = vld [vmem:[%s1252_s3 + $0x1b4] ss:$8 sps:$4 sm:$0xff]   ;;  %s696_s24 = sshll.u32 %s953_s23, 4  ;;  %s697_s24 = int_to_ptr.vmem [resolvable:$true] %s696_s24 }
  0x15   :  { %339 = vmatprep.mubr.bf16.mxu1 %v952_v61  ;;  %v1131_v8 = vld [vmem:[%s1251_s2] ss:$0 sm:$0xff]  ;;  %v901_v41 = vld [vmem:[%s1252_s3 + $0x154] ss:$8 sps:$4 sm:$0xff]   ;;  %p933_p1 = scmp.lt.s32.totalorder %s697_s24, %s697_s24 }
  0x16   :  { %193 = vmatpush1.bf16.msra.mxu0 %v843_v40  ;;  %v871_v15 = vld [vmem:[%s1252_s3 + $0x100] ss:$8 sps:$4 sm:$0xff]   ;;  %v896_v40 = vld [vmem:[%s1252_s3 + $0x1b0] ss:$8 sps:$4 sm:$0xff]  }
  0x17   :  { %194 = vmatprep.subr.bf16.mxu0 %v845_v42  ;;  %314 = vmatpush1.bf16.msra.mxu1 %v850_v45  ;;  %v893_v39 = vld [vmem:[%s1252_s3 + $0x140] ss:$8 sps:$4 sm:$0xff]   ;;  %v904_v42 = vld [vmem:[%s1252_s3 + $0x1c4] ss:$8 sps:$4 sm:$0xff]  }
  0x18   :  { %315 = vmatprep.subr.bf16.mxu1 %v853_v47  ;;  %v902_v45 = vld [vmem:[%s1252_s3 + $0x1c0] ss:$8 sps:$4 sm:$0xff]   ;;  %v907_v47 = vld [vmem:[%s1252_s3 + $0x164] ss:$8 sps:$4 sm:$0xff]  }
  0x1a   :  { %195 = vmatpush1.bf16.msra.mxu0 %v849_v44  ;;  %v899_v44 = vld [vmem:[%s1252_s3 + $0x150] ss:$8 sps:$4 sm:$0xff]  }
  0x1b   :  { %196 = vmatprep.subr.bf16.mxu0 %v851_v46  ;;  %316 = vmatpush1.bf16.msra.mxu1 %v856_v49 }
  0x1c   :  { %317 = vmatprep.subr.bf16.mxu1 %v859_v51 }
  0x1e   :  { %197 = vmatpush1.bf16.msra.mxu0 %v855_v48  ;;  %v910_v48 = vld [vmem:[%s1252_s3 + $0x1d4] ss:$8 sps:$4 sm:$0xff]  }
  0x1f   :  { %198 = vmatprep.subr.bf16.mxu0 %v857_v50  ;;  %318 = vmatpush1.bf16.msra.mxu1 %v862_v53  ;;  %v905_v50 = vld [vmem:[%s1252_s3 + $0x160] ss:$8 sps:$4 sm:$0xff]   ;;  %v916_v53 = vld [vmem:[%s1252_s3 + $0x1e4] ss:$8 sps:$4 sm:$0xff]  }
  0x20   :  { %319 = vmatprep.subr.bf16.mxu1 %v865_v55  ;;  %v911_v55 = vld [vmem:[%s1252_s3 + $0x170] ss:$8 sps:$4 sm:$0xff]  }
  0x22   :  { %199 = vmatpush1.bf16.msra.mxu0 %v861_v52  ;;  %v913_v52 = vld [vmem:[%s1252_s3 + $0x174] ss:$8 sps:$4 sm:$0xff]  }
  0x23   :  { %200 = vmatprep.subr.bf16.mxu0 %v863_v54  ;;  %320 = vmatpush1.bf16.msra.mxu1 %v868_v57  ;;  %v919_v57 = vld [vmem:[%s1252_s3 + $0x1f4] ss:$8 sps:$4 sm:$0xff]  }
  0x24   :  { %321 = vmatprep.subr.bf16.mxu1 %v869_v58 }
  0x26   :  { %201 = vmatpush1.bf16.msra.mxu0 %v867_v56 }
  0x27   :  { %463 = vmatprep.subr.bf16.mxu0 %v873_v59  ;;  %322 = vmatpush1.bf16.msra.mxu1 %v874_v60  ;;  %v917_v59 = vld [vmem:[%s1252_s3 + $0x1f0] ss:$8 sps:$4 sm:$0xff]  }
  0x28   :  { %621 = vmatprep.subr.bf16.mxu1 %v880_v62 }
  0x90   :  { %v75_v18 = vpop.xlane.xlu0 %74  ;;  %v352_v19 = vpop.xlane.xlu1 %351 }
  0x91   :  { %v76_v20 = vmul.f32 0.0078125, %v75_v18  ;;  %v353_v21 = vmul.f32 0.0078125, %v352_v19  ;;  %v877_v18 = vld [vmem:[%s1252_s3 + $0x114] ss:$8 sps:$4 sm:$0xff]  }
  0x93   :  { %v1030_v22 = vsub.f32 %v706_v0, %v76_v20  ;;  %v1032_v23 = vsub.f32 %v755_v1, %v353_v21  ;;  %v875_v20 = vld [vmem:[%s1252_s3 + $0x110] ss:$8 sps:$4 sm:$0xff]  }
  0x94   :  { %v28_v24 = vpop.xlane.xlu0 %27  ;;  %v510_v25 = vpop.xlane.xlu1 %509 }
  0x95   :  { %v30_v26 = vmul.f32 0.0078125, %v28_v24  ;;  %v511_v27 = vmul.f32 0.0078125, %v510_v25  ;;  %v78_v28 = vmul.f32 %v1030_v22, %v1030_v22  ;;  %v355_v29 = vmul.f32 %v1032_v23, %v1032_v23  ;;  %v878_v25 = vld [vmem:[%s1252_s3 + $0x180] ss:$8 sps:$4 sm:$0xff]  }
  0x97   :  { %v1038_v30 = vsub.f32 %v22_v4, %v30_v26  ;;  %v1040_v31 = vsub.f32 %v788_v5, %v511_v27  ;;  %v79_v32 = vsel %vm25_vm0, %v78_v28, 0.0  ;;  %v356_v33 = vsel %vm25_vm0, %v355_v29, 0.0  ;;  %v883_v27 = vld [vmem:[%s1252_s3 + $0x124] ss:$8 sps:$4 sm:$0xff]   ;;  %v886_v28 = vld [vmem:[%s1252_s3 + $0x194] ss:$8 sps:$4 sm:$0xff]  }
  0x98   :  { %80 = vadd.xlane.f32.xlu0 %v79_v32  ;;  %v884_v32 = vld [vmem:[%s1252_s3 + $0x190] ss:$8 sps:$4 sm:$0xff]  }
  0x99   :  { %v32_v34 = vmul.f32 %v1038_v30, %v1038_v30  ;;  %v513_v35 = vmul.f32 %v1040_v31, %v1040_v31 }
  0x9b   :  { %v33_v36 = vsel %vm25_vm0, %v32_v34, 0.0  ;;  %v514_v37 = vsel %vm25_vm0, %v513_v35, 0.0  ;;  %v892_v34 = vld [vmem:[%s1252_s3 + $0x1a4] ss:$8 sps:$4 sm:$0xff]   ;;  %v887_v35 = vld [vmem:[%s1252_s3 + $0x130] ss:$8 sps:$4 sm:$0xff]  }
  0x9c   :  { %357 = vadd.xlane.f32.xlu0 %v356_v33  ;;  %34 = vadd.xlane.f32.xlu1 %v33_v36  ;;  %v889_v33 = vld [vmem:[%s1252_s3 + $0x134] ss:$8 sps:$4 sm:$0xff]   ;;  %v890_v36 = vld [vmem:[%s1252_s3 + $0x1a0] ss:$8 sps:$4 sm:$0xff]  }
  0xa0   :  { %515 = vadd.xlane.f32.xlu1 %v514_v37  ;;  %v895_v37 = vld [vmem:[%s1252_s3 + $0x144] ss:$8 sps:$4 sm:$0xff]  }
 0x125   :  { %v81_v63 = vpop.xlane.xlu0 %80 }
 0x126   :  { %v82_v0 = vmul.f32 0.0078125, %v81_v63 }
 0x128   :  { %v83_v1 = vadd.f32 1e-06, %v82_v0 }
 0x129   :  { %v35_v2 = vpop.xlane.xlu1 %34  ;;  %v358_v9 = vpop.xlane.xlu0 %357 }
 0x12a   :  { %920 = vrsqrt.f32 %v83_v1  ;;  %v36_v3 = vmul.f32 0.0078125, %v35_v2  ;;  %v359_v14 = vmul.f32 0.0078125, %v358_v9 }
 0x12c   :  { %v37_v4 = vadd.f32 1e-06, %v36_v3 }
 0x12d   :  { %v516_v16 = vpop.xlane.xlu1 %515 }
 0x12e   :  { %922 = vrsqrt.f32 %v37_v4  ;;  %v517_v24 = vmul.f32 0.0078125, %v516_v16 }
 0x130   :  { %v518_v29 = vadd.f32 1e-06, %v517_v24 }
 0x134   :  { %v921_v5 = vpop.eup %920 }
 0x135   :  { %v85_v7 = vmul.f32 %v921_v5, %v1030_v22  ;;  %v360_v22 = vadd.f32 1e-06, %v359_v14 }
 0x137   :  { %v86_v10 = vmul.f32 %v1125_v6, %v85_v7  ;;  %924 = vrsqrt.f32 %v360_v22 }
 0x138   :  { %v923_v11 = vpop.eup %922  ;;  %926 = vrsqrt.f32 %v518_v29 }
 0x139   :  { %v87_v12 = vadd.f32 %v1131_v8, %v86_v10  ;;  %v39_v13 = vmul.f32 %v923_v11, %v1038_v30  ;;  %v881_v30 = vld [vmem:[%s1252_s3 + $0x120] ss:$8 sps:$4 sm:$0xff]   ;;  %v666_v10 = vlaneseq }
 0x13b   :  { %v88_v17 = vpack.c.bf16 %v87_v12, %v87_v12  ;;  %v46_v19 = vmul.f32 %v1125_v6, %v39_v13  ;;  %v667_v11 = vshrl.u32 %v666_v10, 7 }
 0x13d   :  { %219 = vmatmul.mubr.bf16.vlgmr.msra.gmra.mrb[0].mxu0 %v88_v17  ;;  %v53_v21 = vadd.f32 %v1131_v8, %v46_v19  ;;  %v668_v12 = vsub.s32 0, %v667_v11  ;;  %v672_v14 = vsub.s32 1, %v667_v11 }
 0x13e   :  { %464 = vmatpush1.bf16.msra.mxu0 %v871_v15  ;;  %495 = vmatprep.mubr.bf16.mxu0 %v952_v61 }
 0x13f   :  { %465 = vmatprep.subr.bf16.mxu0 %v877_v18  ;;  %v54_v26 = vpack.c.bf16 %v53_v21, %v53_v21 }
 0x141   :  { %340 = vmatmul.mubr.bf16.vlgmr.msra.gmra.mrb[0].mxu1 %v54_v26  ;;  %v925_v43 = vpop.eup %924 }
 0x142   :  { %466 = vmatpush1.bf16.msra.mxu0 %v875_v20  ;;  %622 = vmatpush1.bf16.msra.mxu1 %v878_v25  ;;  %v362_v46 = vmul.f32 %v925_v43, %v1032_v23  ;;  %v927_v49 = vpop.eup %926  ;;  %v908_v23 = vld [vmem:[%s1252_s3 + $0x1d0] ss:$8 sps:$4 sm:$0xff]  }
 0x143   :  { %467 = vmatprep.subr.bf16.mxu0 %v883_v27  ;;  %623 = vmatprep.subr.bf16.mxu1 %v886_v28  ;;  %v520_v51 = vmul.f32 %v927_v49, %v1040_v31  ;;  %v914_v31 = vld [vmem:[%s1252_s3 + $0x1e0] ss:$8 sps:$4 sm:$0xff]  }
 0x144   :  { %653 = vmatprep.mubr.bf16.mxu1 %v952_v61  ;;  %v363_v54 = vmul.f32 %v1125_v6, %v362_v46 }
 0x145   :  { %v521_v58 = vmul.f32 %v1125_v6, %v520_v51 }
 0x146   :  { %468 = vmatpush1.bf16.msra.mxu0 %v881_v30  ;;  %624 = vmatpush1.bf16.msra.mxu1 %v884_v32  ;;  %v364_v56 = vadd.f32 %v1131_v8, %v363_v54 }
 0x147   :  { %469 = vmatprep.subr.bf16.mxu0 %v889_v33  ;;  %625 = vmatprep.subr.bf16.mxu1 %v892_v34  ;;  %v522_v61 = vadd.f32 %v1131_v8, %v521_v58  ;;  %v664_v8 = vld [vmem:[%s1253_s4] sm:$0x3]  ;;  %s928_s4 = scalar_lea.vmem %s697_s24, 64 }
 0x148   :  { %v365_v60 = vpack.c.bf16 %v364_v56, %v364_v56  ;;  %v669_v20 = vrot.slane %v664_v8, %v668_v12  ;;  %v673_v22 = vrot.slane %v664_v8, %v672_v14  ;;  %p929_p0 = scmp.ne.s32.totalorder %s697_s24, %s928_s4  ;;  %p934_p2 = scmp.lt.s32.totalorder %s928_s4, %s928_s4 }
 0x149   :  { %v523_v62 = vpack.c.bf16 %v522_v61, %v522_v61 }
 0x14a   :  { %470 = vmatpush1.bf16.msra.mxu0 %v887_v35  ;;  %626 = vmatpush1.bf16.msra.mxu1 %v890_v36  ;;  %p935_p3 = por %p934_p2, %p933_p1 }
 0x14b   :  { %471 = vmatprep.subr.bf16.mxu0 %v895_v37  ;;  %627 = vmatprep.subr.bf16.mxu1 %v898_v38 }
 0x14c   :  { %p936_p4 = pnand %p935_p3, %p929_p0 }
 0x14e   :  { %472 = vmatpush1.bf16.msra.mxu0 %v893_v39  ;;  %628 = vmatpush1.bf16.msra.mxu1 %v896_v40 }
 0x14f   :  { %473 = vmatprep.subr.bf16.mxu0 %v901_v41  ;;  %629 = vmatprep.subr.bf16.mxu1 %v904_v42 }
 0x152   :  { %474 = vmatpush1.bf16.msra.mxu0 %v899_v44  ;;  %630 = vmatpush1.bf16.msra.mxu1 %v902_v45 }
 0x153   :  { %475 = vmatprep.subr.bf16.mxu0 %v907_v47  ;;  %631 = vmatprep.subr.bf16.mxu1 %v910_v48 }
 0x156   :  { %476 = vmatpush1.bf16.msra.mxu0 %v905_v50  ;;  %632 = vmatpush1.bf16.msra.mxu1 %v908_v23 }
 0x157   :  { %477 = vmatprep.subr.bf16.mxu0 %v913_v52  ;;  %633 = vmatprep.subr.bf16.mxu1 %v916_v53 }
 0x15a   :  { %478 = vmatpush1.bf16.msra.mxu0 %v911_v55  ;;  %634 = vmatpush1.bf16.msra.mxu1 %v914_v31 }
 0x15b   :  { %635 = vmatprep.subr.bf16.mxu1 %v919_v57 }
 0x15d   :  { %496 = vmatmul.mubr.bf16.vlgmr.msra.gmra.mrb[4].mxu0 %v365_v60 }
 0x15e   :  { %636 = vmatpush1.bf16.msra.mxu1 %v917_v59 }
 0x161   :  { %654 = vmatmul.mubr.bf16.vlgmr.msra.gmra.mrb[4].mxu1 %v523_v62 }
 0x210   :  { %v220_v63 = vpop.f32.mrb[0].mxu0 }
 0x211   :  { %v222_v0 = vpop.f32.mrb[1].mxu0 }
 0x212   :  { %v224_v1 = vpop.f32.mrb[2].mxu0 }
 0x213   :  { %v225_v2 = vpop.f32.mrb[3].mxu0 }
 0x214   :  { %v341_v3 = vpop.f32.mrb[0].mxu1 }
 0x215   :  { %v342_v4 = vadd.f32 %v341_v3, %v220_v63  ;;  %v343_v5 = vpop.f32.mrb[1].mxu1 }
 0x216   :  { %v344_v6 = vadd.f32 %v343_v5, %v222_v0  ;;  %v345_v7 = vpop.f32.mrb[2].mxu1 }
 0x217   :  { %v346_v9 = vpop.f32.mrb[3].mxu1 }
 0x230   :  { %v497_v13 = vpop.f32.mrb[4].mxu0 }
 0x231   :  { %v504_v15 = vadd.f32 %v497_v13, %v342_v4  ;;  %v499_v16 = vpop.f32.mrb[5].mxu0 }
 0x232   :  { %v505_v17 = vadd.f32 %v499_v16, %v344_v6  ;;  %v501_v18 = vpop.f32.mrb[6].mxu0 }
 0x233   :  { %v502_v19 = vpop.f32.mrb[7].mxu0 }
 0x234   :  { %v655_v21 = vpop.f32.mrb[4].mxu1 }
 0x235   :  { %v662_v24 = vadd.f32 %v655_v21, %v504_v15  ;;  %v657_v25 = vpop.f32.mrb[5].mxu1 }
 0x236   :  { %v663_v26 = vadd.f32 %v657_v25, %v505_v17  ;;  %v659_v27 = vpop.f32.mrb[6].mxu1 }
 0x237   :  { %v676_v28 = vadd.f32 %v669_v20, %v662_v24  ;;  %v660_v29 = vpop.f32.mrb[7].mxu1 }
 0x238   :  { %v677_v30 = vadd.f32 %v673_v22, %v663_v26 }
 0x23a   :  { %v680_v32 = vcombine.low %v676_v28, %v677_v30 }
 0x23c   :  { %821 = vst.sshfl [vmem:[#allocation2] sm:$0x33 pattern:$0x76325410] %v680_v32 }
 0x23d   :  { %939 = shalt.err (!%p936_p4)
}
 0x23e   :  { %s940_s27 = scalar_lea.hbm %s1254_s5, 64 }
 0x23f   :  { %p941_p5 = scmp.ne.s32.totalorder %s1254_s5, %s940_s27  ;;  %p944_p6 = scmp.lt.u32.totalorder %s940_s27, %s1254_s5 }
 0x241   :  { %p946_p7 = pnand %p944_p6, %p941_p5 }
 0x243   :  { %949 = shalt.err (!%p946_p7)
}
 0x244   :  { %699 = dma.vmem_to_hbm [thread:$0]  %s697_s24, 64, %s1254_s5, [#allocation3]  }
 0x245   :  { %950 = dma.done.wait [#allocation3], 64  }
 0x246   :  { %951 = vsyncadd [#allocation3], 4294967232 }
 0x247   :  { %703 = vsyncpa [#allocation3], 1 }

</bundles_post_ra>
